<compile_context>
chip_gen: v7x
topology: tpu7x:2x2x1
jax: 0.10.0
libtpu: 0.0.40
codegen_flags: <defaults>
</compile_context>

<pallas_src>
import functools

import jax
import jax.numpy as jnp
from jax import lax
from jax.experimental import pallas as pl
from jax.experimental.pallas import tpu as pltpu


_LANE = 128   # channels are padded to the 128-wide lane axis inside VMEM
_PW = 8       # W-halo width per side (sublane-tile aligned)


def _nconv_fused_kernel(x_ref, w_ref, shift_ref, o_ref, pad_ref):
    """Fused n x (3x3 conv + folded-BN shift + ReLU) for one batch element.

    x_ref:     (1, H, W, Cin)      unpadded NHWC input block
    w_ref:     (n, 3, 3*C, C)      bf16 per-(layer, ky) im2col weights
                                   (BN scale folded in; row order = (kx, cin))
    shift_ref: (n, 1, C)           f32 folded shift (BN beta/mean + conv bias)
    o_ref:     (1, H, W, Cout)     unpadded NHWC output of the last layer
    pad_ref:   (H+2, W+2*_PW, C)   f32 VMEM scratch: padded activation buffer
    """
    _, H, W, cin = x_ref.shape
    cout = o_ref.shape[3]
    n_layers = w_ref.shape[0]
    C = w_ref.shape[3]

    # Zero the padded buffer once per batch element: provides the conv zero
    # halo and keeps uninitialized VMEM (possible NaNs) out of padded lanes.
    # (Per-step, not pl.program_id==0, so it is safe under megacore sharding.)
    pad_ref[...] = jnp.zeros_like(pad_ref)

    x = x_ref[0].astype(jnp.float32)                         # (H, W, cin)

    for layer in range(n_layers):                            # static unroll
        if layer == 0:
            # Masked lane store of the true input channels; padded lanes stay 0.
            pad_ref[1:H + 1, _PW:_PW + W, :cin] = x
        else:
            pad_ref[1:H + 1, _PW:_PW + W, :] = x             # all-lane store

        xp = pad_ref[...]                                    # (H+2, W+16, C)
        # One shifted window per kx (3 sublane relayouts per layer); the ky
        # shifts below are free leading-dim slices.
        cols = [xp[:, _PW - 1 + kx:_PW - 1 + kx + W, :] for kx in range(3)]

        # ky-grouped accumulation: 3 dots of K = 3*C into an f32 accumulator.
        acc = None
        for ky in range(3):
            slab = jnp.concatenate([cols[0][ky:ky + H],
                                    cols[1][ky:ky + H],
                                    cols[2][ky:ky + H]], axis=-1)  # (H, W, 3C)
            lhs = slab.reshape(H * W, 3 * C).astype(jnp.bfloat16)
            d = jnp.dot(lhs, w_ref[layer, ky],
                        preferred_element_type=jnp.float32)       # MXU (bf16)
            acc = d if acc is None else acc + d
        act = jnp.maximum(acc + shift_ref[layer], 0.0)        # folded BN + ReLU
        x = act.reshape(H, W, C)                              # f32 carry (VMEM)

    o_ref[0] = x[:, :, :cout].astype(o_ref.dtype)             # drop lane pad


def _round_up(v, m):
    return (v + m - 1) // m * m


def fold_and_pack_params(params):
    """Fold BN scale into conv weights and pack per-(layer, ky) for the kernel.

    params: list of (w (3,3,cin,cout) HWIO, scale (cout,), shift (cout,)).
    Returns:
      w_all     (n, 3, 3*C, C) bf16 -- BN-scale-folded weights, rows = (kx, cin)
      shift_all (n, 1, C)      f32  -- folded shift (BN beta/mean + conv bias)
    with C = channels padded to a multiple of 128 (lane-dense).
    """
    max_ch = max(max(w.shape[2], w.shape[3]) for (w, _, _) in params)
    C = _round_up(max_ch, _LANE)
    w_list, s_list = [], []
    for (w, scale, shift) in params:
        cin, cout = w.shape[2], w.shape[3]
        wf = w.astype(jnp.float32) * scale[None, None, None, :]   # fold BN scale
        wp = jnp.zeros((3, 3, C, C), jnp.float32).at[:, :, :cin, :cout].set(wf)
        sp = jnp.zeros((C,), jnp.float32).at[:cout].set(shift)
        w_list.append(wp.reshape(3, 3 * C, C))      # per-ky rows = (kx, cin)
        s_list.append(sp.reshape(1, C))
    w_all = jnp.stack(w_list).astype(jnp.bfloat16)  # bf16 MXU operand
    shift_all = jnp.stack(s_list)                   # keep shift in f32
    return w_all, shift_all


@functools.partial(jax.jit, static_argnames=("out_channels",))
def nconv_forward(x_nchw, w_all, shift_all, *, out_channels):
    """NConv forward. x_nchw: (B, Cin, H, W) -> (B, out_channels, H, W)."""
    B, Cin, H, W = x_nchw.shape
    n, _, _, C = w_all.shape
    assert W % 8 == 0, "kernel assumes W is a multiple of 8 (sublane tiling)"

    x = jnp.transpose(x_nchw, (0, 2, 3, 1))              # NCHW -> NHWC (once)

    # VMEM budget: double-buffered blocks + padded scratch + intermediates.
    est = (2 * H * W * Cin * 4                           # input block
           + 2 * H * W * out_channels * 4                # output block
           + 2 * int(w_all.size) * 2                     # bf16 weights
           + 2 * int(shift_all.size) * 4
           + (H + 2) * (W + 2 * _PW) * C * 4             # padded scratch
           + 10 * H * W * C * 4)                         # slab/acc/act headroom
    vmem_limit = int(min(max(2 * est, 32 * 1024 * 1024), 56 * 1024 * 1024))

    out = pl.pallas_call(
        _nconv_fused_kernel,
        out_shape=jax.ShapeDtypeStruct((B, H, W, out_channels), jnp.float32),
        grid_spec=pltpu.PrefetchScalarGridSpec(
            num_scalar_prefetch=0,
            grid=(B,),
            in_specs=[
                pl.BlockSpec((1, H, W, Cin), lambda b: (b, 0, 0, 0)),
                pl.BlockSpec((n, 3, 3 * C, C), lambda b: (0, 0, 0, 0)),
                pl.BlockSpec((n, 1, C), lambda b: (0, 0, 0)),
            ],
            out_specs=pl.BlockSpec((1, H, W, out_channels),
                                   lambda b: (b, 0, 0, 0)),
            scratch_shapes=[
                pltpu.VMEM((H + 2, W + 2 * _PW, C), jnp.float32)],
        ),
        compiler_params=pltpu.CompilerParams(
            dimension_semantics=("parallel",),
            vmem_limit_bytes=vmem_limit),
    )(x, w_all, shift_all)

    return jnp.transpose(out, (0, 3, 1, 2))              # NHWC -> NCHW (once)


def init_nconv_params(key, n, in_channels, out_channels, eps=1e-5):
    """Deterministic parameters for n (conv3x3 + BN + ReLU) blocks."""
    params = []
    cin = in_channels
    for i in range(n):
        k = jax.random.fold_in(key, i)
        kw, kb, kg, kbeta, km, kv = jax.random.split(k, 6)
        w = jax.random.normal(kw, (3, 3, cin, out_channels), jnp.float32) * 0.1
        b = jax.random.normal(kb, (out_channels,), jnp.float32) * 0.1
        gamma = 1.0 + 0.1 * jax.random.normal(kg, (out_channels,), jnp.float32)
        beta = 0.1 * jax.random.normal(kbeta, (out_channels,), jnp.float32)
        running_mean = 0.1 * jax.random.normal(km, (out_channels,), jnp.float32)
        running_var = jnp.abs(
            1.0 + 0.1 * jax.random.normal(kv, (out_channels,), jnp.float32))
        # Fold BN + conv bias: BN(conv(x) + b) = scale*conv(x) + shift
        scale = gamma / jnp.sqrt(running_var + eps)
        shift = beta + scale * (b - running_mean)
        params.append((w, scale, shift))
        cin = out_channels
    return params


def nconv_reference(x_nchw, params):
    """Pure-JAX reference (lax.conv, f32) for correctness checking."""
    x = jnp.transpose(x_nchw, (0, 2, 3, 1))
    for (w, scale, shift) in params:
        y = lax.conv_general_dilated(
            x, w, window_strides=(1, 1), padding="SAME",
            dimension_numbers=("NHWC", "HWIO", "NHWC"))
        x = jnp.maximum(y * scale + shift, 0.0)
    return jnp.transpose(x, (0, 3, 1, 2))


if __name__ == "__main__":
    key = jax.random.PRNGKey(0)
    k_x, k_p = jax.random.split(key)

    n = 2
    in_channels, out_channels = 4, 8
    B, H, W = 2, 16, 16

    x = jax.random.normal(k_x, (B, in_channels, H, W), jnp.float32)
    params = init_nconv_params(k_p, n, in_channels, out_channels)
    w_all, shift_all = fold_and_pack_params(params)

    out = nconv_forward(x, w_all, shift_all, out_channels=out_channels)
    out = jax.block_until_ready(out)

    ref = nconv_reference(x, params)
    assert out.shape == (B, out_channels, H, W)
    # bf16 MXU operands -> loosened tolerance vs. the f32 reference.
    assert jnp.allclose(out, ref, atol=2e-2, rtol=2e-2), "mismatch vs reference"

    print("KERNEL_OK")
</pallas_src>

<mosaic_0001>
module attributes {stable_mosaic.version = 11 : i64} {
  func.func @_nconv_fused_kernel(%arg0: i32, %arg1: memref<1x16x16x4xf32, #tpu.memory_space<vmem>>, %arg2: memref<2x3x384x128xbf16, #tpu.memory_space<vmem>>, %arg3: memref<2x1x128xf32, #tpu.memory_space<vmem>>, %arg4: memref<1x16x16x8xf32, #tpu.memory_space<vmem>>, %arg5: memref<18x32x128xf32, #tpu.memory_space<vmem>>) attributes {dimension_semantics = [#tpu.dimension_semantics<parallel>], iteration_bounds = array<i64: 2>, scalar_prefetch = 0 : i64, scratch_operands = 1 : i64, tpu.core_type = #tpu.core_type<tc>, window_params = [{transform_indices = @transform_0, window_bounds = array<i64: 1, 16, 16, 4>}, {pipeline_mode = #tpu.pipeline_mode<synchronous>, transform_indices = @transform_1, window_bounds = array<i64: 2, 3, 384, 128>}, {pipeline_mode = #tpu.pipeline_mode<synchronous>, transform_indices = @transform_2, window_bounds = array<i64: 2, 1, 128>}, {transform_indices = @transform_3, window_bounds = array<i64: 1, 16, 16, 8>}]} {
    %cst = arith.constant 0.000000e+00 : f32
    %0 = vector.broadcast %cst : f32 to vector<18x32x128xf32>
    %c0 = arith.constant 0 : index
    %c0_0 = arith.constant 0 : index
    %c0_1 = arith.constant 0 : index
    %1 = vector.load %arg5[%c0, %c0_0, %c0_1] : memref<18x32x128xf32, #tpu.memory_space<vmem>>, vector<18x32x128xf32>
    tpu.vector_store %arg5[%c0, %c0_0, %c0_1], %0 {strides = array<i32>} : memref<18x32x128xf32, #tpu.memory_space<vmem>>, vector<18x32x128xf32>,
    %c0_2 = arith.constant 0 : index
    %c0_3 = arith.constant 0 : index
    %c0_4 = arith.constant 0 : index
    %c0_5 = arith.constant 0 : index
    %2 = vector.load %arg1[%c0_2, %c0_3, %c0_4, %c0_5] : memref<1x16x16x4xf32, #tpu.memory_space<vmem>>, vector<1x16x16x4xf32>
    %3 = vector.shape_cast %2 : vector<1x16x16x4xf32> to vector<16x16x4xf32>
    %c1 = arith.constant 1 : index
    %c8 = arith.constant 8 : index
    %c0_6 = arith.constant 0 : index
    %4 = vector.load %arg5[%c1, %c8, %c0_6] : memref<18x32x128xf32, #tpu.memory_space<vmem>>, vector<16x16x4xf32>
    tpu.vector_store %arg5[%c1, %c8, %c0_6], %3 {strides = array<i32>} : memref<18x32x128xf32, #tpu.memory_space<vmem>>, vector<16x16x4xf32>,
    %c0_7 = arith.constant 0 : index
    %c0_8 = arith.constant 0 : index
    %c0_9 = arith.constant 0 : index
    %5 = vector.load %arg5[%c0_7, %c0_8, %c0_9] : memref<18x32x128xf32, #tpu.memory_space<vmem>>, vector<18x32x128xf32>
    %6 = vector.extract_strided_slice %5 {offsets = [0, 7, 0], sizes = [18, 16, 128], strides = [1, 1, 1]} : vector<18x32x128xf32> to vector<18x16x128xf32>
    %7 = vector.extract_strided_slice %5 {offsets = [0, 8, 0], sizes = [18, 16, 128], strides = [1, 1, 1]} : vector<18x32x128xf32> to vector<18x16x128xf32>
    %8 = vector.extract_strided_slice %5 {offsets = [0, 9, 0], sizes = [18, 16, 128], strides = [1, 1, 1]} : vector<18x32x128xf32> to vector<18x16x128xf32>
    %9 = vector.extract_strided_slice %6 {offsets = [0, 0, 0], sizes = [16, 16, 128], strides = [1, 1, 1]} : vector<18x16x128xf32> to vector<16x16x128xf32>
    %10 = vector.extract_strided_slice %7 {offsets = [0, 0, 0], sizes = [16, 16, 128], strides = [1, 1, 1]} : vector<18x16x128xf32> to vector<16x16x128xf32>
    %11 = vector.extract_strided_slice %8 {offsets = [0, 0, 0], sizes = [16, 16, 128], strides = [1, 1, 1]} : vector<18x16x128xf32> to vector<16x16x128xf32>
    %12 = tpu.concatenate %9, %10, %11 in 2 : vector<16x16x128xf32>, vector<16x16x128xf32>, vector<16x16x128xf32> -> vector<16x16x384xf32>
    %13 = vector.shape_cast %12 : vector<16x16x384xf32> to vector<256x384xf32>
    %14 = arith.truncf %13 : vector<256x384xf32> to vector<256x384xbf16>
    %c0_10 = arith.constant 0 : index
    %c0_11 = arith.constant 0 : index
    %c0_12 = arith.constant 0 : index
    %c0_13 = arith.constant 0 : index
    %15 = vector.load %arg2[%c0_10, %c0_11, %c0_12, %c0_13] : memref<2x3x384x128xbf16, #tpu.memory_space<vmem>>, vector<1x1x384x128xbf16>
    %16 = vector.shape_cast %15 : vector<1x1x384x128xbf16> to vector<384x128xbf16>
    %cst_14 = arith.constant dense<0.000000e+00> : vector<256x128xf32>
    %17 = tpu.matmul %14, %16, %cst_14 {dimension_numbers = #tpu.dot_dimension_numbers<[1], [0], [0], [1], [0, 0, 1, 1], [], []>} : vector<256x384xbf16>, vector<384x128xbf16>, vector<256x128xf32> -> vector<256x128xf32>
    %18 = vector.extract_strided_slice %6 {offsets = [1, 0, 0], sizes = [16, 16, 128], strides = [1, 1, 1]} : vector<18x16x128xf32> to vector<16x16x128xf32>
    %19 = vector.extract_strided_slice %7 {offsets = [1, 0, 0], sizes = [16, 16, 128], strides = [1, 1, 1]} : vector<18x16x128xf32> to vector<16x16x128xf32>
    %20 = vector.extract_strided_slice %8 {offsets = [1, 0, 0], sizes = [16, 16, 128], strides = [1, 1, 1]} : vector<18x16x128xf32> to vector<16x16x128xf32>
    %21 = tpu.concatenate %18, %19, %20 in 2 : vector<16x16x128xf32>, vector<16x16x128xf32>, vector<16x16x128xf32> -> vector<16x16x384xf32>
    %22 = vector.shape_cast %21 : vector<16x16x384xf32> to vector<256x384xf32>
    %23 = arith.truncf %22 : vector<256x384xf32> to vector<256x384xbf16>
    %c0_15 = arith.constant 0 : index
    %c1_16 = arith.constant 1 : index
    %c0_17 = arith.constant 0 : index
    %c0_18 = arith.constant 0 : index
    %24 = vector.load %arg2[%c0_15, %c1_16, %c0_17, %c0_18] : memref<2x3x384x128xbf16, #tpu.memory_space<vmem>>, vector<1x1x384x128xbf16>
    %25 = vector.shape_cast %24 : vector<1x1x384x128xbf16> to vector<384x128xbf16>
    %cst_19 = arith.constant dense<0.000000e+00> : vector<256x128xf32>
    %26 = tpu.matmul %23, %25, %cst_19 {dimension_numbers = #tpu.dot_dimension_numbers<[1], [0], [0], [1], [0, 0, 1, 1], [], []>} : vector<256x384xbf16>, vector<384x128xbf16>, vector<256x128xf32> -> vector<256x128xf32>
    %27 = arith.addf %17, %26 : vector<256x128xf32>
    %28 = vector.extract_strided_slice %6 {offsets = [2, 0, 0], sizes = [16, 16, 128], strides = [1, 1, 1]} : vector<18x16x128xf32> to vector<16x16x128xf32>
    %29 = vector.extract_strided_slice %7 {offsets = [2, 0, 0], sizes = [16, 16, 128], strides = [1, 1, 1]} : vector<18x16x128xf32> to vector<16x16x128xf32>
    %30 = vector.extract_strided_slice %8 {offsets = [2, 0, 0], sizes = [16, 16, 128], strides = [1, 1, 1]} : vector<18x16x128xf32> to vector<16x16x128xf32>
    %31 = tpu.concatenate %28, %29, %30 in 2 : vector<16x16x128xf32>, vector<16x16x128xf32>, vector<16x16x128xf32> -> vector<16x16x384xf32>
    %32 = vector.shape_cast %31 : vector<16x16x384xf32> to vector<256x384xf32>
    %33 = arith.truncf %32 : vector<256x384xf32> to vector<256x384xbf16>
    %c0_20 = arith.constant 0 : index
    %c2 = arith.constant 2 : index
    %c0_21 = arith.constant 0 : index
    %c0_22 = arith.constant 0 : index
    %34 = vector.load %arg2[%c0_20, %c2, %c0_21, %c0_22] : memref<2x3x384x128xbf16, #tpu.memory_space<vmem>>, vector<1x1x384x128xbf16>
    %35 = vector.shape_cast %34 : vector<1x1x384x128xbf16> to vector<384x128xbf16>
    %cst_23 = arith.constant dense<0.000000e+00> : vector<256x128xf32>
    %36 = tpu.matmul %33, %35, %cst_23 {dimension_numbers = #tpu.dot_dimension_numbers<[1], [0], [0], [1], [0, 0, 1, 1], [], []>} : vector<256x384xbf16>, vector<384x128xbf16>, vector<256x128xf32> -> vector<256x128xf32>
    %37 = arith.addf %27, %36 : vector<256x128xf32>
    %c0_24 = arith.constant 0 : index
    %c0_25 = arith.constant 0 : index
    %c0_26 = arith.constant 0 : index
    %38 = vector.load %arg3[%c0_24, %c0_25, %c0_26] : memref<2x1x128xf32, #tpu.memory_space<vmem>>, vector<1x1x128xf32>
    %39 = vector.shape_cast %38 : vector<1x1x128xf32> to vector<1x128xf32>
    %40 = vector.broadcast %39 : vector<1x128xf32> to vector<256x128xf32>
    %41 = arith.addf %37, %40 : vector<256x128xf32>
    %cst_27 = arith.constant 0.000000e+00 : f32
    %42 = vector.broadcast %cst_27 : f32 to vector<256x128xf32>
    %43 = arith.maximumf %41, %42 : vector<256x128xf32>
    %44 = vector.shape_cast %43 : vector<256x128xf32> to vector<16x16x128xf32>
    %c1_28 = arith.constant 1 : index
    %c8_29 = arith.constant 8 : index
    %c0_30 = arith.constant 0 : index
    %45 = vector.load %arg5[%c1_28, %c8_29, %c0_30] : memref<18x32x128xf32, #tpu.memory_space<vmem>>, vector<16x16x128xf32>
    tpu.vector_store %arg5[%c1_28, %c8_29, %c0_30], %44 {strides = array<i32>} : memref<18x32x128xf32, #tpu.memory_space<vmem>>, vector<16x16x128xf32>,
    %c0_31 = arith.constant 0 : index
    %c0_32 = arith.constant 0 : index
    %c0_33 = arith.constant 0 : index
    %46 = vector.load %arg5[%c0_31, %c0_32, %c0_33] : memref<18x32x128xf32, #tpu.memory_space<vmem>>, vector<18x32x128xf32>
    %47 = vector.extract_strided_slice %46 {offsets = [0, 7, 0], sizes = [18, 16, 128], strides = [1, 1, 1]} : vector<18x32x128xf32> to vector<18x16x128xf32>
    %48 = vector.extract_strided_slice %46 {offsets = [0, 8, 0], sizes = [18, 16, 128], strides = [1, 1, 1]} : vector<18x32x128xf32> to vector<18x16x128xf32>
    %49 = vector.extract_strided_slice %46 {offsets = [0, 9, 0], sizes = [18, 16, 128], strides = [1, 1, 1]} : vector<18x32x128xf32> to vector<18x16x128xf32>
    %50 = vector.extract_strided_slice %47 {offsets = [0, 0, 0], sizes = [16, 16, 128], strides = [1, 1, 1]} : vector<18x16x128xf32> to vector<16x16x128xf32>
    %51 = vector.extract_strided_slice %48 {offsets = [0, 0, 0], sizes = [16, 16, 128], strides = [1, 1, 1]} : vector<18x16x128xf32> to vector<16x16x128xf32>
    %52 = vector.extract_strided_slice %49 {offsets = [0, 0, 0], sizes = [16, 16, 128], strides = [1, 1, 1]} : vector<18x16x128xf32> to vector<16x16x128xf32>
    %53 = tpu.concatenate %50, %51, %52 in 2 : vector<16x16x128xf32>, vector<16x16x128xf32>, vector<16x16x128xf32> -> vector<16x16x384xf32>
    %54 = vector.shape_cast %53 : vector<16x16x384xf32> to vector<256x384xf32>
    %55 = arith.truncf %54 : vector<256x384xf32> to vector<256x384xbf16>
    %c1_34 = arith.constant 1 : index
    %c0_35 = arith.constant 0 : index
    %c0_36 = arith.constant 0 : index
    %c0_37 = arith.constant 0 : index
    %56 = vector.load %arg2[%c1_34, %c0_35, %c0_36, %c0_37] : memref<2x3x384x128xbf16, #tpu.memory_space<vmem>>, vector<1x1x384x128xbf16>
    %57 = vector.shape_cast %56 : vector<1x1x384x128xbf16> to vector<384x128xbf16>
    %cst_38 = arith.constant dense<0.000000e+00> : vector<256x128xf32>
    %58 = tpu.matmul %55, %57, %cst_38 {dimension_numbers = #tpu.dot_dimension_numbers<[1], [0], [0], [1], [0, 0, 1, 1], [], []>} : vector<256x384xbf16>, vector<384x128xbf16>, vector<256x128xf32> -> vector<256x128xf32>
    %59 = vector.extract_strided_slice %47 {offsets = [1, 0, 0], sizes = [16, 16, 128], strides = [1, 1, 1]} : vector<18x16x128xf32> to vector<16x16x128xf32>
    %60 = vector.extract_strided_slice %48 {offsets = [1, 0, 0], sizes = [16, 16, 128], strides = [1, 1, 1]} : vector<18x16x128xf32> to vector<16x16x128xf32>
    %61 = vector.extract_strided_slice %49 {offsets = [1, 0, 0], sizes = [16, 16, 128], strides = [1, 1, 1]} : vector<18x16x128xf32> to vector<16x16x128xf32>
    %62 = tpu.concatenate %59, %60, %61 in 2 : vector<16x16x128xf32>, vector<16x16x128xf32>, vector<16x16x128xf32> -> vector<16x16x384xf32>
    %63 = vector.shape_cast %62 : vector<16x16x384xf32> to vector<256x384xf32>
    %64 = arith.truncf %63 : vector<256x384xf32> to vector<256x384xbf16>
    %c1_39 = arith.constant 1 : index
    %c1_40 = arith.constant 1 : index
    %c0_41 = arith.constant 0 : index
    %c0_42 = arith.constant 0 : index
    %65 = vector.load %arg2[%c1_39, %c1_40, %c0_41, %c0_42] : memref<2x3x384x128xbf16, #tpu.memory_space<vmem>>, vector<1x1x384x128xbf16>
    %66 = vector.shape_cast %65 : vector<1x1x384x128xbf16> to vector<384x128xbf16>
    %cst_43 = arith.constant dense<0.000000e+00> : vector<256x128xf32>
    %67 = tpu.matmul %64, %66, %cst_43 {dimension_numbers = #tpu.dot_dimension_numbers<[1], [0], [0], [1], [0, 0, 1, 1], [], []>} : vector<256x384xbf16>, vector<384x128xbf16>, vector<256x128xf32> -> vector<256x128xf32>
    %68 = arith.addf %58, %67 : vector<256x128xf32>
    %69 = vector.extract_strided_slice %47 {offsets = [2, 0, 0], sizes = [16, 16, 128], strides = [1, 1, 1]} : vector<18x16x128xf32> to vector<16x16x128xf32>
    %70 = vector.extract_strided_slice %48 {offsets = [2, 0, 0], sizes = [16, 16, 128], strides = [1, 1, 1]} : vector<18x16x128xf32> to vector<16x16x128xf32>
    %71 = vector.extract_strided_slice %49 {offsets = [2, 0, 0], sizes = [16, 16, 128], strides = [1, 1, 1]} : vector<18x16x128xf32> to vector<16x16x128xf32>
    %72 = tpu.concatenate %69, %70, %71 in 2 : vector<16x16x128xf32>, vector<16x16x128xf32>, vector<16x16x128xf32> -> vector<16x16x384xf32>
    %73 = vector.shape_cast %72 : vector<16x16x384xf32> to vector<256x384xf32>
    %74 = arith.truncf %73 : vector<256x384xf32> to vector<256x384xbf16>
    %c1_44 = arith.constant 1 : index
    %c2_45 = arith.constant 2 : index
    %c0_46 = arith.constant 0 : index
    %c0_47 = arith.constant 0 : index
    %75 = vector.load %arg2[%c1_44, %c2_45, %c0_46, %c0_47] : memref<2x3x384x128xbf16, #tpu.memory_space<vmem>>, vector<1x1x384x128xbf16>
    %76 = vector.shape_cast %75 : vector<1x1x384x128xbf16> to vector<384x128xbf16>
    %cst_48 = arith.constant dense<0.000000e+00> : vector<256x128xf32>
    %77 = tpu.matmul %74, %76, %cst_48 {dimension_numbers = #tpu.dot_dimension_numbers<[1], [0], [0], [1], [0, 0, 1, 1], [], []>} : vector<256x384xbf16>, vector<384x128xbf16>, vector<256x128xf32> -> vector<256x128xf32>
    %78 = arith.addf %68, %77 : vector<256x128xf32>
    %c1_49 = arith.constant 1 : index
    %c0_50 = arith.constant 0 : index
    %c0_51 = arith.constant 0 : index
    %79 = vector.load %arg3[%c1_49, %c0_50, %c0_51] : memref<2x1x128xf32, #tpu.memory_space<vmem>>, vector<1x1x128xf32>
    %80 = vector.shape_cast %79 : vector<1x1x128xf32> to vector<1x128xf32>
    %81 = vector.broadcast %80 : vector<1x128xf32> to vector<256x128xf32>
    %82 = arith.addf %78, %81 : vector<256x128xf32>
    %cst_52 = arith.constant 0.000000e+00 : f32
    %83 = vector.broadcast %cst_52 : f32 to vector<256x128xf32>
    %84 = arith.maximumf %82, %83 : vector<256x128xf32>
    %85 = vector.shape_cast %84 : vector<256x128xf32> to vector<16x16x128xf32>
    %86 = vector.extract_strided_slice %85 {offsets = [0, 0, 0], sizes = [16, 16, 8], strides = [1, 1, 1]} : vector<16x16x128xf32> to vector<16x16x8xf32>
    %c0_53 = arith.constant 0 : index
    %c0_54 = arith.constant 0 : index
    %c0_55 = arith.constant 0 : index
    %c0_56 = arith.constant 0 : index
    %87 = vector.load %arg4[%c0_53, %c0_54, %c0_55, %c0_56] : memref<1x16x16x8xf32, #tpu.memory_space<vmem>>, vector<1x16x16x8xf32>
    %88 = vector.shape_cast %87 : vector<1x16x16x8xf32> to vector<16x16x8xf32>
    %89 = vector.shape_cast %86 : vector<16x16x8xf32> to vector<1x16x16x8xf32>
    tpu.vector_store %arg4[%c0_53, %c0_54, %c0_55, %c0_56], %89 {strides = array<i32>} : memref<1x16x16x8xf32, #tpu.memory_space<vmem>>, vector<1x16x16x8xf32>,
    return
  }
  func.func @transform_0(%arg0: i32) -> (i32, i32, i32, i32) {
    %c0_i32 = arith.constant 0 : i32
    %c0_i32_0 = arith.constant 0 : i32
    %c0_i32_1 = arith.constant 0 : i32
    %c0_i32_2 = arith.constant 0 : i32
    return %arg0, %c0_i32, %c0_i32_0, %c0_i32_1 : i32, i32, i32, i32
  }
  func.func @transform_1(%arg0: i32) -> (i32, i32, i32, i32) {
    %c0_i32 = arith.constant 0 : i32
    %c0_i32_0 = arith.constant 0 : i32
    %c0_i32_1 = arith.constant 0 : i32
    %c0_i32_2 = arith.constant 0 : i32
    %c0_i32_3 = arith.constant 0 : i32
    return %c0_i32, %c0_i32_0, %c0_i32_1, %c0_i32_2 : i32, i32, i32, i32
  }
  func.func @transform_2(%arg0: i32) -> (i32, i32, i32) {
    %c0_i32 = arith.constant 0 : i32
    %c0_i32_0 = arith.constant 0 : i32
    %c0_i32_1 = arith.constant 0 : i32
    %c0_i32_2 = arith.constant 0 : i32
    return %c0_i32, %c0_i32_0, %c0_i32_1 : i32, i32, i32
  }
  func.func @transform_3(%arg0: i32) -> (i32, i32, i32, i32) {
    %c0_i32 = arith.constant 0 : i32
    %c0_i32_0 = arith.constant 0 : i32
    %c0_i32_1 = arith.constant 0 : i32
    %c0_i32_2 = arith.constant 0 : i32
    return %arg0, %c0_i32, %c0_i32_0, %c0_i32_1 : i32, i32, i32, i32
  }
}

</mosaic_0001>

<bundles_post_ra>
// kernel: nconv_forward.1
= control target key start
LH: loop header
LB: loop body
LE: loop exit
PB: predicated region body
PF: predicated region fallthrough
CT: control target
= control target key end

     0   :  { %8 = vsyncpa [#allocation4], 0  ;;  %s7020_s12 = smov 0   ;;  %s9218_s0 = inlined_call_operand.vmem [shape: f32[2,16,16,4], index: 0, kind: input, shape index: {}]   ;;  %s9219_s1 = inlined_call_operand.hbm [shape: bf16[2,3,384,128], index: 1, kind: input, shape index: {}]   ;;  %s9220_s2 = inlined_call_operand.vmem [shape: f32[2,1,128], index: 2, kind: input, shape index: {}]   ;;  %s9221_s3 = inlined_call_operand.vmem [shape: f32[2,16,16,8], index: 3, kind: output, shape index: {}]  }
   0x1 LB: > { %s7026_s13 = sadd.s32 4294967295, %s6994_s12   ;;  %p5198_p0 = scmp.ge.s32.totalorder %s6994_s12, 1  ;;  %s6994_s12 = sphi %s7020_s12, %s14_s12  }
   0x2   : > { %p113_p1 = scmp.lt.s32.totalorder %s6994_s12, 3  ;;  %s6996_s14 = smov [#allocation3]  }
   0x3   : > { %s125_s15 = sshll.u32 %s6996_s14, 4  ;;  %p9222_p3 = scmp.eq.s32.totalorder %s7026_s13, 0  ;;  %s126_s15 = int_to_ptr.vmem [resolvable:$true] %s125_s15 }
   0x4   : > { %p7030_p2 = pnand %p5198_p0, %p113_p1  ;;  %s6956_s20 = scalar_lea.hbm %s9219_s1, 18432 }
   0x5   : > { %p6957_p6 = scmp.ne.s32.totalorder %s9219_s1, %s6956_s20  ;;  %p6963_p10 = scmp.lt.u32.totalorder %s6956_s20, %s9219_s1 }
   0x6   : > { %s9266_s16 = scalar_select %p7030_p2, 1, 0 }
   0x7   : > { %p6786_p4 = pneg %p7030_p2 }
   0x9   : > { %p7039_p5 = pnand %p9222_p3, %p6786_p4 }
   0xb   : > { %p6958_p7 = pneg %p7039_p5 }
   0xd   : > { %p6959_p8 = pnand %p6958_p7, %p6957_p6 }
   0xf   : > { %p6960_p9 = pneg %p6959_p8 }
  0x11   : > { %p6965_p11 = pnand %p6963_p10, %p6960_p9 }
  0x13   : > { %6968 = shalt.err (!%p6965_p11)
}
  0x14   : > { %s6969_s25 = scalar_lea.vmem %s126_s15, 18432  ;;  %p6977_p1 = scmp.lt.s32.totalorder %s126_s15, %s126_s15 }
  0x15   : > { %p6970_p12 = scmp.ne.s32.totalorder %s126_s15, %s6969_s25  ;;  %p6978_p4 = scmp.lt.s32.totalorder %s6969_s25, %s6969_s25 }
  0x17   : > { %p6972_p13 = pnand %p6970_p12, %p6958_p7  ;;  %p6979_p3 = por %p6978_p4, %p6977_p1 }
  0x19   : > { %p6973_p0 = pneg %p6972_p13 }
  0x1b   : > { %p6980_p2 = pnand %p6979_p3, %p6973_p0 }
  0x1d   : > { %6983 = shalt.err (!%p6980_p2)
}
  0x1e   : > { %s6997_s26 = smov 64   ;;  %s6998_s27 = smov 4  }
  0x1f   : > { %6789 = dma.hbm_to_vmem [thread:$0]  (!%p7039_p5), %s9219_s1, 18432, %s126_s15, [#allocation4], %s6997_s26, %s6997_s26, %s6998_s27  }
  0x20   : > { %p9268_p6 = scmp.ne.s32.totalorder %s9266_s16, 0 }
  0x22   : > { %152 = sbr.rel (%p9268_p6) target bundleno = 1113 (0x459), region = 32 }
  0x29   : > { %p9269_p8 = scmp.eq.s32.totalorder %s7026_s13, 0 }
  0x2b   : > { %6989 = dma.done.wait (%p9269_p8), [#allocation4], 18432   ;;  %p9270_p7 = pmov %p9269_p8 }
  0x2c   : > { %vm429_vm0 = vcmask 1046528   ;;  %v6999_v0 = vmov 0.0   ;;  %vm591_vm1 = vcmask 1040384   ;;  %v6804_v4 = vld [vmem:[#allocation3 + $0x100] sm:$0xff]   ;;  %v6808_v9 = vld [vmem:[#allocation3 + $0x108] sm:$0xff]   ;;  %v6812_v13 = vld [vmem:[#allocation3 + $0x110] sm:$0xff]  }
  0x2d   : > { %6991 = vsyncadd (%p9270_p7), [#allocation4], 4294948864  ;;  %192 = vst [vmem:[#allocation2 + $0x28] sm:$0xff] %v6999_v0  ;;  %v430_v1 = vrot.slane %v6999_v0, 1  ;;  %v6805_v6 = vld [vmem:[#allocation3 + $0xc0] sm:$0xff]   ;;  %5358 = vmatprep.subr.bf16.mxu0 %v6804_v4  ;;  %v6809_v10 = vld [vmem:[#allocation3 + $0xc8] sm:$0xff]  }
  0x2e   : > { %193 = vst [vmem:[#allocation2 + $0x30] sm:$0xff] %v6999_v0  ;;  %187 = vst [vmem:[#allocation2] sm:$0xff] %v6999_v0  ;;  %v6806_v7 = vld [vmem:[#allocation3 + $0x40] sm:$0xff]   ;;  %5359 = vmatpush3.bf16.msra.mxu0 %v6805_v6  ;;  %v6810_v11 = vld [vmem:[#allocation3 + $0x48] sm:$0xff]   ;;  %p176_p2 = scmp.lt.s32.totalorder %s7026_s13, 1  ;;  %v7105_v31 = vrot.slane %v6999_v0, 7 }
  0x2f   : > { %196 = vst [vmem:[#allocation2 + $0x48] sm:$0xff] %v6999_v0  ;;  %197 = vst [vmem:[#allocation2 + $0x50] sm:$0xff] %v6999_v0  ;;  %v595_v2 = vrot.slane %v430_v1, 7  ;;  %v6807_v8 = vld [vmem:[#allocation3] sm:$0xff]   ;;  %5494 = vmatprep.subr.bf16.mxu1 %v6806_v7  ;;  %5360 = vmatprep.subr.bf16.mxu0 %v6808_v9  ;;  %v6811_v12 = vld [vmem:[#allocation3 + $0x8] sm:$0xff]   ;;  %vm292_vm2 = vcmask 31744  }
  0x30   : > { %200 = vst [vmem:[#allocation2 + $0x68] sm:$0xff] %v6999_v0  ;;  %201 = vst [vmem:[#allocation2 + $0x70] sm:$0xff] %v6999_v0  ;;  %5495 = vmatpush3.bf16.msra.mxu1 %v6807_v8  ;;  %v6813_v14 = vld [vmem:[#allocation3 + $0xd0] sm:$0xff]   ;;  %v6816_v17 = vld [vmem:[#allocation3 + $0x118] sm:$0xff]   ;;  %s9390_s13 = smov (!%p176_p2, %s7026_s13), 1  ;;  %v928_v40 = vpack.c.bf16 %v7105_v31, %v7105_v31  ;;  %vm494_vm3 = vcmask 1045504  }
  0x31   : > { %204 = vst [vmem:[#allocation2 + $0x88] sm:$0xff] %v6999_v0  ;;  %205 = vst [vmem:[#allocation2 + $0x90] sm:$0xff] %v6999_v0  ;;  %v597_v3 = vsel %vm591_vm1, %v595_v2, %v595_v2  ;;  %5496 = vmatprep.subr.bf16.mxu1 %v6810_v11  ;;  %v6814_v15 = vld [vmem:[#allocation3 + $0x50] sm:$0xff]   ;;  %v6817_v18 = vld [vmem:[#allocation3 + $0xd8] sm:$0xff]   ;;  %s5356_s30 = sshll.u32 %s9390_s13, 8  ;;  %vm5096_vm4 = vcmask 64512  }
  0x32   : > { %208 = vst [vmem:[#allocation2 + $0xa8] sm:$0xff] %v6999_v0  ;;  %209 = vst [vmem:[#allocation2 + $0xb0] sm:$0xff] %v6999_v0  ;;  %v929_v5 = vpack.c.bf16 %v597_v3, %v597_v3  ;;  %5361 = vmatpush3.bf16.msra.mxu0 %v6809_v10  ;;  %v6815_v16 = vld [vmem:[#allocation3 + $0x10] sm:$0xff]   ;;  %v6818_v19 = vld [vmem:[#allocation3 + $0x58] sm:$0xff]   ;;  %s7113_s6 = scalar_lea.vmem %s9218_s0, %s5356_s30  ;;  %s9089_s17 = scalar_lea.vmem %s9221_s3, %s5356_s30 }
  0x33   : > { %212 = vst [vmem:[#allocation2 + $0xc8] sm:$0xff] %v6999_v0  ;;  %213 = vst [vmem:[#allocation2 + $0xd0] sm:$0xff] %v6999_v0  ;;  %5362 = vmatprep.subr.bf16.mxu0 %v6812_v13  ;;  %v6819_v20 = vld [vmem:[#allocation3 + $0x18] sm:$0xff]   ;;  %v6820_v21 = vld [vmem:[#allocation3 + $0x120] sm:$0xff]  }
  0x34   : > { %216 = vst [vmem:[#allocation2 + $0xe8] sm:$0xff] %v6999_v0  ;;  %217 = vst [vmem:[#allocation2 + $0xf0] sm:$0xff] %v6999_v0  ;;  %1751 = vmatprep.mubr.bf16.mxu1 %v929_v5  ;;  %5497 = vmatpush3.bf16.msra.mxu1 %v6811_v12  ;;  %v6821_v22 = vld [vmem:[#allocation3 + $0xe0] sm:$0xff]   ;;  %v6824_v25 = vld [vmem:[#allocation3 + $0x128] sm:$0xff]  }
  0x35   : > { %220 = vst [vmem:[#allocation2 + $0x108] sm:$0xff] %v6999_v0  ;;  %221 = vst [vmem:[#allocation2 + $0x110] sm:$0xff] %v6999_v0  ;;  %5498 = vmatprep.subr.bf16.mxu1 %v6814_v15  ;;  %v6822_v23 = vld [vmem:[#allocation3 + $0x60] sm:$0xff]   ;;  %v6825_v26 = vld [vmem:[#allocation3 + $0xe8] sm:$0xff]  }
  0x36   : > { %224 = vst [vmem:[#allocation2 + $0x128] sm:$0xff] %v6999_v0  ;;  %225 = vst [vmem:[#allocation2 + $0x130] sm:$0xff] %v6999_v0  ;;  %5363 = vmatpush3.bf16.msra.mxu0 %v6813_v14  ;;  %v6823_v24 = vld [vmem:[#allocation3 + $0x20] sm:$0xff]   ;;  %v6826_v27 = vld [vmem:[#allocation3 + $0x68] sm:$0xff]  }
  0x37   : > { %228 = vst [vmem:[#allocation2 + $0x148] sm:$0xff] %v6999_v0  ;;  %229 = vst [vmem:[#allocation2 + $0x150] sm:$0xff] %v6999_v0  ;;  %5364 = vmatprep.subr.bf16.mxu0 %v6816_v17  ;;  %v6827_v28 = vld [vmem:[#allocation3 + $0x28] sm:$0xff]   ;;  %v6828_v29 = vld [vmem:[#allocation3 + $0x130] sm:$0xff]  }
  0x38   : > { %232 = vst [vmem:[#allocation2 + $0x168] sm:$0xff] %v6999_v0  ;;  %233 = vst [vmem:[#allocation2 + $0x170] sm:$0xff] %v6999_v0  ;;  %5499 = vmatpush3.bf16.msra.mxu1 %v6815_v16  ;;  %v6829_v30 = vld [vmem:[#allocation3 + $0xf0] sm:$0xff]   ;;  %v6832_v34 = vld [vmem:[#allocation3 + $0x138] sm:$0xff]  }
  0x39   : > { %236 = vst [vmem:[#allocation2 + $0x188] sm:$0xff] %v6999_v0  ;;  %237 = vst [vmem:[#allocation2 + $0x190] sm:$0xff] %v6999_v0  ;;  %5500 = vmatprep.subr.bf16.mxu1 %v6818_v19  ;;  %v6830_v32 = vld [vmem:[#allocation3 + $0x70] sm:$0xff]   ;;  %v6833_v35 = vld [vmem:[#allocation3 + $0xf8] sm:$0xff]  }
  0x3a   : > { %240 = vst [vmem:[#allocation2 + $0x1a8] sm:$0xff] %v6999_v0  ;;  %241 = vst [vmem:[#allocation2 + $0x1b0] sm:$0xff] %v6999_v0  ;;  %5365 = vmatpush3.bf16.msra.mxu0 %v6817_v18  ;;  %v6831_v33 = vld [vmem:[#allocation3 + $0x30] sm:$0xff]   ;;  %v6834_v36 = vld [vmem:[#allocation3 + $0x78] sm:$0xff]  }
  0x3b   : > { %244 = vst [vmem:[#allocation2 + $0x1c8] sm:$0xff] %v6999_v0  ;;  %245 = vst [vmem:[#allocation2 + $0x1d0] sm:$0xff] %v6999_v0  ;;  %5366 = vmatprep.subr.bf16.mxu0 %v6820_v21  ;;  %v6835_v37 = vld [vmem:[#allocation3 + $0x38] sm:$0xff]   ;;  %v259_v38 = vld [vmem:[%s7113_s6] sm:$0xff] }
  0x3c   : > { %248 = vst [vmem:[#allocation2 + $0x1e8] sm:$0xff] %v6999_v0  ;;  %249 = vst [vmem:[#allocation2 + $0x1f0] sm:$0xff] %v6999_v0  ;;  %5501 = vmatpush3.bf16.msra.mxu1 %v6819_v20  ;;  %v260_v39 = vld [vmem:[%s7113_s6 + $0x8] sm:$0xff]  ;;  %v7121_v41 = vld [vmem:[#allocation3 + $0x140] sm:$0xff]  }
  0x3d   : > { %252 = vst [vmem:[#allocation2 + $0x208] sm:$0xff] %v6999_v0  ;;  %253 = vst [vmem:[#allocation2 + $0x210] sm:$0xff] %v6999_v0  ;;  %5502 = vmatprep.subr.bf16.mxu1 %v6822_v23  ;;  %v261_v42 = vld [vmem:[%s7113_s6 + $0x10] sm:$0xff]  ;;  %v262_v43 = vld [vmem:[%s7113_s6 + $0x18] sm:$0xff] }
  0x3e   : > { %5367 = vmatpush3.bf16.msra.mxu0 %v6821_v22  ;;  %293 = vst.msk [vmem:[#allocation2 + $0x28] sm:$0xff] %vm292_vm2, %v259_v38  ;;  %294 = vst.msk [vmem:[#allocation2 + $0x30] sm:$0xff] %vm292_vm2, %v260_v39  ;;  %v263_v44 = vld [vmem:[%s7113_s6 + $0x20] sm:$0xff]  ;;  %v264_v45 = vld [vmem:[%s7113_s6 + $0x28] sm:$0xff] }
  0x3f   : > { %5368 = vmatprep.subr.bf16.mxu0 %v6824_v25  ;;  %295 = vst.msk [vmem:[#allocation2 + $0x48] sm:$0xff] %vm292_vm2, %v261_v42  ;;  %296 = vst.msk [vmem:[#allocation2 + $0x50] sm:$0xff] %vm292_vm2, %v262_v43  ;;  %v265_v46 = vld [vmem:[%s7113_s6 + $0x30] sm:$0xff]  ;;  %v266_v47 = vld [vmem:[%s7113_s6 + $0x38] sm:$0xff] }
  0x40   : > { %5503 = vmatpush3.bf16.msra.mxu1 %v6823_v24  ;;  %297 = vst.msk [vmem:[#allocation2 + $0x68] sm:$0xff] %vm292_vm2, %v263_v44  ;;  %298 = vst.msk [vmem:[#allocation2 + $0x70] sm:$0xff] %vm292_vm2, %v264_v45  ;;  %v267_v48 = vld [vmem:[%s7113_s6 + $0x40] sm:$0xff]  ;;  %v268_v49 = vld [vmem:[%s7113_s6 + $0x48] sm:$0xff] }
  0x41   : > { %5504 = vmatprep.subr.bf16.mxu1 %v6826_v27  ;;  %299 = vst.msk [vmem:[#allocation2 + $0x88] sm:$0xff] %vm292_vm2, %v265_v46  ;;  %300 = vst.msk [vmem:[#allocation2 + $0x90] sm:$0xff] %vm292_vm2, %v266_v47  ;;  %v269_v50 = vld [vmem:[%s7113_s6 + $0x50] sm:$0xff]  ;;  %v270_v51 = vld [vmem:[%s7113_s6 + $0x58] sm:$0xff] }
  0x42   : > { %5369 = vmatpush3.bf16.msra.mxu0 %v6825_v26  ;;  %301 = vst.msk [vmem:[#allocation2 + $0xa8] sm:$0xff] %vm292_vm2, %v267_v48  ;;  %302 = vst.msk [vmem:[#allocation2 + $0xb0] sm:$0xff] %vm292_vm2, %v268_v49  ;;  %v271_v52 = vld [vmem:[%s7113_s6 + $0x60] sm:$0xff]  ;;  %v272_v53 = vld [vmem:[%s7113_s6 + $0x68] sm:$0xff] }
  0x43   : > { %5370 = vmatprep.subr.bf16.mxu0 %v6828_v29  ;;  %303 = vst.msk [vmem:[#allocation2 + $0xc8] sm:$0xff] %vm292_vm2, %v269_v50  ;;  %304 = vst.msk [vmem:[#allocation2 + $0xd0] sm:$0xff] %vm292_vm2, %v270_v51  ;;  %v273_v3 = vld [vmem:[%s7113_s6 + $0x70] sm:$0xff]  ;;  %v274_v4 = vld [vmem:[%s7113_s6 + $0x78] sm:$0xff] }
  0x44   : > { %5505 = vmatpush3.bf16.msra.mxu1 %v6827_v28  ;;  %305 = vst.msk [vmem:[#allocation2 + $0xe8] sm:$0xff] %vm292_vm2, %v271_v52  ;;  %306 = vst.msk [vmem:[#allocation2 + $0xf0] sm:$0xff] %vm292_vm2, %v272_v53  ;;  %v275_v5 = vld [vmem:[%s7113_s6 + $0x80] sm:$0xff]  ;;  %v276_v14 = vld [vmem:[%s7113_s6 + $0x88] sm:$0xff] }
  0x45   : > { %5506 = vmatprep.subr.bf16.mxu1 %v6830_v32  ;;  %v7146_v54 = vld [vmem:[#allocation2 + $0x28] sm:$0xff]  ;;  %v7148_v55 = vld [vmem:[#allocation2 + $0x30] sm:$0xff]  ;;  %307 = vst.msk [vmem:[#allocation2 + $0x108] sm:$0xff] %vm292_vm2, %v273_v3  ;;  %308 = vst.msk [vmem:[#allocation2 + $0x110] sm:$0xff] %vm292_vm2, %v274_v4 }
  0x46   : > { %5371 = vmatpush3.bf16.msra.mxu0 %v6829_v30  ;;  %v433_v56 = vrot.slane %v7146_v54, 1  ;;  %v434_v57 = vrot.slane %v7148_v55, 1  ;;  %v608_v58 = vrot.slane %v7146_v54, 7  ;;  %v616_v59 = vrot.slane %v7148_v55, 7  ;;  %v7156_v60 = vld [vmem:[#allocation2 + $0x48] sm:$0xff]  ;;  %v7158_v61 = vld [vmem:[#allocation2 + $0x50] sm:$0xff] }
  0x47   : > { %5372 = vmatprep.subr.bf16.mxu0 %v6832_v34  ;;  %v436_v62 = vrot.slane %v7156_v60, 1  ;;  %v437_v8 = vrot.slane %v7158_v61, 1  ;;  %v7169_v9 = vld [vmem:[#allocation2 + $0x68] sm:$0xff]  ;;  %309 = vst.msk [vmem:[#allocation2 + $0x128] sm:$0xff] %vm292_vm2, %v275_v5  ;;  %v623_v12 = vrot.slane %v7156_v60, 7  ;;  %v7175_v13 = vld [vmem:[#allocation2 + $0x70] sm:$0xff] }
  0x48   : > { %5507 = vmatpush3.bf16.msra.mxu1 %v6831_v33  ;;  %v435_v63 = vsel %vm429_vm0, %v433_v56, %v434_v57  ;;  %v610_v0 = vrot.slane %v433_v56, 7  ;;  %v618_v1 = vrot.slane %v434_v57, 7  ;;  %v609_v2 = vsel %vm591_vm1, %v7105_v31, %v608_v58  ;;  %v7181_v19 = vld [vmem:[#allocation2 + $0x88] sm:$0xff]  ;;  %310 = vst.msk [vmem:[#allocation2 + $0x130] sm:$0xff] %vm292_vm2, %v276_v14  ;;  %v7187_v26 = vld [vmem:[#allocation2 + $0x90] sm:$0xff]  ;;  %v6841_v27 = vld [vmem:[#allocation3 + $0x80] sm:$0xff]  }
  0x49   : > { %5508 = vmatprep.subr.bf16.mxu1 %v6834_v36  ;;  %v611_v6 = vrot.slane %v435_v63, 7  ;;  %v617_v7 = vsel %vm591_vm1, %v608_v58, %v616_v59  ;;  %v625_v11 = vrot.slane %v436_v62, 7  ;;  %v438_v17 = vsel %vm429_vm0, %v436_v62, %v437_v8  ;;  %v6837_v24 = vld [vmem:[#allocation3 + $0x148] sm:$0xff]   ;;  %v277_v33 = vld [vmem:[%s7113_s6 + $0x90] sm:$0xff]  ;;  %v278_v34 = vld [vmem:[%s7113_s6 + $0x98] sm:$0xff] }
  0x4a   : > { %5373 = vmatpush3.bf16.msra.mxu0 %v6833_v35  ;;  %v931_v10 = vpack.c.bf16 %v617_v7, %v609_v2  ;;  %v633_v18 = vrot.slane %v437_v8, 7  ;;  %v626_v21 = vrot.slane %v438_v17, 7  ;;  %v631_v22 = vrot.slane %v7158_v61, 7  ;;  %311 = vst.msk [vmem:[#allocation2 + $0x148] sm:$0xff] %vm292_vm2, %v277_v33  ;;  %312 = vst.msk [vmem:[#allocation2 + $0x150] sm:$0xff] %vm292_vm2, %v278_v34  ;;  %v279_v38 = vld [vmem:[%s7113_s6 + $0xa0] sm:$0xff] }
  0x4b   : > { %6174 = vmatprep.subr.bf16.mxu0 %v7121_v41  ;;  %v612_v15 = vsel %vm591_vm1, %v610_v0, %v611_v6  ;;  %v619_v16 = vsel %vm591_vm1, %v611_v6, %v618_v1  ;;  %v439_v23 = vrot.slane %v7169_v9, 1  ;;  %v440_v25 = vrot.slane %v7175_v13, 1  ;;  %v280_v39 = vld [vmem:[%s7113_s6 + $0xa8] sm:$0xff]  ;;  %313 = vst.msk [vmem:[#allocation2 + $0x168] sm:$0xff] %vm292_vm2, %v279_v38  ;;  %v7215_v49 = vld [vmem:[#allocation2 + $0xb0] sm:$0xff]  ;;  %v282_v53 = vld [vmem:[%s7113_s6 + $0xb8] sm:$0xff] }
  0x4c   : > { %5509 = vmatpush3.bf16.msra.mxu1 %v6835_v37  ;;  %v932_v20 = vpack.c.bf16 %v619_v16, %v612_v15  ;;  %v627_v28 = vsel %vm591_vm1, %v625_v11, %v626_v21  ;;  %v634_v29 = vsel %vm591_vm1, %v626_v21, %v633_v18  ;;  %v442_v32 = vrot.slane %v7181_v19, 1  ;;  %314 = vst.msk [vmem:[#allocation2 + $0x170] sm:$0xff] %vm292_vm2, %v280_v39  ;;  %v7209_v45 = vld [vmem:[#allocation2 + $0xa8] sm:$0xff]  ;;  %v281_v52 = vld [vmem:[%s7113_s6 + $0xb0] sm:$0xff]  ;;  %v283_v62 = vld [vmem:[%s7113_s6 + $0xc0] sm:$0xff] }
  0x4d   : > { %v640_v30 = vrot.slane %v439_v23, 7  ;;  %v7194_v35 = vpack.c.bf16 %v634_v29, %v627_v28  ;;  %v441_v36 = vsel %vm429_vm0, %v439_v23, %v440_v25  ;;  %v648_v37 = vrot.slane %v440_v25, 7  ;;  %6222 = vmatprep.subr.bf16.mxu1 %v6841_v27  ;;  %v6843_v51 = vld [vmem:[#allocation3 + $0x88] sm:$0xff]   ;;  %315 = vst.msk [vmem:[#allocation2 + $0x188] sm:$0xff] %vm292_vm2, %v281_v52  ;;  %316 = vst.msk [vmem:[#allocation2 + $0x190] sm:$0xff] %vm292_vm2, %v282_v53  ;;  %v6839_v4 = vld [vmem:[#allocation3 + $0x158] sm:$0xff]  }
  0x4e   : > { %1285 = vmatprep.mubr.bf16.mxu0 %v932_v20  ;;  %v632_v42 = vsel %vm591_vm1, %v623_v12, %v631_v22  ;;  %v641_v43 = vrot.slane %v441_v36, 7  ;;  %v443_v44 = vrot.slane %v7187_v26, 1  ;;  %v638_v57 = vrot.slane %v7169_v9, 7  ;;  %v284_v63 = vld [vmem:[%s7113_s6 + $0xc8] sm:$0xff]  ;;  %317 = vst.msk [vmem:[#allocation2 + $0x1a8] sm:$0xff] %vm292_vm2, %v283_v62  ;;  %v6845_v5 = vld [vmem:[#allocation3 + $0x90] sm:$0xff]  }
  0x4f   : > { %1752 = vmatmul.mubr.bf16.vlgmr.msra.gmra.mrb[0].mxu1 %v928_v40  ;;  %1286 = vmatmul.mubr.bf16.vlgmr.msra.gmra.mrb[0].mxu0 %v931_v10  ;;  %v624_v40 = vsel %vm591_vm1, %v7105_v31, %v623_v12  ;;  %v646_v58 = vrot.slane %v7175_v13, 7  ;;  %v655_v59 = vrot.slane %v442_v32, 7  ;;  %318 = vst.msk [vmem:[#allocation2 + $0x1b0] sm:$0xff] %vm292_vm2, %v284_v63  ;;  %v445_v2 = vrot.slane %v7209_v45, 1  ;;  %v6840_v8 = vld [vmem:[#allocation3 + $0x160] sm:$0xff]   ;;  %v286_v14 = vld [vmem:[%s7113_s6 + $0xd8] sm:$0xff] }
  0x50   : > { %1759 = vmatprep.mubr.bf16.mxu1 %v932_v20  ;;  %6175 = vmatpush3.bf16.msra.mxu0 %v7121_v41  ;;  %v6838_v41 = vld [vmem:[#allocation3 + $0x150] sm:$0xff]   ;;  %v642_v46 = vsel %vm591_vm1, %v640_v30, %v641_v43  ;;  %v649_v47 = vsel %vm591_vm1, %v641_v43, %v648_v37  ;;  %v444_v48 = vsel %vm429_vm0, %v442_v32, %v443_v44  ;;  %v663_v1 = vrot.slane %v443_v44, 7  ;;  %v6846_v16 = vld [vmem:[#allocation3 + $0x98] sm:$0xff]   ;;  %v287_v17 = vld [vmem:[%s7113_s6 + $0xe0] sm:$0xff] }
  0x51   : > { %1293 = vmatprep.mubr.bf16.mxu0 %v7194_v35  ;;  %6176 = vmatprep.subr.bf16.mxu0 %v6837_v24  ;;  %v7217_v50 = vpack.c.bf16 %v632_v42, %v624_v40  ;;  %v7221_v56 = vpack.c.bf16 %v649_v47, %v642_v46  ;;  %v656_v0 = vrot.slane %v444_v48, 7  ;;  %v446_v3 = vrot.slane %v7215_v49, 1  ;;  %320 = vst.msk [vmem:[#allocation2 + $0x1d0] sm:$0xff] %vm292_vm2, %v286_v14  ;;  %v288_v18 = vld [vmem:[%s7113_s6 + $0xe8] sm:$0xff]  ;;  %v7254_v23 = vld [vmem:[#allocation2 + $0xd0] sm:$0xff]  ;;  %v6848_v30 = vld [vmem:[#allocation3 + $0xa0] sm:$0xff]  }
  0x52   : > { %6223 = vmatpush3.bf16.msra.mxu1 %v6841_v27  ;;  %v639_v6 = vsel %vm591_vm1, %v7105_v31, %v638_v57  ;;  %v647_v7 = vsel %vm591_vm1, %v638_v57, %v646_v58  ;;  %v653_v21 = vrot.slane %v7181_v19, 7  ;;  %v7252_v22 = vld [vmem:[#allocation2 + $0xc8] sm:$0xff]  ;;  %321 = vst.msk [vmem:[#allocation2 + $0x1e8] sm:$0xff] %vm292_vm2, %v287_v17  ;;  %322 = vst.msk [vmem:[#allocation2 + $0x1f0] sm:$0xff] %vm292_vm2, %v288_v18  ;;  %v661_v25 = vrot.slane %v7187_v26, 7  ;;  %v289_v37 = vld [vmem:[%s7113_s6 + $0xf0] sm:$0xff] }
  0x53   : > { %6224 = vmatprep.subr.bf16.mxu1 %v6843_v51  ;;  %v657_v11 = vsel %vm591_vm1, %v655_v59, %v656_v0  ;;  %v664_v12 = vsel %vm591_vm1, %v656_v0, %v663_v1  ;;  %v447_v15 = vsel %vm429_vm0, %v445_v2, %v446_v3  ;;  %v7249_v20 = vpack.c.bf16 %v647_v7, %v639_v6  ;;  %v6842_v34 = vld [vmem:[#allocation3 + $0x168] sm:$0xff]   ;;  %v290_v40 = vld [vmem:[%s7113_s6 + $0xf8] sm:$0xff]  ;;  %v6844_v46 = vld [vmem:[#allocation3 + $0x170] sm:$0xff]  }
  0x54   : > { %6177 = vmatpush3.bf16.msra.mxu0 %v6837_v24  ;;  %v7258_v24 = vpack.c.bf16 %v664_v12, %v657_v11  ;;  %v670_v27 = vrot.slane %v445_v2, 7  ;;  %v678_v28 = vrot.slane %v446_v3, 7  ;;  %v671_v29 = vrot.slane %v447_v15, 7  ;;  %v6849_v36 = vld [vmem:[#allocation3 + $0xa8] sm:$0xff]   ;;  %323 = vst.msk [vmem:[#allocation2 + $0x208] sm:$0xff] %vm292_vm2, %v289_v37  ;;  %324 = vst.msk [vmem:[#allocation2 + $0x210] sm:$0xff] %vm292_vm2, %v290_v40 }
  0x55   : > { %6178 = vmatprep.subr.bf16.mxu0 %v6838_v41  ;;  %9271 = vst [vmem:[#allocation6_spill] sm:$0xff] %v7249_v20  ;;  %v448_v32 = vrot.slane %v7252_v22, 1  ;;  %v449_v33 = vrot.slane %v7254_v23, 1  ;;  %v654_v38 = vsel %vm591_vm1, %v7105_v31, %v653_v21  ;;  %v662_v39 = vsel %vm591_vm1, %v653_v21, %v661_v25  ;;  %v7281_v48 = vld [vmem:[#allocation2 + $0xf0] sm:$0xff]  ;;  %v6847_v1 = vld [vmem:[#allocation3 + $0x178] sm:$0xff]   ;;  %v6852_v7 = vld [vmem:[#allocation3 + $0x1c0] sm:$0xff]  }
  0x56   : > { %6225 = vmatpush3.bf16.msra.mxu1 %v6843_v51  ;;  %9272 = vst [vmem:[#allocation7_spill] sm:$0xff] %v7258_v24  ;;  %v672_v42 = vsel %vm591_vm1, %v670_v27, %v671_v29  ;;  %v679_v43 = vsel %vm591_vm1, %v671_v29, %v678_v28  ;;  %v7279_v47 = vpack.c.bf16 %v662_v39, %v654_v38  ;;  %v668_v52 = vrot.slane %v7209_v45, 7  ;;  %v6850_v62 = vld [vmem:[#allocation3 + $0xb0] sm:$0xff]   ;;  %v6851_v2 = vld [vmem:[#allocation3 + $0xb8] sm:$0xff]   ;;  %v7321_v29 = vld [vmem:[#allocation3 + $0x200] sm:$0xff]  }
  0x57   : > { %1760 = vmatmul.mubr.bf16.gmra.mrb[4].mxu1 %v931_v10  ;;  %1294 = vmatmul.mubr.bf16.gmra.mrb[4].mxu0 %v7217_v50  ;;  %v285_v10 = vld [vmem:[%s7113_s6 + $0xd0] sm:$0xff]  ;;  %v450_v44 = vsel %vm429_vm0, %v448_v32, %v449_v33  ;;  %v7283_v51 = vpack.c.bf16 %v679_v43, %v672_v42  ;;  %v676_v53 = vrot.slane %v7215_v49, 7  ;;  %v685_v57 = vrot.slane %v448_v32, 7  ;;  %v7325_v32 = vld [vmem:[#allocation2 + $0x128] sm:$0xff] }
  0x58   : > { %1767 = vmatprep.mubr.bf16.mxu1 %v7194_v35  ;;  %1301 = vmatprep.mubr.bf16.mxu0 %v7221_v56  ;;  %319 = vst.msk [vmem:[#allocation2 + $0x1c8] sm:$0xff] %vm292_vm2, %v285_v10  ;;  %9273 = vst [vmem:[#allocation8_spill] sm:$0xff] %v7279_v47  ;;  %v686_v58 = vrot.slane %v450_v44, 7  ;;  %v693_v59 = vrot.slane %v449_v33, 7  ;;  %v452_v0 = vrot.slane %v7281_v48, 1  ;;  %v669_v45 = vsel %vm591_vm1, %v7105_v31, %v668_v52  ;;  %v7303_v10 = vld [vmem:[#allocation2 + $0x110] sm:$0xff] }
  0x59   : > { %6179 = vmatpush3.bf16.msra.mxu0 %v6838_v41  ;;  %6226 = vmatprep.subr.bf16.mxu1 %v6845_v5  ;;  %v7277_v41 = vld [vmem:[#allocation2 + $0xe8] sm:$0xff]  ;;  %9274 = vst [vmem:[#allocation9_spill] sm:$0xff] %v7283_v51  ;;  %v677_v49 = vsel %vm591_vm1, %v668_v52, %v676_v53  ;;  %v683_v12 = vrot.slane %v7252_v22, 7  ;;  %v691_v14 = vrot.slane %v7254_v23, 7  ;;  %v455_v21 = vrot.slane %v7303_v10, 1  ;;  %v7327_v33 = vld [vmem:[#allocation2 + $0x130] sm:$0xff] }
  0x5a   : > { %6180 = vmatprep.subr.bf16.mxu0 %v6839_v4  ;;  %6227 = vmatpush3.bf16.msra.mxu1 %v6845_v5  ;;  %v451_v63 = vrot.slane %v7277_v41, 1  ;;  %v687_v3 = vsel %vm591_vm1, %v685_v57, %v686_v58  ;;  %v7298_v5 = vld [vmem:[#allocation2 + $0x108] sm:$0xff]  ;;  %v708_v17 = vrot.slane %v452_v0, 7  ;;  %v706_v37 = vrot.slane %v7281_v48, 7 }
  0x5b   : > { %6228 = vmatprep.subr.bf16.mxu1 %v6846_v16  ;;  %v454_v18 = vrot.slane %v7298_v5, 1  ;;  %v684_v22 = vsel %vm591_vm1, %v7105_v31, %v683_v12  ;;  %v692_v23 = vsel %vm591_vm1, %v683_v12, %v691_v14  ;;  %v723_v40 = vrot.slane %v455_v21, 7 }
  0x5c   : > { %v453_v6 = vsel %vm429_vm0, %v451_v63, %v452_v0  ;;  %v700_v15 = vrot.slane %v451_v63, 7  ;;  %v457_v42 = vrot.slane %v7325_v32, 1  ;;  %v458_v43 = vrot.slane %v7327_v33, 1  ;;  %v7351_v63 = vld [vmem:[#allocation2 + $0x150] sm:$0xff] }
  0x5d   : > { %6181 = vmatpush3.bf16.msra.mxu0 %v6839_v4  ;;  %v694_v4 = vsel %vm591_vm1, %v686_v58, %v693_v59  ;;  %v456_v28 = vsel %vm429_vm0, %v454_v18, %v455_v21  ;;  %v715_v38 = vrot.slane %v454_v18, 7  ;;  %v713_v59 = vrot.slane %v7298_v5, 7  ;;  %v7371_v18 = vld [vmem:[#allocation2 + $0x170] sm:$0xff] }
  0x5e   : > { %6182 = vmatprep.subr.bf16.mxu0 %v6840_v8  ;;  %6229 = vmatpush3.bf16.msra.mxu1 %v6846_v16  ;;  %v7305_v11 = vpack.c.bf16 %v694_v4, %v687_v3  ;;  %v701_v16 = vrot.slane %v453_v6, 7  ;;  %v716_v39 = vrot.slane %v456_v28, 7  ;;  %v459_v57 = vsel %vm429_vm0, %v457_v42, %v458_v43 }
  0x5f   : > { %1768 = vmatmul.mubr.bf16.gmra.mrb[8].mxu1 %v7217_v50  ;;  %1302 = vmatmul.mubr.bf16.gmra.mrb[8].mxu0 %v7249_v20  ;;  %v461_v4 = vrot.slane %v7351_v63, 1  ;;  %v714_v6 = vsel %vm591_vm1, %v7105_v31, %v713_v59 }
  0x60   : > { %1775 = vmatprep.mubr.bf16.mxu1 %v7221_v56  ;;  %1309 = vmatprep.mubr.bf16.mxu0 %v7258_v24  ;;  %9276 = vst [vmem:[#allocation11_spill] sm:$0xff] %v7305_v11  ;;  %v702_v25 = vsel %vm591_vm1, %v700_v15, %v701_v16  ;;  %v709_v27 = vsel %vm591_vm1, %v701_v16, %v708_v17  ;;  %v728_v15 = vrot.slane %v7325_v32, 7  ;;  %v7369_v17 = vld [vmem:[#allocation2 + $0x168] sm:$0xff] }
  0x61   : > { %6183 = vmatpush3.bf16.msra.mxu0 %v6840_v8  ;;  %6230 = vmatprep.subr.bf16.mxu1 %v6848_v30  ;;  %v7301_v8 = vpack.c.bf16 %v677_v49, %v669_v45  ;;  %v717_v52 = vsel %vm591_vm1, %v715_v38, %v716_v39  ;;  %v724_v53 = vsel %vm591_vm1, %v716_v39, %v723_v40  ;;  %v731_v45 = vrot.slane %v459_v57, 7 }
  0x62   : > { %6184 = vmatprep.subr.bf16.mxu0 %v6842_v34  ;;  %6231 = vmatpush3.bf16.msra.mxu1 %v6848_v30  ;;  %v7323_v30 = vpack.c.bf16 %v692_v23, %v684_v22  ;;  %v7353_v0 = vpack.c.bf16 %v724_v53, %v717_v52  ;;  %v738_v49 = vrot.slane %v458_v43, 7  ;;  %v736_v22 = vrot.slane %v7327_v33, 7  ;;  %v7389_v43 = vld [vmem:[#allocation2 + $0x188] sm:$0xff] }
  0x63   : > { %6232 = vmatprep.subr.bf16.mxu1 %v6849_v36  ;;  %9275 = vst [vmem:[#allocation10_spill] sm:$0xff] %v7301_v8  ;;  %v753_v28 = vrot.slane %v461_v4, 7  ;;  %v729_v38 = vsel %vm591_vm1, %v7105_v31, %v728_v15  ;;  %v751_v57 = vrot.slane %v7351_v63, 7 }
  0x64   : > { %9277 = vst [vmem:[#allocation12_spill] sm:$0xff] %v7323_v30  ;;  %9280 = vst [vmem:[#allocation15_spill] sm:$0xff] %v7353_v0  ;;  %v739_v14 = vsel %vm591_vm1, %v731_v45, %v738_v49  ;;  %v737_v39 = vsel %vm591_vm1, %v728_v15, %v736_v22  ;;  %v466_v49 = vrot.slane %v7389_v43, 1  ;;  %v7413_v22 = vld [vmem:[#allocation2 + $0x1c8] sm:$0xff] }
  0x65   : > { %6185 = vmatpush3.bf16.msra.mxu0 %v6842_v34  ;;  %v7329_v34 = vpack.c.bf16 %v709_v27, %v702_v25  ;;  %v7394_v52 = vpack.c.bf16 %v737_v39, %v729_v38  ;;  %v766_v39 = vrot.slane %v7371_v18, 7 }
  0x66   : > { %6186 = vmatprep.subr.bf16.mxu0 %v6844_v46  ;;  %6233 = vmatpush3.bf16.msra.mxu1 %v6849_v36  ;;  %v698_v36 = vrot.slane %v7277_v41, 7 }
  0x67   : > { %1776 = vmatmul.mubr.bf16.gmra.mrb[12].mxu1 %v7249_v20  ;;  %1310 = vmatmul.mubr.bf16.gmra.mrb[12].mxu0 %v7279_v47  ;;  %9278 = vst [vmem:[#allocation13_spill] sm:$0xff] %v7329_v34  ;;  %9283 = vst [vmem:[#allocation18_spill] sm:$0xff] %v7394_v52  ;;  %v511_v20 = vrot.slane %v7175_v13, 2  ;;  %v516_v13 = vrot.slane %v7187_v26, 2 }
  0x68   : > { %1783 = vmatprep.mubr.bf16.mxu1 %v7258_v24  ;;  %1317 = vmatprep.mubr.bf16.mxu0 %v7283_v51  ;;  %v699_v44 = vsel %vm591_vm1, %v7105_v31, %v698_v36 }
  0x69   : > { %6187 = vmatpush3.bf16.msra.mxu0 %v6844_v46  ;;  %6234 = vmatprep.subr.bf16.mxu1 %v6850_v62  ;;  %v707_v46 = vsel %vm591_vm1, %v698_v36, %v706_v37  ;;  %v463_v36 = vrot.slane %v7369_v17, 1  ;;  %v464_v37 = vrot.slane %v7371_v18, 1 }
  0x6a   : > { %6188 = vmatprep.subr.bf16.mxu0 %v6847_v1  ;;  %6235 = vmatpush3.bf16.msra.mxu1 %v6850_v62  ;;  %v7346_v58 = vpack.c.bf16 %v707_v46, %v699_v44  ;;  %v7349_v62 = vld [vmem:[#allocation2 + $0x148] sm:$0xff]  ;;  %v7392_v46 = vld [vmem:[#allocation2 + $0x190] sm:$0xff] }
  0x6b   : > { %6236 = vmatprep.subr.bf16.mxu1 %v6851_v2  ;;  %v460_v3 = vrot.slane %v7349_v62, 1  ;;  %v465_v44 = vsel %vm429_vm0, %v463_v36, %v464_v37  ;;  %v743_v53 = vrot.slane %v7349_v62, 7 }
  0x6c   : > { %9279 = vst [vmem:[#allocation14_spill] sm:$0xff] %v7346_v58 }
  0x6d   : > { %6189 = vmatpush3.bf16.msra.mxu0 %v6847_v1  ;;  %v721_v1 = vrot.slane %v7303_v10, 7  ;;  %v462_v16 = vsel %vm429_vm0, %v460_v3, %v461_v4  ;;  %v745_v23 = vrot.slane %v460_v3, 7  ;;  %v761_v3 = vrot.slane %v465_v44, 7 }
  0x6e   : > { %6237 = vmatpush3.bf16.msra.mxu1 %v6851_v2  ;;  %5630 = vmatprep.subr.bf16.mxu0 %v6852_v7  ;;  %v730_v2 = vrot.slane %v457_v42, 7  ;;  %v746_v27 = vrot.slane %v462_v16, 7  ;;  %v768_v4 = vrot.slane %v464_v37, 7 }
  0x6f   : > { %1784 = vmatmul.mubr.bf16.gmra.mrb[16].mxu1 %v7279_v47  ;;  %1318 = vmatmul.mubr.bf16.gmra.mrb[16].mxu0 %v7301_v8  ;;  %v722_v7 = vsel %vm591_vm1, %v713_v59, %v721_v1  ;;  %v7398_v59 = vld [vmem:[#allocation2 + $0x1a8] sm:$0xff]  ;;  %v7400_v1 = vld [vmem:[#allocation2 + $0x1b0] sm:$0xff]  ;;  %v501_v47 = vrot.slane %v7148_v55, 2 }
  0x70   : > { %1791 = vmatprep.mubr.bf16.mxu1 %v7283_v51  ;;  %1325 = vmatprep.mubr.bf16.mxu0 %v7305_v11  ;;  %v732_v12 = vsel %vm591_vm1, %v730_v2, %v731_v45  ;;  %v7373_v21 = vpack.c.bf16 %v722_v7, %v714_v6  ;;  %v747_v40 = vsel %vm591_vm1, %v745_v23, %v746_v27  ;;  %v760_v45 = vrot.slane %v463_v36, 7  ;;  %v6948_v6 = vld [vmem:[#allocation2] sm:$0xff]  ;;  %v7421_v36 = vld [vmem:[#allocation2 + $0x1d0] sm:$0xff] }
  0x71   : > { %6270 = vmatprep.subr.bf16.mxu1 %v7321_v29  ;;  %v7376_v25 = vpack.c.bf16 %v739_v14, %v732_v12  ;;  %v754_v42 = vsel %vm591_vm1, %v746_v27, %v753_v28  ;;  %v7405_v7 = vrot.slane %v6948_v6, 2  ;;  %v467_v12 = vrot.slane %v7392_v46, 1  ;;  %v7432_v14 = vld [vmem:[#allocation2 + $0x1f0] sm:$0xff] }
  0x72   : > { %9281 = vst [vmem:[#allocation16_spill] sm:$0xff] %v7373_v21  ;;  %v7402_v2 = vpack.c.bf16 %v754_v42, %v747_v40  ;;  %v469_v15 = vrot.slane %v7398_v59, 1  ;;  %v470_v16 = vrot.slane %v7400_v1, 1  ;;  %v744_v23 = vsel %vm591_vm1, %v7105_v31, %v743_v53  ;;  %v7426_v42 = vld [vmem:[#allocation2 + $0x1e8] sm:$0xff] }
  0x73   : > { %9282 = vst [vmem:[#allocation17_spill] sm:$0xff] %v7376_v25  ;;  %v752_v27 = vsel %vm591_vm1, %v743_v53, %v751_v57  ;;  %v758_v28 = vrot.slane %v7369_v17, 7  ;;  %v762_v37 = vsel %vm591_vm1, %v760_v45, %v761_v3  ;;  %v769_v38 = vsel %vm591_vm1, %v761_v3, %v768_v4 }
  0x74   : > { %9284 = vst [vmem:[#allocation19_spill] sm:$0xff] %v7402_v2  ;;  %v775_v40 = vrot.slane %v466_v49, 7  ;;  %v468_v44 = vsel %vm429_vm0, %v466_v49, %v467_v12  ;;  %v773_v6 = vrot.slane %v7389_v43, 7  ;;  %v781_v53 = vrot.slane %v7392_v46, 7 }
  0x75   : > { %v472_v57 = vrot.slane %v7413_v22, 1  ;;  %v783_v45 = vrot.slane %v467_v12, 7  ;;  %v471_v3 = vsel %vm429_vm0, %v469_v15, %v470_v16  ;;  %v473_v4 = vrot.slane %v7421_v36, 1 }
  0x76   : > { %v7442_v49 = vpack.c.bf16 %v769_v38, %v762_v37 }
  0x77   : > { %1792 = vmatmul.mubr.bf16.gmra.mrb[20].mxu1 %v7301_v8  ;;  %1326 = vmatmul.mubr.bf16.gmra.mrb[20].mxu0 %v7323_v30  ;;  %v7446_v12 = vrot.slane %v472_v57, 7  ;;  %v7452_v37 = vsel %vm429_vm0, %v472_v57, %v473_v4  ;;  %v813_v38 = vrot.slane %v473_v4, 7  ;;  %v782_v4 = vsel %vm591_vm1, %v773_v6, %v781_v53 }
  0x78   : > { %1799 = vmatprep.mubr.bf16.mxu1 %v7305_v11  ;;  %1333 = vmatprep.mubr.bf16.mxu0 %v7329_v34  ;;  %9286 = vst [vmem:[#allocation21_spill] sm:$0xff] %v7442_v49  ;;  %v806_v11 = vrot.slane %v7452_v37, 7 }
  0x7f   : > { %1800 = vmatmul.mubr.bf16.gmra.mrb[24].mxu1 %v7323_v30  ;;  %1334 = vmatmul.mubr.bf16.gmra.mrb[24].mxu0 %v7346_v58  ;;  %v475_v30 = vrot.slane %v7426_v42, 1 }
  0x80   : > { %1807 = vmatprep.mubr.bf16.mxu1 %v7329_v34  ;;  %1341 = vmatprep.mubr.bf16.mxu0 %v7353_v0 }
  0x81   : > { %v820_v8 = vrot.slane %v475_v30, 7 }
  0x87   : > { %1808 = vmatmul.mubr.bf16.gmra.mrb[28].mxu1 %v7346_v58  ;;  %1342 = vmatmul.mubr.bf16.gmra.mrb[28].mxu0 %v7373_v21 }
  0x88   : > { %1815 = vmatprep.mubr.bf16.mxu1 %v7353_v0  ;;  %1349 = vmatprep.mubr.bf16.mxu0 %v7376_v25  ;;  %v790_v0 = vrot.slane %v469_v15, 7  ;;  %v476_v15 = vrot.slane %v7432_v14, 1 }
  0x8a   : > { %v828_v37 = vrot.slane %v476_v15, 7 }
  0x8f   : > { %1816 = vmatmul.mubr.bf16.gmra.mrb[32].mxu1 %v7373_v21  ;;  %1350 = vmatmul.mubr.bf16.gmra.mrb[32].mxu0 %v7394_v52  ;;  %v776_v21 = vrot.slane %v468_v44, 7  ;;  %v767_v44 = vsel %vm591_vm1, %v758_v28, %v766_v39 }
  0x90   : > { %1823 = vmatprep.mubr.bf16.mxu1 %v7376_v25  ;;  %1357 = vmatprep.mubr.bf16.mxu0 %v7402_v2  ;;  %v7440_v25 = vld [vmem:[#allocation2 + $0x210] sm:$0xff] }
  0x91   : > { %v1027_v34 = vrot.slane %v7440_v25, 1  ;;  %v777_v57 = vsel %vm591_vm1, %v775_v40, %v776_v21  ;;  %v784_v58 = vsel %vm591_vm1, %v776_v21, %v783_v45  ;;  %v505_v40 = vrot.slane %v7156_v60, 2 }
  0x92   : > { %v7474_v24 = vpack.c.bf16 %v784_v58, %v777_v57  ;;  %v774_v45 = vsel %vm591_vm1, %v7105_v31, %v773_v6  ;;  %v504_v6 = vsel %vm494_vm3, %v501_v47, %v7405_v7 }
  0x93   : > { %v1047_v58 = vrot.slane %v1027_v34, 7  ;;  %v628_v51 = vrot.slane %v505_v40, 7 }
  0x94   : > { %9288 = vst [vmem:[#allocation23_spill] sm:$0xff] %v7474_v24 }
  0x97   : > { %1824 = vmatmul.mubr.bf16.gmra.mrb[36].mxu1 %v7394_v52  ;;  %v7438_v52 = vld [vmem:[#allocation2 + $0x208] sm:$0xff] }
  0x98   : > { %1831 = vmatprep.mubr.bf16.mxu1 %v7402_v2  ;;  %v7434_v2 = vpack.c.bf16 %v752_v27, %v744_v23  ;;  %v791_v23 = vrot.slane %v471_v3, 7  ;;  %v798_v27 = vrot.slane %v470_v16, 7  ;;  %v759_v16 = vsel %vm591_vm1, %v7105_v31, %v758_v28 }
  0x99   : > { %v1026_v3 = vrot.slane %v7438_v52, 1  ;;  %v500_v28 = vrot.slane %v7146_v54, 2  ;;  %v7469_v39 = vpack.c.bf16 %v767_v44, %v759_v16  ;;  %v826_v54 = vrot.slane %v7432_v14, 7 }
  0x9a   : > { %9285 = vst [vmem:[#allocation20_spill] sm:$0xff] %v7434_v2  ;;  %1358 = vmatmul.mubr.bf16.gmra.mrb[36].mxu0 %v7434_v2  ;;  %v799_v55 = vsel %vm591_vm1, %v791_v23, %v798_v27  ;;  %v9292_v27 = vrot.slane %v7400_v1, 7 }
  0x9b   : > { %1365 = vmatprep.mubr.bf16.mxu0 %v7442_v49  ;;  %9287 = vst [vmem:[#allocation22_spill] sm:$0xff] %v7469_v39  ;;  %v7477_v21 = vsel %vm429_vm0, %v1026_v3, %v1027_v34  ;;  %v1039_v44 = vrot.slane %v1026_v3, 7  ;;  %v7489_v57 = vsel %vm494_vm3, %v500_v28, %v501_v47  ;;  %v613_v53 = vrot.slane %v500_v28, 7 }
  0x9c   : > { %v1040_v60 = vrot.slane %v7477_v21, 7  ;;  %v598_v21 = vrot.slane %v7405_v7, 7  ;;  %v792_v47 = vsel %vm591_vm1, %v790_v0, %v791_v23  ;;  %v620_v28 = vrot.slane %v504_v6, 7 }
  0x9d   : > { %v9291_v0 = vrot.slane %v7398_v59, 7 }
  0x9f   : > { %1832 = vmatmul.mubr.bf16.gmra.mrb[40].mxu1 %v7434_v2  ;;  %v811_v2 = vrot.slane %v7421_v36, 7  ;;  %v789_v23 = vsel %vm591_vm1, %v7105_v31, %v9291_v0 }
  0xa0   : > { %1839 = vmatprep.mubr.bf16.mxu1 %v7442_v49  ;;  %v477_v49 = vsel %vm429_vm0, %v475_v30, %v476_v15  ;;  %v614_v30 = vrot.slane %v7489_v57, 7 }
  0xa1   : > { %v821_v16 = vrot.slane %v477_v49, 7  ;;  %v9289_v49 = vrot.slane %v7158_v61, 2  ;;  %v7514_v61 = vpack.c.bf16 %v799_v55, %v792_v47  ;;  %v814_v55 = vsel %vm591_vm1, %v806_v11, %v813_v38 }
  0xa2   : > { %1366 = vmatmul.mubr.bf16.gmra.mrb[40].mxu0 %v7469_v39 }
  0xa3   : > { %1373 = vmatprep.mubr.bf16.mxu0 %v7474_v24  ;;  %v7498_v15 = vsel %vm494_vm3, %v505_v40, %v9289_v49  ;;  %v9290_v3 = vmov %v9289_v49  ;;  %v9293_v40 = vmov %v9291_v0  ;;  %v829_v38 = vsel %vm591_vm1, %v821_v16, %v828_v37 }
  0xa4   : > { %v7504_v34 = vsel %vm494_vm3, %v9290_v3, %v7405_v7  ;;  %v629_v49 = vrot.slane %v7498_v15, 7  ;;  %v510_v3 = vrot.slane %v7169_v9, 2  ;;  %v515_v9 = vrot.slane %v7181_v19, 2 }
  0xa5   : > { %v9294_v15 = vrot.slane %v7413_v22, 7  ;;  %v9296_v0 = vrot.slane %v7426_v42, 7  ;;  %v1041_v37 = vsel %vm591_vm1, %v1039_v44, %v1040_v60 }
  0xa6   : > { %v512_v44 = vsel %vm494_vm3, %v510_v3, %v511_v20 }
  0xa7   : > { %1840 = vmatmul.mubr.bf16.gmra.mrb[44].mxu1 %v7469_v39  ;;  %v635_v39 = vrot.slane %v7504_v34, 7  ;;  %v804_v19 = vsel %vm591_vm1, %v7105_v31, %v9294_v15  ;;  %v9295_v26 = vmov %v9294_v15 }
  0xa8   : > { %1847 = vmatprep.mubr.bf16.mxu1 %v7474_v24  ;;  %v7510_v24 = vpack.c.bf16 %v782_v4, %v774_v45  ;;  %v797_v45 = vsel %vm591_vm1, %v9293_v40, %v9292_v27  ;;  %v807_v4 = vsel %vm591_vm1, %v7446_v12, %v806_v11  ;;  %v812_v12 = vsel %vm591_vm1, %v9295_v26, %v811_v2 }
  0xa9   : > { %v7536_v57 = vpack.c.bf16 %v797_v45, %v789_v23  ;;  %v7538_v6 = vpack.c.bf16 %v814_v55, %v807_v4  ;;  %v822_v11 = vsel %vm591_vm1, %v820_v8, %v821_v16  ;;  %v7553_v34 = vpack.c.bf16 %v812_v12, %v804_v19 }
  0xaa   : > { %1374 = vmatmul.mubr.bf16.gmra.mrb[44].mxu0 %v7510_v24  ;;  %v7555_v47 = vpack.c.bf16 %v829_v38, %v822_v11  ;;  %v819_v2 = vsel %vm591_vm1, %v7105_v31, %v9296_v0  ;;  %v9297_v23 = vmov %v9296_v0  ;;  %v1048_v16 = vsel %vm591_vm1, %v1040_v60, %v1047_v58 }
  0xab   : > { %1381 = vmatprep.mubr.bf16.mxu0 %v7514_v61  ;;  %v827_v8 = vsel %vm591_vm1, %v9297_v23, %v826_v54  ;;  %v7571_v27 = vsel %vm591_vm1, %v598_v21, %v598_v21  ;;  %v7575_v45 = vpack.c.bf16 %v1048_v16, %v1041_v37  ;;  %v9298_v55 = vrot.slane %v7438_v52, 7  ;;  %v6949_v23 = vld [vmem:[#allocation2 + $0xa8] sm:$0xff]  ;;  %v6950_v37 = vld [vmem:[#allocation2 + $0xb0] sm:$0xff] }
  0xac   : > { %v7573_v40 = vpack.c.bf16 %v827_v8, %v819_v2  ;;  %v930_v4 = vpack.c.bf16 %v598_v21, %v7571_v27  ;;  %v514_v60 = vsel %vm494_vm3, %v511_v20, %v7405_v7  ;;  %v9299_v58 = vrot.slane %v7440_v25, 7 }
  0xad   : > { %v1038_v54 = vsel %vm591_vm1, %v7105_v31, %v9298_v55  ;;  %v9300_v21 = vmov %v9298_v55  ;;  %v615_v19 = vsel %vm591_vm1, %v613_v53, %v614_v30  ;;  %v621_v26 = vsel %vm591_vm1, %v614_v30, %v620_v28 }
  0xae   : > { %v1046_v15 = vsel %vm591_vm1, %v9300_v21, %v9299_v58  ;;  %v643_v31 = vrot.slane %v510_v3, 7  ;;  %v644_v12 = vrot.slane %v512_v44, 7  ;;  %v650_v11 = vrot.slane %v514_v60, 7  ;;  %v6863_v3 = vld [vmem:[#allocation3 + $0x208] sm:$0xff]  }
  0xaf   : > { %1848 = vmatmul.mubr.bf16.gmra.mrb[48].mxu1 %v7510_v24  ;;  %v7595_v38 = vpack.c.bf16 %v1046_v15, %v1038_v54  ;;  %v933_v0 = vpack.c.bf16 %v621_v26, %v615_v19  ;;  %v630_v20 = vsel %vm591_vm1, %v628_v51, %v629_v49  ;;  %v636_v2 = vsel %vm591_vm1, %v629_v49, %v635_v39  ;;  %v6951_v49 = vld [vmem:[#allocation2 + $0xc8] sm:$0xff]  ;;  %v6952_v54 = vld [vmem:[#allocation2 + $0xd0] sm:$0xff] }
  0xb0   : > { %1855 = vmatprep.mubr.bf16.mxu1 %v7514_v61  ;;  %v520_v8 = vrot.slane %v6949_v23, 2  ;;  %v521_v16 = vrot.slane %v6950_v37, 2  ;;  %v517_v55 = vsel %vm494_vm3, %v515_v9, %v516_v13  ;;  %v519_v30 = vsel %vm494_vm3, %v516_v13, %v7405_v7  ;;  %v6866_v15 = vld [vmem:[#allocation3 + $0x210] sm:$0xff]   ;;  %v6854_v23 = vld [vmem:[#allocation3 + $0x1c8] sm:$0xff]  }
  0xb1   : > { %v7602_v53 = vpack.c.bf16 %v636_v2, %v630_v20  ;;  %v645_v28 = vsel %vm591_vm1, %v643_v31, %v644_v12  ;;  %v651_v51 = vsel %vm591_vm1, %v644_v12, %v650_v11  ;;  %v658_v39 = vrot.slane %v515_v9, 7  ;;  %v6853_v12 = vld [vmem:[#allocation3 + $0x180] sm:$0xff]  }
  0xb2   : > { %1382 = vmatmul.mubr.bf16.gmra.mrb[48].mxu0 %v7536_v57  ;;  %v526_v44 = vrot.slane %v6952_v54, 2  ;;  %v659_v60 = vrot.slane %v517_v55, 7  ;;  %v665_v58 = vrot.slane %v519_v30, 7  ;;  %v522_v13 = vsel %vm494_vm3, %v520_v8, %v521_v16 }
  0xb3   : > { %1389 = vmatprep.mubr.bf16.mxu0 %v7538_v6  ;;  %v524_v21 = vsel %vm494_vm3, %v521_v16, %v7405_v7  ;;  %v7612_v19 = vpack.c.bf16 %v651_v51, %v645_v28  ;;  %v673_v9 = vrot.slane %v520_v8, 7  ;;  %v674_v26 = vrot.slane %v522_v13, 7  ;;  %v6867_v28 = vld [vmem:[#allocation3 + $0x218] sm:$0xff]   ;;  %v6855_v51 = vld [vmem:[#allocation3 + $0x188] sm:$0xff]  }
  0xb4   : > { %v680_v31 = vrot.slane %v524_v21, 7  ;;  %v660_v11 = vsel %vm591_vm1, %v658_v39, %v659_v60  ;;  %v529_v2 = vsel %vm494_vm3, %v526_v44, %v7405_v7  ;;  %v531_v37 = vrot.slane %v7281_v48, 2 }
  0xb5   : > { %v695_v30 = vrot.slane %v529_v2, 7  ;;  %v536_v39 = vrot.slane %v7303_v10, 2 }
  0xb6   : > { %v681_v48 = vsel %vm591_vm1, %v674_v26, %v680_v31  ;;  %v534_v54 = vsel %vm494_vm3, %v531_v37, %v7405_v7  ;;  %v6858_v31 = vld [vmem:[#allocation3 + $0x1d8] sm:$0xff]  }
  0xb7   : > { %1856 = vmatmul.mubr.bf16.gmra.mrb[52].mxu1 %v7536_v57  ;;  %v710_v21 = vrot.slane %v534_v54, 7  ;;  %v6861_v54 = vld [vmem:[#allocation3 + $0x1a0] sm:$0xff]  }
  0xb8   : > { %1863 = vmatprep.mubr.bf16.mxu1 %v7538_v6 }
  0xba   : > { %1390 = vmatmul.mubr.bf16.gmra.mrb[52].mxu0 %v7553_v34 }
  0xbb   : > { %1397 = vmatprep.mubr.bf16.mxu0 %v7555_v47 }
  0xbf   : > { %1864 = vmatmul.mubr.bf16.gmra.mrb[56].mxu1 %v7553_v34 }
  0xc0   : > { %1871 = vmatprep.mubr.bf16.mxu1 %v7555_v47 }
  0xc2   : > { %1398 = vmatmul.mubr.bf16.gmra.mrb[56].mxu0 %v7573_v40 }
  0xc3   : > { %1405 = vmatprep.mubr.bf16.mxu0 %v7575_v45 }
  0xc7   : > { %1872 = vmatmul.mubr.bf16.gmra.mrb[60].mxu1 %v7573_v40 }
  0xc8   : > { %6238 = vmatprep.mubr.bf16.mxu1 %v930_v4  ;;  %v525_v4 = vrot.slane %v6951_v49, 2  ;;  %v6856_v49 = vld [vmem:[#allocation3 + $0x1d0] sm:$0xff]  }
  0xca   : > { %1406 = vmatmul.mubr.bf16.gmra.mrb[60].mxu0 %v7595_v38  ;;  %v527_v20 = vsel %vm494_vm3, %v525_v4, %v526_v44  ;;  %v688_v16 = vrot.slane %v525_v4, 7 }
  0xcb   : > { %6190 = vmatprep.mubr.bf16.mxu0 %v933_v0  ;;  %v689_v55 = vrot.slane %v527_v20, 7 }
  0xcf   : > { %6239 = vmatmul.mubr.bf16.vlgmr.msra.gmra.mrb[64].mxu1 %v933_v0  ;;  %v666_v0 = vsel %vm591_vm1, %v659_v60, %v665_v58  ;;  %v690_v60 = vsel %vm591_vm1, %v688_v16, %v689_v55  ;;  %v696_v58 = vsel %vm591_vm1, %v689_v55, %v695_v30  ;;  %v546_v16 = vrot.slane %v7351_v63, 2  ;;  %v6871_v55 = vld [vmem:[#allocation3 + $0x228] sm:$0xff]  }
  0xd0   : > { %6242 = vmatprep.mubr.bf16.mxu1 %v7602_v53  ;;  %6271 = vmatpush3.bf16.msra.mxu1 %v7321_v29  ;;  %v530_v29 = vrot.slane %v7277_v41, 2  ;;  %v7622_v8 = vpack.c.bf16 %v666_v0, %v660_v11  ;;  %v675_v41 = vsel %vm591_vm1, %v673_v9, %v674_v26  ;;  %v539_v26 = vsel %vm494_vm3, %v536_v39, %v7405_v7  ;;  %v6870_v11 = vld [vmem:[#allocation3 + $0x220] sm:$0xff]  }
  0xd1   : > { %6272 = vmatprep.subr.bf16.mxu1 %v6863_v3  ;;  %v7634_v44 = vpack.c.bf16 %v681_v48, %v675_v41  ;;  %v7644_v0 = vpack.c.bf16 %v696_v58, %v690_v60  ;;  %v550_v60 = vrot.slane %v7369_v17, 2  ;;  %v551_v58 = vrot.slane %v7371_v18, 2 }
  0xd2   : > { %6191 = vmatmul.mubr.bf16.vlgmr.msra.gmra.mrb[64].mxu0 %v7602_v53  ;;  %v532_v4 = vsel %vm494_vm3, %v530_v29, %v531_v37  ;;  %v703_v13 = vrot.slane %v530_v29, 7  ;;  %v6859_v37 = vld [vmem:[#allocation3 + $0x198] sm:$0xff]   ;;  %v555_v17 = vrot.slane %v7389_v43, 2  ;;  %v556_v18 = vrot.slane %v7392_v46, 2 }
  0xd3   : > { %5631 = vmatpush3.bf16.msra.mxu0 %v6853_v12  ;;  %6194 = vmatprep.mubr.bf16.mxu0 %v7612_v19  ;;  %v704_v10 = vrot.slane %v532_v4, 7  ;;  %v541_v12 = vrot.slane %v7327_v33, 2  ;;  %v545_v33 = vrot.slane %v7349_v62, 2  ;;  %v549_v4 = vsel %vm494_vm3, %v546_v16, %v7405_v7 }
  0xd4   : > { %6273 = vmatpush3.bf16.msra.mxu1 %v6863_v3  ;;  %v535_v3 = vrot.slane %v7298_v5, 2  ;;  %5632 = vmatprep.subr.bf16.mxu0 %v6854_v23  ;;  %v6857_v5 = vld [vmem:[#allocation3 + $0x190] sm:$0xff]   ;;  %v725_v23 = vrot.slane %v539_v26, 7  ;;  %v755_v26 = vrot.slane %v549_v4, 7  ;;  %v566_v4 = vrot.slane %v7421_v36, 2 }
  0xd5   : > { %6274 = vmatprep.subr.bf16.mxu1 %v6866_v15  ;;  %v705_v29 = vsel %vm591_vm1, %v703_v13, %v704_v10 }
  0xd6   : > { %v537_v9 = vsel %vm494_vm3, %v535_v3, %v536_v39  ;;  %v718_v20 = vrot.slane %v535_v3, 7 }
  0xd7   : > { %6243 = vmatmul.mubr.bf16.gmra.mrb[68].mxu1 %v7612_v19  ;;  %5633 = vmatpush3.bf16.msra.mxu0 %v6855_v51  ;;  %v719_v2 = vrot.slane %v537_v9, 7  ;;  %v6860_v51 = vld [vmem:[#allocation3 + $0x1e0] sm:$0xff]  }
  0xd8   : > { %6246 = vmatprep.mubr.bf16.mxu1 %v7622_v8  ;;  %6275 = vmatpush3.bf16.msra.mxu1 %v6866_v15  ;;  %v540_v15 = vrot.slane %v7325_v32, 2  ;;  %v711_v32 = vsel %vm591_vm1, %v704_v10, %v710_v21  ;;  %v6874_v10 = vld [vmem:[#allocation3 + $0x230] sm:$0xff]   ;;  %v748_v21 = vrot.slane %v545_v33, 7 }
  0xd9   : > { %6276 = vmatprep.subr.bf16.mxu1 %v6867_v28  ;;  %5634 = vmatprep.subr.bf16.mxu0 %v6856_v49  ;;  %v7656_v41 = vpack.c.bf16 %v711_v32, %v705_v29  ;;  %v720_v48 = vsel %vm591_vm1, %v718_v20, %v719_v2  ;;  %v726_v3 = vsel %vm591_vm1, %v719_v2, %v725_v23  ;;  %v6865_v20 = vld [vmem:[#allocation3 + $0x1a8] sm:$0xff]   ;;  %v6868_v2 = vld [vmem:[#allocation3 + $0x1f0] sm:$0xff]   ;;  %v6875_v23 = vld [vmem:[#allocation3 + $0x238] sm:$0xff]  }
  0xda   : > { %6195 = vmatmul.mubr.bf16.gmra.mrb[68].mxu0 %v7622_v8  ;;  %v542_v30 = vsel %vm494_vm3, %v540_v15, %v541_v12  ;;  %v733_v62 = vrot.slane %v540_v15, 7  ;;  %v547_v49 = vsel %vm494_vm3, %v545_v33, %v546_v16  ;;  %v7665_v13 = vpack.c.bf16 %v726_v3, %v720_v48  ;;  %v6872_v3 = vld [vmem:[#allocation3 + $0x1f8] sm:$0xff]  }
  0xdb   : > { %6198 = vmatprep.mubr.bf16.mxu0 %v7634_v44  ;;  %5635 = vmatpush3.bf16.msra.mxu0 %v6857_v5  ;;  %v734_v63 = vrot.slane %v542_v30, 7  ;;  %v6864_v5 = vld [vmem:[#allocation3 + $0x1e8] sm:$0xff]   ;;  %v749_v9 = vrot.slane %v547_v49, 7  ;;  %v557_v16 = vsel %vm494_vm3, %v555_v17, %v556_v18  ;;  %v559_v30 = vsel %vm494_vm3, %v556_v18, %v7405_v7 }
  0xdc   : > { %6277 = vmatpush3.bf16.msra.mxu1 %v6867_v28  ;;  %5636 = vmatprep.subr.bf16.mxu0 %v6858_v31  ;;  %v544_v28 = vsel %vm494_vm3, %v541_v12, %v7405_v7  ;;  %v552_v12 = vsel %vm494_vm3, %v550_v60, %v551_v58  ;;  %v565_v49 = vrot.slane %v7413_v22, 2 }
  0xdd   : > { %6278 = vmatprep.subr.bf16.mxu1 %v6870_v11  ;;  %v740_v39 = vrot.slane %v544_v28, 7  ;;  %v735_v31 = vsel %vm591_vm1, %v733_v62, %v734_v63  ;;  %v750_v32 = vsel %vm591_vm1, %v748_v21, %v749_v9  ;;  %v756_v43 = vsel %vm591_vm1, %v749_v9, %v755_v26 }
  0xde   : > { %v764_v46 = vrot.slane %v552_v12, 7  ;;  %v561_v28 = vrot.slane %v7400_v1, 2  ;;  %v7687_v48 = vpack.c.bf16 %v756_v43, %v750_v32  ;;  %v778_v62 = vrot.slane %v555_v17, 7 }
  0xdf   : > { %6247 = vmatmul.mubr.bf16.gmra.mrb[72].mxu1 %v7634_v44  ;;  %5637 = vmatpush3.bf16.msra.mxu0 %v6859_v37  ;;  %v741_v15 = vsel %vm591_vm1, %v734_v63, %v740_v39  ;;  %v763_v37 = vrot.slane %v550_v60, 7  ;;  %v779_v63 = vrot.slane %v557_v16, 7  ;;  %v785_v39 = vrot.slane %v559_v30, 7 }
  0xe0   : > { %6250 = vmatprep.mubr.bf16.mxu1 %v7644_v0  ;;  %6279 = vmatpush3.bf16.msra.mxu1 %v6870_v11  ;;  %v554_v11 = vsel %vm494_vm3, %v551_v58, %v7405_v7  ;;  %v7678_v29 = vpack.c.bf16 %v741_v15, %v735_v31  ;;  %v564_v60 = vsel %vm494_vm3, %v561_v28, %v7405_v7  ;;  %v6873_v58 = vld [vmem:[#allocation3 + $0x1b8] sm:$0xff]   ;;  %v570_v15 = vrot.slane %v7426_v42, 2 }
  0xe1   : > { %6280 = vmatprep.subr.bf16.mxu1 %v6871_v55  ;;  %5638 = vmatprep.subr.bf16.mxu0 %v6860_v51  ;;  %v770_v33 = vrot.slane %v554_v11, 7  ;;  %v6869_v51 = vld [vmem:[#allocation3 + $0x1b0] sm:$0xff]   ;;  %v786_v21 = vsel %vm591_vm1, %v779_v63, %v785_v39  ;;  %v800_v22 = vrot.slane %v564_v60, 7  ;;  %v567_v36 = vsel %vm494_vm3, %v565_v49, %v566_v4 }
  0xe2   : > { %6199 = vmatmul.mubr.bf16.gmra.mrb[72].mxu0 %v7644_v0  ;;  %v569_v31 = vsel %vm494_vm3, %v566_v4, %v7405_v7  ;;  %v571_v17 = vrot.slane %v7432_v14, 2  ;;  %v808_v12 = vrot.slane %v565_v49, 7  ;;  %v809_v11 = vrot.slane %v567_v36, 7 }
  0xe3   : > { %6202 = vmatprep.mubr.bf16.mxu0 %v7656_v41  ;;  %5639 = vmatpush3.bf16.msra.mxu0 %v6861_v54  ;;  %v771_v1 = vsel %vm591_vm1, %v764_v46, %v770_v33  ;;  %v1030_v30 = vrot.slane %v7438_v52, 2 }
  0xe4   : > { %6281 = vmatpush3.bf16.msra.mxu1 %v6871_v55  ;;  %5640 = vmatprep.subr.bf16.mxu0 %v6864_v5  ;;  %v560_v55 = vrot.slane %v7398_v59, 2  ;;  %v765_v59 = vsel %vm591_vm1, %v763_v37, %v764_v46  ;;  %v572_v14 = vsel %vm494_vm3, %v570_v15, %v571_v17  ;;  %v574_v42 = vsel %vm494_vm3, %v571_v17, %v7405_v7 }
  0xe5   : > { %6282 = vmatprep.subr.bf16.mxu1 %v6874_v10  ;;  %v7700_v5 = vpack.c.bf16 %v771_v1, %v765_v59  ;;  %v810_v43 = vsel %vm591_vm1, %v808_v12, %v809_v11  ;;  %v823_v46 = vrot.slane %v570_v15, 7  ;;  %v824_v33 = vrot.slane %v572_v14, 7 }
  0xe6   : > { %v562_v54 = vsel %vm494_vm3, %v560_v55, %v561_v28  ;;  %v793_v9 = vrot.slane %v560_v55, 7  ;;  %v830_v16 = vrot.slane %v574_v42, 7  ;;  %v1031_v55 = vrot.slane %v7440_v25, 2 }
  0xe7   : > { %6251 = vmatmul.mubr.bf16.gmra.mrb[76].mxu1 %v7656_v41  ;;  %5641 = vmatpush3.bf16.msra.mxu0 %v6865_v20  ;;  %v794_v26 = vrot.slane %v562_v54, 7  ;;  %v815_v20 = vrot.slane %v569_v31, 7 }
  0xe8   : > { %6254 = vmatprep.mubr.bf16.mxu1 %v7665_v13  ;;  %6283 = vmatpush3.bf16.msra.mxu1 %v6874_v10  ;;  %v780_v10 = vsel %vm591_vm1, %v778_v62, %v779_v63  ;;  %v1032_v62 = vsel %vm494_vm3, %v1030_v30, %v1031_v55  ;;  %v1034_v52 = vsel %vm494_vm3, %v1031_v55, %v7405_v7  ;;  %v1042_v63 = vrot.slane %v1030_v30, 7 }
  0xe9   : > { %5642 = vmatprep.subr.bf16.mxu0 %v6868_v2  ;;  %6284 = vmatprep.subr.bf16.mxu1 %v6875_v23  ;;  %v7709_v18 = vpack.c.bf16 %v786_v21, %v780_v10  ;;  %v795_v2 = vsel %vm591_vm1, %v793_v9, %v794_v26  ;;  %v816_v37 = vsel %vm591_vm1, %v809_v11, %v815_v20  ;;  %v1043_v39 = vrot.slane %v1032_v62, 7 }
  0xea   : > { %6203 = vmatmul.mubr.bf16.gmra.mrb[76].mxu0 %v7665_v13  ;;  %v7726_v28 = vpack.c.bf16 %v816_v37, %v810_v43  ;;  %v1049_v59 = vrot.slane %v1034_v52, 7 }
  0xeb   : > { %6206 = vmatprep.mubr.bf16.mxu0 %v7678_v29  ;;  %5643 = vmatpush3.bf16.msra.mxu0 %v6869_v51  ;;  %v825_v51 = vsel %vm591_vm1, %v823_v46, %v824_v33  ;;  %v1044_v1 = vsel %vm591_vm1, %v1042_v63, %v1043_v39 }
  0xec   : > { %6285 = vmatpush3.bf16.msra.mxu1 %v6875_v23  ;;  %5644 = vmatprep.subr.bf16.mxu0 %v6872_v3  ;;  %v801_v23 = vsel %vm591_vm1, %v794_v26, %v800_v22  ;;  %v831_v3 = vsel %vm591_vm1, %v824_v33, %v830_v16  ;;  %v1050_v49 = vsel %vm591_vm1, %v1043_v39, %v1049_v59 }
  0xed   : > { %v7720_v32 = vpack.c.bf16 %v801_v23, %v795_v2  ;;  %v7737_v25 = vpack.c.bf16 %v831_v3, %v825_v51  ;;  %v7745_v4 = vpack.c.bf16 %v1050_v49, %v1044_v1 }
  0xef   : > { %6255 = vmatmul.mubr.bf16.gmra.mrb[80].mxu1 %v7678_v29  ;;  %5645 = vmatpush3.bf16.msra.mxu0 %v6873_v58  ;;  %v9301_v58 = vld [vmem:[#allocation6_spill] sm:$0xff] }
  0xf0   : > { %6258 = vmatprep.mubr.bf16.mxu1 %v7687_v48 }
  0xf2   : > { %6207 = vmatmul.mubr.bf16.gmra.mrb[80].mxu0 %v7687_v48 }
  0xf3   : > { %6210 = vmatprep.mubr.bf16.mxu0 %v7700_v5 }
  0xf7   : > { %6259 = vmatmul.mubr.bf16.gmra.mrb[84].mxu1 %v7700_v5 }
  0xf8   : > { %6262 = vmatprep.mubr.bf16.mxu1 %v7709_v18 }
  0xfa   : > { %6211 = vmatmul.mubr.bf16.gmra.mrb[84].mxu0 %v7709_v18 }
  0xfb   : > { %6214 = vmatprep.mubr.bf16.mxu0 %v7720_v32 }
  0xff   : > { %6263 = vmatmul.mubr.bf16.gmra.mrb[88].mxu1 %v7720_v32 }
 0x100   : > { %6266 = vmatprep.mubr.bf16.mxu1 %v7726_v28 }
 0x102   : > { %6215 = vmatmul.mubr.bf16.gmra.mrb[88].mxu0 %v7726_v28 }
 0x103   : > { %6218 = vmatprep.mubr.bf16.mxu0 %v7737_v25 }
 0x107   : > { %6267 = vmatmul.mubr.bf16.gmra.mrb[92].mxu1 %v7737_v25 }
 0x108   : > { %6286 = vmatprep.mubr.bf16.mxu1 %v7602_v53 }
 0x10a   : > { %6219 = vmatmul.mubr.bf16.gmra.mrb[92].mxu0 %v7745_v4 }
 0x10b   : > { %2302 = vmatprep.mubr.bf16.mxu0 %v7194_v35 }
 0x10f   : > { %6287 = vmatmul.mubr.bf16.vlgmr.msra.gmra.mrb[64].mxu1 %v7612_v19  ;;  %v9302_v19 = vld [vmem:[#allocation7_spill] sm:$0xff] }
 0x110   : > { %6290 = vmatprep.mubr.bf16.mxu1 %v7622_v8  ;;  %v9303_v8 = vld [vmem:[#allocation8_spill] sm:$0xff] }
 0x112   : > { %2303 = vmatmul.mubr.bf16.vlgmr.msra.gmra.mrb[96].mxu0 %v7217_v50 }
 0x113   : > { %2310 = vmatprep.mubr.bf16.mxu0 %v7221_v56  ;;  %v9304_v56 = vld [vmem:[#allocation9_spill] sm:$0xff] }
 0x117   : > { %6291 = vmatmul.mubr.bf16.gmra.mrb[68].mxu1 %v7634_v44 }
 0x118   : > { %6294 = vmatprep.mubr.bf16.mxu1 %v7644_v0 }
 0x11a   : > { %2311 = vmatmul.mubr.bf16.gmra.mrb[100].mxu0 %v9301_v58  ;;  %v2076_v58 = vpack.c.bf16 %v7571_v27, %v7571_v27 }
 0x11b   : > { %2318 = vmatprep.mubr.bf16.mxu0 %v9302_v19 }
 0x11f   : > { %6295 = vmatmul.mubr.bf16.gmra.mrb[72].mxu1 %v7656_v41 }
 0x120   : > { %6298 = vmatprep.mubr.bf16.mxu1 %v7665_v13 }
 0x122   : > { %v5510_v7 = vpop.f32.mrb[0].mxu1  ;;  %2319 = vmatmul.mubr.bf16.gmra.mrb[104].mxu0 %v9303_v8  ;;  %v5374_v44 = vpop.f32.mrb[0].mxu0 }
 0x123   : > { %v5511_v53 = vpop.f32.mrb[1].mxu1  ;;  %2326 = vmatprep.mubr.bf16.mxu0 %v9304_v56  ;;  %v5375_v10 = vpop.f32.mrb[1].mxu0 }
 0x124   : > { %v7755_v54 = vadd.f32 %v5511_v53, %v5510_v7  ;;  %v5513_v60 = vpop.f32.mrb[2].mxu1  ;;  %v5377_v41 = vpop.f32.mrb[2].mxu0  ;;  %v7769_v22 = vadd.f32 %v5375_v10, %v5374_v44 }
 0x125   : > { %v5514_v35 = vpop.f32.mrb[3].mxu1  ;;  %v5378_v13 = vpop.f32.mrb[3].mxu0 }
 0x126   : > { %v7761_v50 = vadd.f32 %v5514_v35, %v5513_v60  ;;  %v7773_v15 = vadd.f32 %v5378_v13, %v5377_v41  ;;  %v9312_v41 = vld [vmem:[#allocation17_spill] sm:$0xff] }
 0x127   : > { %6299 = vmatmul.mubr.bf16.gmra.mrb[76].mxu1 %v7678_v29  ;;  %v9305_v29 = vld [vmem:[#allocation10_spill] sm:$0xff] }
 0x128   : > { %6302 = vmatprep.mubr.bf16.mxu1 %v7687_v48  ;;  %v9306_v48 = vld [vmem:[#allocation11_spill] sm:$0xff] }
 0x12a   : > { %v5516_v0 = vpop.f32.mrb[4].mxu1  ;;  %2327 = vmatmul.mubr.bf16.gmra.mrb[108].mxu0 %v9305_v29  ;;  %v5380_v17 = vpop.f32.mrb[4].mxu0 }
 0x12b   : > { %v5517_v21 = vpop.f32.mrb[5].mxu1  ;;  %2334 = vmatprep.mubr.bf16.mxu0 %v9306_v48  ;;  %v5381_v11 = vpop.f32.mrb[5].mxu0 }
 0x12c   : > { %v7767_v9 = vadd.f32 %v5517_v21, %v5516_v0  ;;  %v5519_v26 = vpop.f32.mrb[6].mxu1  ;;  %v5383_v2 = vpop.f32.mrb[6].mxu0  ;;  %v7781_v42 = vadd.f32 %v5381_v11, %v5380_v17 }
 0x12d   : > { %v5520_v36 = vpop.f32.mrb[7].mxu1  ;;  %v5384_v43 = vpop.f32.mrb[7].mxu0 }
 0x12e   : > { %v7771_v31 = vadd.f32 %v5520_v36, %v5519_v26  ;;  %v7785_v33 = vadd.f32 %v5384_v43, %v5383_v2  ;;  %v9313_v43 = vld [vmem:[#allocation18_spill] sm:$0xff] }
 0x12f   : > { %6303 = vmatmul.mubr.bf16.gmra.mrb[80].mxu1 %v7700_v5  ;;  %v9307_v5 = vld [vmem:[#allocation12_spill] sm:$0xff] }
 0x130   : > { %6306 = vmatprep.mubr.bf16.mxu1 %v7709_v18  ;;  %v9308_v18 = vld [vmem:[#allocation13_spill] sm:$0xff] }
 0x132   : > { %v5522_v12 = vpop.f32.mrb[8].mxu1  ;;  %2335 = vmatmul.mubr.bf16.gmra.mrb[112].mxu0 %v9307_v5  ;;  %v5386_v16 = vpop.f32.mrb[8].mxu0 }
 0x133   : > { %v5523_v20 = vpop.f32.mrb[9].mxu1  ;;  %2342 = vmatprep.mubr.bf16.mxu0 %v9308_v18  ;;  %v5387_v55 = vpop.f32.mrb[9].mxu0 }
 0x134   : > { %v7779_v23 = vadd.f32 %v5523_v20, %v5522_v12  ;;  %v5525_v14 = vpop.f32.mrb[10].mxu1  ;;  %v5389_v3 = vpop.f32.mrb[10].mxu0  ;;  %v7793_v63 = vadd.f32 %v5387_v55, %v5386_v16 }
 0x135   : > { %v5526_v37 = vpop.f32.mrb[11].mxu1  ;;  %v5390_v39 = vpop.f32.mrb[11].mxu0 }
 0x136   : > { %v7783_v46 = vadd.f32 %v5526_v37, %v5525_v14  ;;  %v7797_v49 = vadd.f32 %v5390_v39, %v5389_v3  ;;  %v9314_v37 = vld [vmem:[#allocation19_spill] sm:$0xff] }
 0x137   : > { %6307 = vmatmul.mubr.bf16.gmra.mrb[84].mxu1 %v7720_v32  ;;  %v9309_v32 = vld [vmem:[#allocation14_spill] sm:$0xff] }
 0x138   : > { %6310 = vmatprep.mubr.bf16.mxu1 %v7726_v28  ;;  %v9310_v28 = vld [vmem:[#allocation15_spill] sm:$0xff] }
 0x13a   : > { %v5528_v30 = vpop.f32.mrb[12].mxu1  ;;  %2343 = vmatmul.mubr.bf16.gmra.mrb[116].mxu0 %v9309_v32  ;;  %v5392_v7 = vpop.f32.mrb[12].mxu0 }
 0x13b   : > { %v5529_v51 = vpop.f32.mrb[13].mxu1  ;;  %2350 = vmatprep.mubr.bf16.mxu0 %v9310_v28  ;;  %v5393_v60 = vpop.f32.mrb[13].mxu0 }
 0x13c   : > { %v7791_v62 = vadd.f32 %v5529_v51, %v5528_v30  ;;  %v5531_v52 = vpop.f32.mrb[14].mxu1  ;;  %v5395_v19 = vpop.f32.mrb[14].mxu0  ;;  %v7807_v44 = vadd.f32 %v5393_v60, %v5392_v7  ;;  %v9315_v7 = vld [vmem:[#allocation20_spill] sm:$0xff] }
 0x13d   : > { %v5532_v59 = vpop.f32.mrb[15].mxu1  ;;  %v5396_v0 = vpop.f32.mrb[15].mxu0 }
 0x13e   : > { %v7795_v1 = vadd.f32 %v5532_v59, %v5531_v52  ;;  %v7811_v21 = vadd.f32 %v5396_v0, %v5395_v19 }
 0x13f   : > { %6311 = vmatmul.mubr.bf16.gmra.mrb[88].mxu1 %v7737_v25 }
 0x140   : > { %6314 = vmatprep.mubr.bf16.mxu1 %v7745_v4  ;;  %v9311_v4 = vld [vmem:[#allocation16_spill] sm:$0xff] }
 0x142   : > { %v5534_v53 = vpop.f32.mrb[16].mxu1  ;;  %2351 = vmatmul.mubr.bf16.gmra.mrb[120].mxu0 %v9311_v4  ;;  %v5398_v26 = vpop.f32.mrb[16].mxu0 }
 0x143   : > { %v5535_v35 = vpop.f32.mrb[17].mxu1  ;;  %2358 = vmatprep.mubr.bf16.mxu0 %v9312_v41  ;;  %v5399_v13 = vpop.f32.mrb[17].mxu0 }
 0x144   : > { %v7805_v8 = vadd.f32 %v5535_v35, %v5534_v53  ;;  %v5537_v56 = vpop.f32.mrb[18].mxu1  ;;  %v5401_v29 = vpop.f32.mrb[18].mxu0  ;;  %v7817_v12 = vadd.f32 %v5399_v13, %v5398_v26  ;;  %v9316_v53 = vld [vmem:[#allocation21_spill] sm:$0xff] }
 0x145   : > { %v5538_v10 = vpop.f32.mrb[19].mxu1  ;;  %v5402_v11 = vpop.f32.mrb[19].mxu0 }
 0x146   : > { %v7809_v25 = vadd.f32 %v5538_v10, %v5537_v56  ;;  %v7821_v14 = vadd.f32 %v5402_v11, %v5401_v29  ;;  %v6876_v29 = vld [vmem:[#allocation3 + $0x340] sm:$0xff]  }
 0x147   : > { %6315 = vmatmul.mubr.bf16.gmra.mrb[92].mxu1 %v2076_v58  ;;  %v6877_v11 = vld [vmem:[#allocation3 + $0x300] sm:$0xff]   ;;  %5766 = vmatprep.subr.bf16.mxu0 %v6876_v29  ;;  %v6884_v29 = vld [vmem:[#allocation3 + $0x358] sm:$0xff]  }
 0x148   : > { %5767 = vmatpush3.bf16.msra.mxu0 %v6877_v11 }
 0x14a   : > { %v5540_v27 = vpop.f32.mrb[20].mxu1  ;;  %2359 = vmatmul.mubr.bf16.gmra.mrb[124].mxu0 %v9313_v43  ;;  %v5404_v5 = vpop.f32.mrb[20].mxu0 }
 0x14b   : > { %v5541_v36 = vpop.f32.mrb[21].mxu1  ;;  %2366 = vmatprep.mubr.bf16.mxu0 %v9314_v37  ;;  %v5405_v16 = vpop.f32.mrb[21].mxu0 }
 0x14c   : > { %v7815_v48 = vadd.f32 %v5541_v36, %v5540_v27  ;;  %v5543_v17 = vpop.f32.mrb[22].mxu1  ;;  %v5407_v55 = vpop.f32.mrb[22].mxu0  ;;  %v7827_v52 = vadd.f32 %v5405_v16, %v5404_v5  ;;  %v9317_v36 = vld [vmem:[#allocation22_spill] sm:$0xff] }
 0x14d   : > { %v5544_v20 = vpop.f32.mrb[23].mxu1  ;;  %v5408_v39 = vpop.f32.mrb[23].mxu0 }
 0x14e   : > { %v7819_v2 = vadd.f32 %v5544_v20, %v5543_v17  ;;  %v7831_v28 = vadd.f32 %v5408_v39, %v5407_v55  ;;  %v9318_v17 = vld [vmem:[#allocation23_spill] sm:$0xff] }
 0x14f   : > { %v6879_v39 = vld [vmem:[#allocation3 + $0x308] sm:$0xff]  }
 0x152   : > { %v5546_v18 = vpop.f32.mrb[24].mxu1  ;;  %2367 = vmatmul.mubr.bf16.gmra.mrb[128].mxu0 %v9315_v7  ;;  %v5410_v60 = vpop.f32.mrb[24].mxu0 }
 0x153   : > { %v5547_v30 = vpop.f32.mrb[25].mxu1  ;;  %2374 = vmatprep.mubr.bf16.mxu0 %v9316_v53  ;;  %v5411_v35 = vpop.f32.mrb[25].mxu0 }
 0x154   : > { %v7825_v51 = vadd.f32 %v5547_v30, %v5546_v18  ;;  %v5549_v3 = vpop.f32.mrb[26].mxu1  ;;  %v5413_v56 = vpop.f32.mrb[26].mxu0  ;;  %v7837_v4 = vadd.f32 %v5411_v35, %v5410_v60  ;;  %v6878_v18 = vld [vmem:[#allocation3 + $0x348] sm:$0xff]   ;;  %v6881_v35 = vld [vmem:[#allocation3 + $0x350] sm:$0xff]  }
 0x155   : > { %v5550_v59 = vpop.f32.mrb[27].mxu1  ;;  %v5414_v41 = vpop.f32.mrb[27].mxu0  ;;  %5768 = vmatprep.subr.bf16.mxu0 %v6878_v18 }
 0x156   : > { %v7829_v32 = vadd.f32 %v5550_v59, %v5549_v3  ;;  %v7841_v13 = vadd.f32 %v5414_v41, %v5413_v56  ;;  %5769 = vmatpush3.bf16.msra.mxu0 %v6879_v39  ;;  %v6883_v41 = vld [vmem:[#allocation3 + $0x388] sm:$0xff]   ;;  %v6888_v39 = vld [vmem:[#allocation3 + $0x320] sm:$0xff]  }
 0x157   : > { %5770 = vmatprep.subr.bf16.mxu0 %v6881_v35 }
 0x15a   : > { %v5552_v58 = vpop.f32.mrb[28].mxu1  ;;  %2375 = vmatmul.mubr.bf16.gmra.mrb[132].mxu0 %v9317_v36  ;;  %v5416_v20 = vpop.f32.mrb[28].mxu0 }
 0x15b   : > { %v5553_v19 = vpop.f32.mrb[29].mxu1  ;;  %2382 = vmatprep.mubr.bf16.mxu0 %v9318_v17  ;;  %v5417_v37 = vpop.f32.mrb[29].mxu0 }
 0x15c   : > { %v7835_v0 = vadd.f32 %v5553_v19, %v5552_v58  ;;  %v5555_v10 = vpop.f32.mrb[30].mxu1  ;;  %v5419_v16 = vpop.f32.mrb[30].mxu0  ;;  %v7847_v3 = vadd.f32 %v5417_v37, %v5416_v20  ;;  %v6880_v58 = vld [vmem:[#allocation3 + $0x380] sm:$0xff]   ;;  %v6882_v19 = vld [vmem:[#allocation3 + $0x310] sm:$0xff]  }
 0x15d   : > { %v5556_v26 = vpop.f32.mrb[31].mxu1  ;;  %v5420_v59 = vpop.f32.mrb[31].mxu0  ;;  %6318 = vmatprep.subr.bf16.mxu1 %v6880_v58  ;;  %5771 = vmatpush3.bf16.msra.mxu0 %v6882_v19 }
 0x15e   : > { %v7839_v27 = vadd.f32 %v5556_v26, %v5555_v10  ;;  %v7851_v60 = vadd.f32 %v5420_v59, %v5419_v16  ;;  %6319 = vmatpush3.bf16.msra.mxu1 %v6880_v58  ;;  %5772 = vmatprep.subr.bf16.mxu0 %v6884_v29  ;;  %v6886_v16 = vld [vmem:[#allocation3 + $0x390] sm:$0xff]   ;;  %v6889_v58 = vld [vmem:[#allocation3 + $0x398] sm:$0xff]  }
 0x15f   : > { %6320 = vmatprep.subr.bf16.mxu1 %v6883_v41 }
 0x162   : > { %v5558_v43 = vpop.f32.mrb[32].mxu1  ;;  %2383 = vmatmul.mubr.bf16.gmra.mrb[136].mxu0 %v7510_v24  ;;  %v5422_v56 = vpop.f32.mrb[32].mxu0  ;;  %6321 = vmatpush3.bf16.msra.mxu1 %v6883_v41 }
 0x163   : > { %v5559_v5 = vpop.f32.mrb[33].mxu1  ;;  %2390 = vmatprep.mubr.bf16.mxu0 %v7514_v61  ;;  %v5423_v26 = vpop.f32.mrb[33].mxu0  ;;  %6322 = vmatprep.subr.bf16.mxu1 %v6886_v16 }
 0x164   : > { %v7845_v30 = vadd.f32 %v5559_v5, %v5558_v43  ;;  %v5561_v55 = vpop.f32.mrb[34].mxu1  ;;  %v7855_v17 = vadd.f32 %v5423_v26, %v5422_v56  ;;  %v5425_v11 = vpop.f32.mrb[34].mxu0  ;;  %v6885_v43 = vld [vmem:[#allocation3 + $0x318] sm:$0xff]   ;;  %v6890_v56 = vld [vmem:[#allocation3 + $0x368] sm:$0xff]  }
 0x165   : > { %v5562_v7 = vpop.f32.mrb[35].mxu1  ;;  %v5426_v61 = vpop.f32.mrb[35].mxu0  ;;  %5773 = vmatpush3.bf16.msra.mxu0 %v6885_v43 }
 0x166   : > { %v7849_v53 = vadd.f32 %v5562_v7, %v5561_v55  ;;  %v7859_v5 = vadd.f32 %v5426_v61, %v5425_v11  ;;  %v6887_v55 = vld [vmem:[#allocation3 + $0x360] sm:$0xff]   ;;  %6323 = vmatpush3.bf16.msra.mxu1 %v6886_v16  ;;  %v6893_v16 = vld [vmem:[#allocation3 + $0x370] sm:$0xff]  }
 0x167   : > { %5774 = vmatprep.subr.bf16.mxu0 %v6887_v55  ;;  %6324 = vmatprep.subr.bf16.mxu1 %v6889_v58  ;;  %v6894_v55 = vld [vmem:[#allocation3 + $0x330] sm:$0xff]  }
 0x169   : > { %5775 = vmatpush3.bf16.msra.mxu0 %v6888_v39 }
 0x16a   : > { %v5564_v10 = vpop.f32.mrb[36].mxu1  ;;  %2391 = vmatmul.mubr.bf16.gmra.mrb[140].mxu0 %v7536_v57  ;;  %5776 = vmatprep.subr.bf16.mxu0 %v6890_v56 }
 0x16b   : > { %v5565_v36 = vpop.f32.mrb[37].mxu1  ;;  %2398 = vmatprep.mubr.bf16.mxu0 %v7538_v6  ;;  %6325 = vmatpush3.bf16.msra.mxu1 %v6889_v58 }
 0x16c   : > { %v7857_v20 = vadd.f32 %v5565_v36, %v5564_v10  ;;  %v5567_v24 = vpop.f32.mrb[38].mxu1  ;;  %v6891_v36 = vld [vmem:[#allocation3 + $0x328] sm:$0xff]  }
 0x16d   : > { %v5568_v37 = vpop.f32.mrb[39].mxu1  ;;  %v5428_v59 = vpop.f32.mrb[36].mxu0  ;;  %5777 = vmatpush3.bf16.msra.mxu0 %v6891_v36  ;;  %v6897_v36 = vld [vmem:[#allocation3 + $0x338] sm:$0xff]  }
 0x16e   : > { %v7861_v18 = vadd.f32 %v5568_v37, %v5567_v24  ;;  %v5429_v35 = vpop.f32.mrb[37].mxu0  ;;  %v7871_v24 = vld [vmem:[#allocation2] sm:$0xff]  ;;  %5778 = vmatprep.subr.bf16.mxu0 %v6893_v16 }
 0x16f   : > { %v7865_v10 = vadd.f32 %v5429_v35, %v5428_v59  ;;  %v5431_v41 = vpop.f32.mrb[38].mxu0  ;;  %9319 = vst [vmem:[#allocation6_spill] sm:$0xff] %v7871_v24  ;;  %v2043_v43 = vrot.slane %v7871_v24, 1  ;;  %v6892_v37 = vld [vmem:[#allocation3 + $0x3a0] sm:$0xff]  }
 0x170   : > { %v5432_v6 = vpop.f32.mrb[39].mxu0  ;;  %6326 = vmatprep.subr.bf16.mxu1 %v6892_v37 }
 0x171   : > { %v7869_v11 = vadd.f32 %v5432_v6, %v5431_v41  ;;  %6327 = vmatpush3.bf16.msra.mxu1 %v6892_v37  ;;  %5779 = vmatpush3.bf16.msra.mxu0 %v6894_v55  ;;  %v2056_v6 = vrot.slane %v2043_v43, 7  ;;  %v6898_v55 = vld [vmem:[#allocation3 + $0x3b0] sm:$0xff]  }
 0x172   : > { %v5570_v7 = vpop.f32.mrb[40].mxu1  ;;  %2399 = vmatmul.mubr.bf16.gmra.mrb[144].mxu0 %v7553_v34 }
 0x173   : > { %v5571_v19 = vpop.f32.mrb[41].mxu1  ;;  %2406 = vmatprep.mubr.bf16.mxu0 %v7555_v47 }
 0x174   : > { %v7867_v26 = vadd.f32 %v5571_v19, %v5570_v7  ;;  %v5573_v57 = vpop.f32.mrb[42].mxu1  ;;  %v6895_v7 = vld [vmem:[#allocation3 + $0x3a8] sm:$0xff]   ;;  %v6896_v19 = vld [vmem:[#allocation3 + $0x378] sm:$0xff]  }
 0x175   : > { %v5574_v29 = vpop.f32.mrb[43].mxu1  ;;  %v5434_v39 = vpop.f32.mrb[40].mxu0  ;;  %6328 = vmatprep.subr.bf16.mxu1 %v6895_v7  ;;  %5780 = vmatprep.subr.bf16.mxu0 %v6896_v19 }
 0x176   : > { %v7874_v61 = vadd.f32 %v5574_v29, %v5573_v57  ;;  %v5435_v58 = vpop.f32.mrb[41].mxu0  ;;  %6329 = vmatpush3.bf16.msra.mxu1 %v6895_v7  ;;  %5781 = vmatpush3.bf16.msra.mxu0 %v6897_v36 }
 0x177   : > { %v7878_v56 = vadd.f32 %v5435_v58, %v5434_v39  ;;  %v5437_v41 = vpop.f32.mrb[42].mxu0  ;;  %v2058_v39 = vsel %vm591_vm1, %v2056_v6, %v2056_v6  ;;  %6330 = vmatprep.subr.bf16.mxu1 %v6898_v55 }
 0x178   : > { %9320 = vst [vmem:[#allocation7_spill] sm:$0xff] %v7874_v61  ;;  %v5438_v47 = vpop.f32.mrb[43].mxu0 }
 0x179   : > { %v7882_v37 = vadd.f32 %v5438_v47, %v5437_v41  ;;  %v2075_v41 = vpack.c.bf16 %v2058_v39, %v2058_v39  ;;  %v6899_v47 = vld [vmem:[#allocation3 + $0x3b8] sm:$0xff]  }
 0x17a   : > { %v5576_v59 = vpop.f32.mrb[44].mxu1  ;;  %2407 = vmatmul.mubr.bf16.gmra.mrb[148].mxu0 %v7573_v40  ;;  %6331 = vmatpush3.bf16.msra.mxu1 %v6898_v55 }
 0x17b   : > { %v5577_v35 = vpop.f32.mrb[45].mxu1  ;;  %9321 = vst [vmem:[#allocation8_spill] sm:$0xff] %v7882_v37  ;;  %2414 = vmatprep.mubr.bf16.mxu0 %v7575_v45  ;;  %6332 = vmatprep.subr.bf16.mxu1 %v6899_v47 }
 0x17c   : > { %v7880_v57 = vadd.f32 %v5577_v35, %v5576_v59  ;;  %v5579_v34 = vpop.f32.mrb[46].mxu1 }
 0x17d   : > { %v5580_v29 = vpop.f32.mrb[47].mxu1  ;;  %v5440_v59 = vpop.f32.mrb[44].mxu0 }
 0x17e   : > { %v7884_v16 = vadd.f32 %v5580_v29, %v5579_v34  ;;  %v5441_v43 = vpop.f32.mrb[45].mxu0  ;;  %v7892_v34 = vrot.slane %v7871_v24, 7  ;;  %6333 = vmatpush3.bf16.msra.mxu1 %v6899_v47 }
 0x17f   : > { %v7889_v19 = vadd.f32 %v5441_v43, %v5440_v59  ;;  %v5443_v7 = vpop.f32.mrb[46].mxu0 }
 0x180   : > { %9322 = vst [vmem:[#allocation9_spill] sm:$0xff] %v7884_v16  ;;  %9323 = vst [vmem:[#allocation10_spill] sm:$0xff] %v7892_v34  ;;  %v5444_v45 = vpop.f32.mrb[47].mxu0 }
 0x181   : > { %v7896_v6 = vadd.f32 %v5444_v45, %v5443_v7 }
 0x182   : > { %v5582_v58 = vpop.f32.mrb[48].mxu1  ;;  %2415 = vmatmul.mubr.bf16.gmra.mrb[152].mxu0 %v7595_v38 }
 0x183   : > { %v5583_v35 = vpop.f32.mrb[49].mxu1  ;;  %2422 = vmatprep.mubr.bf16.mxu0 %v2075_v41 }
 0x184   : > { %v7894_v36 = vadd.f32 %v5583_v35, %v5582_v58  ;;  %v5585_v40 = vpop.f32.mrb[50].mxu1  ;;  %v7903_v58 = vpack.c.bf16 %v7892_v34, %v7892_v34 }
 0x185   : > { %v5586_v29 = vpop.f32.mrb[51].mxu1  ;;  %v5446_v55 = vpop.f32.mrb[48].mxu0 }
 0x186   : > { %9324 = vst [vmem:[#allocation11_spill] sm:$0xff] %v7894_v36  ;;  %v7898_v61 = vadd.f32 %v5586_v29, %v5585_v40  ;;  %v5447_v59 = vpop.f32.mrb[49].mxu0  ;;  %9326 = vst [vmem:[#allocation13_spill] sm:$0xff] %v7903_v58 }
 0x187   : > { %v7905_v35 = vadd.f32 %v5447_v59, %v5446_v55  ;;  %v5449_v24 = vpop.f32.mrb[50].mxu0 }
 0x188   : > { %9325 = vst [vmem:[#allocation12_spill] sm:$0xff] %v7898_v61  ;;  %v5450_v45 = vpop.f32.mrb[51].mxu0 }
 0x189   : > { %9327 = vst [vmem:[#allocation14_spill] sm:$0xff] %v7905_v35  ;;  %v7909_v61 = vadd.f32 %v5450_v45, %v5449_v24 }
 0x18a   : > { %v5588_v39 = vpop.f32.mrb[52].mxu1  ;;  %2423 = vmatmul.mubr.bf16.gmra.mrb[156].mxu0 %v7903_v58 }
 0x18b   : > { %v5589_v43 = vpop.f32.mrb[53].mxu1  ;;  %9329 = vst [vmem:[#allocation16_spill] sm:$0xff] %v7909_v61 }
 0x18c   : > { %v7907_v7 = vadd.f32 %v5589_v43, %v5588_v39  ;;  %v5591_v40 = vpop.f32.mrb[54].mxu1 }
 0x18d   : > { %v5592_v29 = vpop.f32.mrb[55].mxu1  ;;  %v5452_v41 = vpop.f32.mrb[52].mxu0 }
 0x18e   : > { %9328 = vst [vmem:[#allocation15_spill] sm:$0xff] %v7907_v7  ;;  %v7911_v38 = vadd.f32 %v5592_v29, %v5591_v40  ;;  %v5453_v36 = vpop.f32.mrb[53].mxu0 }
 0x18f   : > { %v7914_v16 = vadd.f32 %v5453_v36, %v5452_v41  ;;  %v5455_v55 = vpop.f32.mrb[54].mxu0 }
 0x190   : > { %9330 = vst [vmem:[#allocation17_spill] sm:$0xff] %v7911_v38  ;;  %v5456_v43 = vpop.f32.mrb[55].mxu0 }
 0x191   : > { %v7918_v35 = vadd.f32 %v5456_v43, %v5455_v55 }
 0x192   : > { %v5594_v47 = vpop.f32.mrb[56].mxu1 }
 0x193   : > { %v5595_v34 = vpop.f32.mrb[57].mxu1  ;;  %9332 = vst [vmem:[#allocation19_spill] sm:$0xff] %v7918_v35 }
 0x194   : > { %v7916_v59 = vadd.f32 %v5595_v34, %v5594_v47  ;;  %v5597_v39 = vpop.f32.mrb[58].mxu1 }
 0x195   : > { %v5598_v7 = vpop.f32.mrb[59].mxu1  ;;  %v5458_v40 = vpop.f32.mrb[56].mxu0 }
 0x196   : > { %9331 = vst [vmem:[#allocation18_spill] sm:$0xff] %v7916_v59  ;;  %v7920_v24 = vadd.f32 %v5598_v7, %v5597_v39  ;;  %v5459_v29 = vpop.f32.mrb[57].mxu0 }
 0x197   : > { %v7922_v38 = vadd.f32 %v5459_v29, %v5458_v40  ;;  %v5461_v61 = vpop.f32.mrb[58].mxu0 }
 0x198   : > { %9333 = vst [vmem:[#allocation20_spill] sm:$0xff] %v7920_v24  ;;  %v5462_v41 = vpop.f32.mrb[59].mxu0 }
 0x199   : > { %v7926_v47 = vadd.f32 %v5462_v41, %v5461_v61 }
 0x19a   : > { %v5600_v45 = vpop.f32.mrb[60].mxu1 }
 0x19b   : > { %v5601_v58 = vpop.f32.mrb[61].mxu1 }
 0x19c   : > { %v7924_v37 = vadd.f32 %v5601_v58, %v5600_v45  ;;  %v5603_v36 = vpop.f32.mrb[62].mxu1 }
 0x19d   : > { %v5604_v34 = vpop.f32.mrb[63].mxu1  ;;  %v5464_v55 = vpop.f32.mrb[60].mxu0 }
 0x19e   : > { %9334 = vst [vmem:[#allocation21_spill] sm:$0xff] %v7924_v37  ;;  %v7928_v59 = vadd.f32 %v5604_v34, %v5603_v36  ;;  %v5465_v43 = vpop.f32.mrb[61].mxu0 }
 0x19f   : > { %v7930_v7 = vadd.f32 %v5465_v43, %v5464_v55  ;;  %v5467_v39 = vpop.f32.mrb[62].mxu0 }
 0x1a0   : > { %v5468_v24 = vpop.f32.mrb[63].mxu0 }
 0x1a1   : > { %v7932_v35 = vadd.f32 %v5468_v24, %v5467_v39 }
 0x1a5   : > { %v6192_v40 = vpop.f32.mrb[64].mxu0 }
 0x1a6   : > { %v1457_v29 = vadd.f32 %v6192_v40, %v7781_v42  ;;  %v1448_v58 = vpop.f32.mrb[65].mxu0 }
 0x1a7   : > { %v1449_v45 = vadd.f32 %v7769_v22, %v1448_v58  ;;  %v6193_v37 = vpop.f32.mrb[66].mxu0 }
 0x1a8   : > { %v7937_v61 = vadd.f32 %v7767_v9, %v1457_v29  ;;  %v1460_v36 = vadd.f32 %v6193_v37, %v7785_v33  ;;  %v1451_v41 = vpop.f32.mrb[67].mxu0 }
 0x1a9   : > { %v7941_v34 = vadd.f32 %v7755_v54, %v1449_v45  ;;  %v1452_v55 = vadd.f32 %v7773_v15, %v1451_v41 }
 0x1aa   : > { %v7945_v24 = vadd.f32 %v7771_v31, %v1460_v36 }
 0x1ab   : > { %v7948_v42 = vadd.f32 %v7761_v50, %v1452_v55 }
 0x1ad   : > { %v6196_v43 = vpop.f32.mrb[68].mxu0 }
 0x1ae   : > { %v1473_v22 = vadd.f32 %v6196_v43, %v7807_v44  ;;  %v1464_v39 = vpop.f32.mrb[69].mxu0 }
 0x1af   : > { %v1465_v9 = vadd.f32 %v7793_v63, %v1464_v39  ;;  %v6197_v40 = vpop.f32.mrb[70].mxu0 }
 0x1b0   : > { %v7953_v33 = vadd.f32 %v7791_v62, %v1473_v22  ;;  %v1476_v54 = vadd.f32 %v6197_v40, %v7811_v21  ;;  %v1467_v37 = vpop.f32.mrb[71].mxu0 }
 0x1b1   : > { %v7957_v15 = vadd.f32 %v7779_v23, %v1465_v9  ;;  %v1468_v31 = vadd.f32 %v7797_v49, %v1467_v37  ;;  %v8014_v37 = vld [vmem:[#allocation3 + $0x2c0] sm:$0xff]  }
 0x1b2   : > { %v7961_v50 = vadd.f32 %v7795_v1, %v1476_v54  ;;  %6366 = vmatprep.subr.bf16.mxu1 %v8014_v37 }
 0x1b3   : > { %v7964_v44 = vadd.f32 %v7783_v46, %v1468_v31 }
 0x1b5   : > { %v6200_v29 = vpop.f32.mrb[72].mxu0 }
 0x1b6   : > { %v1489_v63 = vadd.f32 %v6200_v29, %v7827_v52  ;;  %v1480_v58 = vpop.f32.mrb[73].mxu0 }
 0x1b7   : > { %v1481_v62 = vadd.f32 %v7817_v12, %v1480_v58  ;;  %v6201_v45 = vpop.f32.mrb[74].mxu0 }
 0x1b8   : > { %v7969_v21 = vadd.f32 %v7815_v48, %v1489_v63  ;;  %v1492_v23 = vadd.f32 %v6201_v45, %v7831_v28  ;;  %v1483_v36 = vpop.f32.mrb[75].mxu0  ;;  %v9335_v63 = vld [vmem:[#allocation8_spill] sm:$0xff] }
 0x1b9   : > { %v7973_v49 = vadd.f32 %v7805_v8, %v1481_v62  ;;  %v1484_v1 = vadd.f32 %v7821_v14, %v1483_v36  ;;  %v9336_v62 = vld [vmem:[#allocation9_spill] sm:$0xff] }
 0x1ba   : > { %v7977_v46 = vadd.f32 %v7819_v2, %v1492_v23  ;;  %v9337_v23 = vld [vmem:[#allocation7_spill] sm:$0xff] }
 0x1bb   : > { %v7980_v52 = vadd.f32 %v7809_v25, %v1484_v1 }
 0x1bd   : > { %v6204_v41 = vpop.f32.mrb[76].mxu0 }
 0x1be   : > { %v1505_v12 = vadd.f32 %v6204_v41, %v7847_v3  ;;  %v1496_v55 = vpop.f32.mrb[77].mxu0 }
 0x1bf   : > { %v1497_v48 = vadd.f32 %v7837_v4, %v1496_v55  ;;  %v6205_v43 = vpop.f32.mrb[78].mxu0 }
 0x1c0   : > { %v7985_v28 = vadd.f32 %v7835_v0, %v1505_v12  ;;  %v1508_v8 = vadd.f32 %v6205_v43, %v7851_v60  ;;  %v1499_v22 = vpop.f32.mrb[79].mxu0 }
 0x1c1   : > { %v7989_v14 = vadd.f32 %v7825_v51, %v1497_v48  ;;  %v1500_v2 = vadd.f32 %v7841_v13, %v1499_v22 }
 0x1c2   : > { %v7993_v25 = vadd.f32 %v7839_v27, %v1508_v8  ;;  %v9342_v8 = vld [vmem:[#allocation11_spill] sm:$0xff] }
 0x1c3   : > { %v7996_v3 = vadd.f32 %v7829_v32, %v1500_v2  ;;  %v9343_v2 = vld [vmem:[#allocation16_spill] sm:$0xff] }
 0x1c5   : > { %v6208_v39 = vpop.f32.mrb[80].mxu0 }
 0x1c6   : > { %v1521_v4 = vadd.f32 %v6208_v39, %v7865_v10  ;;  %v1512_v9 = vpop.f32.mrb[81].mxu0 }
 0x1c7   : > { %v1513_v0 = vadd.f32 %v7855_v17, %v1512_v9  ;;  %v6209_v40 = vpop.f32.mrb[82].mxu0 }
 0x1c8   : > { %v8001_v60 = vadd.f32 %v7857_v20, %v1521_v4  ;;  %v1524_v51 = vadd.f32 %v6209_v40, %v7869_v11  ;;  %v1515_v54 = vpop.f32.mrb[83].mxu0  ;;  %v9344_v4 = vld [vmem:[#allocation17_spill] sm:$0xff] }
 0x1c9   : > { %v8005_v13 = vadd.f32 %v7845_v30, %v1513_v0  ;;  %v1516_v27 = vadd.f32 %v7859_v5, %v1515_v54  ;;  %v9346_v0 = vld [vmem:[#allocation12_spill] sm:$0xff] }
 0x1ca   : > { %v8009_v32 = vadd.f32 %v7861_v18, %v1524_v51 }
 0x1cb   : > { %v8012_v10 = vadd.f32 %v7849_v53, %v1516_v27 }
 0x1cd   : > { %v6212_v17 = vpop.f32.mrb[84].mxu0 }
 0x1ce   : > { %v1537_v20 = vadd.f32 %v6212_v17, %v7889_v19  ;;  %v1528_v11 = vpop.f32.mrb[85].mxu0 }
 0x1cf   : > { %v1529_v31 = vadd.f32 %v7878_v56, %v1528_v11  ;;  %v6213_v30 = vpop.f32.mrb[86].mxu0 }
 0x1d0   : > { %v8020_v29 = vadd.f32 %v7880_v57, %v1537_v20  ;;  %v1540_v5 = vadd.f32 %v6213_v30, %v7896_v6  ;;  %v1531_v18 = vpop.f32.mrb[87].mxu0  ;;  %v9338_v57 = vld [vmem:[#allocation14_spill] sm:$0xff]  ;;  %v9339_v6 = vld [vmem:[#allocation15_spill] sm:$0xff]  ;;  %v9347_v30 = vld [vmem:[#allocation21_spill] sm:$0xff] }
 0x1d1   : > { %v8024_v53 = vadd.f32 %v7867_v26, %v1529_v31  ;;  %v1532_v58 = vadd.f32 %v9335_v63, %v1531_v18  ;;  %v9341_v26 = vld [vmem:[#allocation19_spill] sm:$0xff] }
 0x1d2   : > { %v8028_v45 = vadd.f32 %v9336_v62, %v1540_v5  ;;  %v9349_v62 = vld [vmem:[#allocation18_spill] sm:$0xff] }
 0x1d3   : > { %v8031_v19 = vadd.f32 %v9337_v23, %v1532_v58 }
 0x1d5   : > { %v6216_v36 = vpop.f32.mrb[88].mxu0 }
 0x1d6   : > { %v1553_v56 = vadd.f32 %v6216_v36, %v7914_v16  ;;  %v1544_v1 = vpop.f32.mrb[89].mxu0 }
 0x1d7   : > { %v1545_v41 = vadd.f32 %v9338_v57, %v1544_v1  ;;  %v6217_v12 = vpop.f32.mrb[90].mxu0 }
 0x1d8   : > { %v8036_v55 = vadd.f32 %v9339_v6, %v1553_v56  ;;  %v1556_v48 = vadd.f32 %v6217_v12, %v9341_v26  ;;  %v1547_v43 = vpop.f32.mrb[91].mxu0  ;;  %v9352_v56 = vld [vmem:[#allocation20_spill] sm:$0xff] }
 0x1d9   : > { %v8040_v22 = vadd.f32 %v9342_v8, %v1545_v41  ;;  %v1548_v39 = vadd.f32 %v9343_v2, %v1547_v43  ;;  %v8077_v2 = vld [vmem:[%s9220_s2] ss:$0 sm:$0xff] }
 0x1da   : > { %9340 = vst [vmem:[#allocation22_spill] sm:$0xff] %v8036_v55  ;;  %v8044_v9 = vadd.f32 %v9344_v4, %v1556_v48  ;;  %v6905_v48 = vld [vmem:[#allocation3 + $0x280] sm:$0xff]  }
 0x1db   : > { %v8047_v16 = vadd.f32 %v9346_v0, %v1548_v39  ;;  %5902 = vmatprep.subr.bf16.mxu0 %v6905_v48 }
 0x1dc   : > { %9345 = vst [vmem:[#allocation23_spill] sm:$0xff] %v8044_v9 }
 0x1dd   : > { %v6220_v40 = vpop.f32.mrb[92].mxu0 }
 0x1de   : > { %v1569_v54 = vadd.f32 %v6220_v40, %v7930_v7  ;;  %v1560_v27 = vpop.f32.mrb[93].mxu0 }
 0x1df   : > { %v1561_v20 = vadd.f32 %v7922_v38, %v1560_v27  ;;  %v6221_v11 = vpop.f32.mrb[94].mxu0 }
 0x1e0   : > { %v8052_v5 = vadd.f32 %v9347_v30, %v1569_v54  ;;  %v1572_v18 = vadd.f32 %v6221_v11, %v7932_v35  ;;  %v1563_v63 = vpop.f32.mrb[95].mxu0 }
 0x1e1   : > { %v8056_v23 = vadd.f32 %v9349_v62, %v1561_v20  ;;  %v1564_v36 = vadd.f32 %v7926_v47, %v1563_v63 }
 0x1e2   : > { %v6288_v51 = vpop.f32.mrb[64].mxu1  ;;  %9348 = vst [vmem:[#allocation8_spill] sm:$0xff] %v8052_v5  ;;  %v8060_v7 = vadd.f32 %v7928_v59, %v1572_v18 }
 0x1e3   : > { %v2465_v17 = vpop.f32.mrb[65].mxu1  ;;  %9350 = vst [vmem:[#allocation9_spill] sm:$0xff] %v8056_v23  ;;  %v8063_v1 = vadd.f32 %v9352_v56, %v1564_v36 }
 0x1e4   : > { %v6289_v31 = vpop.f32.mrb[66].mxu1  ;;  %9351 = vst [vmem:[#allocation7_spill] sm:$0xff] %v8060_v7 }
 0x1e5   : > { %v2468_v58 = vpop.f32.mrb[67].mxu1  ;;  %9353 = vst [vmem:[#allocation14_spill] sm:$0xff] %v8063_v1  ;;  %v5646_v38 = vpop.f32.mrb[96].mxu0 }
 0x1e6   : > { %v5647_v41 = vpop.f32.mrb[97].mxu0 }
 0x1e7   : > { %v5648_v35 = vadd.f32 %v5647_v41, %v5646_v38  ;;  %v5649_v6 = vpop.f32.mrb[98].mxu0 }
 0x1e8   : > { %v5650_v43 = vpop.f32.mrb[99].mxu0 }
 0x1e9   : > { %v6468_v59 = vadd.f32 %v5648_v35, %v7941_v34  ;;  %v5651_v47 = vadd.f32 %v5650_v43, %v5649_v6 }
 0x1ea   : > { %v8065_v57 = vpop.f32.mrb[68].mxu1 }
 0x1eb   : > { %v8067_v12 = vpop.f32.mrb[69].mxu1  ;;  %v6469_v39 = vadd.f32 %v6468_v59, %v2465_v17  ;;  %v6476_v4 = vadd.f32 %v5651_v47, %v7948_v42  ;;  %v9354_v42 = vld [vmem:[#allocation6_spill] sm:$0xff] }
 0x1ec   : > { %v8069_v26 = vpop.f32.mrb[70].mxu1  ;;  %v8091_v56 = vrot.slane %v9354_v42, 2 }
 0x1ed   : > { %v8071_v8 = vpop.f32.mrb[71].mxu1  ;;  %v2631_v0 = vadd.f32 %v6469_v39, %v8077_v2  ;;  %v6477_v40 = vadd.f32 %v6476_v4, %v2468_v58  ;;  %v5652_v54 = vpop.f32.mrb[100].mxu0 }
 0x1ee   : > { %v5653_v20 = vpop.f32.mrb[101].mxu0 }
 0x1ef   : > { %v2663_v34 = vmax.f32 %v2631_v0, 0.0  ;;  %v2632_v30 = vadd.f32 %v6477_v40, %v8077_v2  ;;  %v5654_v18 = vadd.f32 %v5653_v20, %v5652_v54  ;;  %v5655_v63 = vpop.f32.mrb[102].mxu0  ;;  %v9355_v54 = vld [vmem:[#allocation10_spill] sm:$0xff] }
 0x1f0   : > { %v5656_v36 = vpop.f32.mrb[103].mxu0 }
 0x1f1   : > { %2695 = vst [vmem:[#allocation2 + $0x28] sm:$0xff] %v2663_v34  ;;  %v2664_v58 = vmax.f32 %v2632_v30, 0.0  ;;  %v6464_v38 = vadd.f32 %v5654_v18, %v7937_v61  ;;  %v5657_v41 = vadd.f32 %v5656_v36, %v5655_v63  ;;  %v2834_v35 = vrot.slane %v2663_v34, 1 }
 0x1f2   : > { %v8081_v27 = vpop.f32.mrb[72].mxu1  ;;  %v3007_v6 = vrot.slane %v2663_v34, 7  ;;  %v2900_v48 = vrot.slane %v2663_v34, 2 }
 0x1f3   : > { %v8083_v11 = vpop.f32.mrb[73].mxu1  ;;  %2696 = vst [vmem:[#allocation2 + $0x30] sm:$0xff] %v2664_v58  ;;  %v6465_v43 = vadd.f32 %v6464_v38, %v6288_v51  ;;  %v6472_v59 = vadd.f32 %v5657_v41, %v7945_v24  ;;  %v2835_v47 = vrot.slane %v2664_v58, 1  ;;  %v3009_v39 = vrot.slane %v2834_v35, 7 }
 0x1f4   : > { %v8086_v62 = vpop.f32.mrb[74].mxu1  ;;  %v3015_v4 = vrot.slane %v2664_v58, 7  ;;  %v2901_v0 = vrot.slane %v2664_v58, 2  ;;  %v3012_v40 = vrot.slane %v2900_v48, 7  ;;  %v3008_v20 = vsel %vm591_vm1, %v9355_v54, %v3007_v6 }
 0x1f5   : > { %v8088_v17 = vpop.f32.mrb[75].mxu1  ;;  %v2633_v30 = vadd.f32 %v6465_v43, %v8077_v2  ;;  %v6473_v42 = vadd.f32 %v6472_v59, %v6289_v31  ;;  %v5658_v61 = vpop.f32.mrb[104].mxu0  ;;  %v2836_v34 = vsel %vm429_vm0, %v2834_v35, %v2835_v47  ;;  %v3017_v63 = vrot.slane %v2835_v47, 7 }
 0x1f6   : > { %v5659_v51 = vpop.f32.mrb[105].mxu0  ;;  %v3010_v24 = vrot.slane %v2836_v34, 7  ;;  %v2902_v38 = vsel %vm494_vm3, %v2900_v48, %v2901_v0  ;;  %v2904_v58 = vsel %vm494_vm3, %v2901_v0, %v8091_v56  ;;  %v3016_v41 = vsel %vm591_vm1, %v3007_v6, %v3015_v4 }
 0x1f7   : > { %v8107_v7 = vmax.f32 %v2633_v30, 0.0  ;;  %v2634_v31 = vadd.f32 %v6473_v42, %v8077_v2  ;;  %v5660_v43 = vadd.f32 %v5659_v51, %v5658_v61  ;;  %v5661_v59 = vpop.f32.mrb[106].mxu0  ;;  %v3013_v35 = vrot.slane %v2902_v38, 7  ;;  %v6906_v61 = vld [vmem:[#allocation3 + $0x240] sm:$0xff]  }
 0x1f8   : > { %v5662_v47 = vpop.f32.mrb[107].mxu0  ;;  %v3011_v34 = vsel %vm591_vm1, %v3009_v39, %v3010_v24  ;;  %v3018_v48 = vsel %vm591_vm1, %v3010_v24, %v3017_v63  ;;  %v3019_v23 = vrot.slane %v2904_v58, 7  ;;  %v8116_v0 = vpack.c.bf16 %v3016_v41, %v3008_v20  ;;  %v6907_v24 = vld [vmem:[#allocation3 + $0x288] sm:$0xff]  }
 0x1f9   : > { %2697 = vst [vmem:[#allocation2 + $0x48] sm:$0xff] %v8107_v7  ;;  %v2666_v6 = vmax.f32 %v2634_v31, 0.0  ;;  %v6484_v4 = vadd.f32 %v5660_v43, %v7957_v15  ;;  %v5663_v30 = vadd.f32 %v5662_v47, %v5661_v59  ;;  %v8120_v42 = vpack.c.bf16 %v3018_v48, %v3011_v34  ;;  %v6908_v48 = vld [vmem:[#allocation3 + $0x248] sm:$0xff]  }
 0x1fa   : > { %v8098_v18 = vpop.f32.mrb[76].mxu1  ;;  %9356 = vst [vmem:[#allocation15_spill] sm:$0xff] %v8116_v0  ;;  %v3014_v51 = vsel %vm591_vm1, %v3012_v40, %v3013_v35  ;;  %v3020_v38 = vsel %vm591_vm1, %v3013_v35, %v3019_v23  ;;  %v2837_v39 = vrot.slane %v8107_v7, 1  ;;  %v2905_v63 = vrot.slane %v8107_v7, 2 }
 0x1fb   : > { %v8101_v36 = vpop.f32.mrb[77].mxu1  ;;  %9357 = vst [vmem:[#allocation19_spill] sm:$0xff] %v8120_v42  ;;  %2698 = vst [vmem:[#allocation2 + $0x50] sm:$0xff] %v2666_v6  ;;  %v6485_v20 = vadd.f32 %v6484_v4, %v8067_v12  ;;  %v6492_v58 = vadd.f32 %v5663_v30, %v7964_v44  ;;  %3685 = vmatprep.mubr.bf16.mxu0 %v8120_v42  ;;  %v8129_v15 = vpack.c.bf16 %v3020_v38, %v3014_v51 }
 0x1fc   : > { %v8110_v5 = vpop.f32.mrb[78].mxu1  ;;  %v2838_v41 = vrot.slane %v2666_v6, 1  ;;  %3686 = vmatmul.mubr.bf16.vlgmr.msra.gmra.mrb[160].mxu0 %v8116_v0  ;;  %v2906_v40 = vrot.slane %v2666_v6, 2  ;;  %v3024_v31 = vrot.slane %v2837_v39, 7  ;;  %v3027_v23 = vrot.slane %v2905_v63, 7 }
 0x1fd   : > { %v8112_v1 = vpop.f32.mrb[79].mxu1  ;;  %9358 = vst [vmem:[#allocation11_spill] sm:$0xff] %v8129_v15  ;;  %v3022_v43 = vrot.slane %v8107_v7, 7  ;;  %v2635_v59 = vadd.f32 %v6485_v20, %v8077_v2  ;;  %v6493_v35 = vadd.f32 %v6492_v58, %v8071_v8  ;;  %v5664_v47 = vpop.f32.mrb[108].mxu0  ;;  %6334 = vmatprep.mubr.bf16.mxu1 %v8129_v15  ;;  %5903 = vmatpush3.bf16.msra.mxu0 %v6906_v61  ;;  %v6910_v20 = vld [vmem:[#allocation3 + $0x290] sm:$0xff]   ;;  %v3030_v55 = vrot.slane %v2666_v6, 7 }
 0x1fe   : > { %v2839_v12 = vsel %vm429_vm0, %v2837_v39, %v2838_v41  ;;  %v3032_v34 = vrot.slane %v2838_v41, 7  ;;  %v5665_v4 = vpop.f32.mrb[109].mxu0  ;;  %v2907_v7 = vsel %vm494_vm3, %v2905_v63, %v2906_v40  ;;  %v2909_v38 = vsel %vm494_vm3, %v2906_v40, %v8091_v56  ;;  %5904 = vmatprep.subr.bf16.mxu0 %v6907_v24  ;;  %v6911_v6 = vld [vmem:[#allocation3 + $0x250] sm:$0xff]  }
 0x1ff   : > { %v3025_v51 = vrot.slane %v2839_v12, 7  ;;  %v3023_v8 = vsel %vm591_vm1, %v9355_v54, %v3022_v43  ;;  %v8146_v58 = vmax.f32 %v2635_v59, 0.0  ;;  %v2636_v39 = vadd.f32 %v6493_v35, %v8077_v2  ;;  %v5667_v41 = vpop.f32.mrb[110].mxu0 }
 0x200   : > { %v5666_v61 = vadd.f32 %v5665_v4, %v5664_v47  ;;  %v3028_v42 = vrot.slane %v2907_v7, 7  ;;  %v5668_v12 = vpop.f32.mrb[111].mxu0  ;;  %v3034_v9 = vrot.slane %v2909_v38, 7 }
 0x201   : > { %v3026_v63 = vsel %vm591_vm1, %v3024_v31, %v3025_v51  ;;  %v3033_v40 = vsel %vm591_vm1, %v3025_v51, %v3032_v34  ;;  %2699 = vst [vmem:[#allocation2 + $0x68] sm:$0xff] %v8146_v58  ;;  %v8156_v24 = vmax.f32 %v2636_v39, 0.0  ;;  %v5669_v35 = vadd.f32 %v5668_v12, %v5667_v41  ;;  %5905 = vmatpush3.bf16.msra.mxu0 %v6908_v48 }
 0x202   : > { %v8136_v44 = vpop.f32.mrb[80].mxu1  ;;  %v6480_v59 = vadd.f32 %v5666_v61, %v7953_v33  ;;  %v8159_v47 = vpack.c.bf16 %v3033_v40, %v3026_v63  ;;  %v3029_v4 = vsel %vm591_vm1, %v3027_v23, %v3028_v42  ;;  %v3035_v7 = vsel %vm591_vm1, %v3028_v42, %v3034_v9  ;;  %5906 = vmatprep.subr.bf16.mxu0 %v6910_v20  ;;  %v6901_v23 = vld [vmem:[#allocation3 + $0x2c8] sm:$0xff]   ;;  %v6912_v9 = vld [vmem:[#allocation3 + $0x298] sm:$0xff]  }
 0x203   : > { %v8139_v30 = vpop.f32.mrb[81].mxu1  ;;  %v3031_v31 = vsel %vm591_vm1, %v3022_v43, %v3030_v55  ;;  %v2840_v34 = vrot.slane %v8146_v58, 1  ;;  %2700 = vst [vmem:[#allocation2 + $0x70] sm:$0xff] %v8156_v24  ;;  %v6488_v33 = vadd.f32 %v5669_v35, %v7961_v50  ;;  %v8169_v38 = vpack.c.bf16 %v3035_v7, %v3029_v4 }
 0x204   : > { %v8149_v0 = vpop.f32.mrb[82].mxu1  ;;  %9359 = vst [vmem:[#allocation16_spill] sm:$0xff] %v8159_v47  ;;  %v6481_v51 = vadd.f32 %v6480_v59, %v8065_v57  ;;  %3693 = vmatprep.mubr.bf16.mxu0 %v8159_v47  ;;  %v8171_v48 = vpack.c.bf16 %v3031_v31, %v3023_v8  ;;  %v2841_v55 = vrot.slane %v8156_v24, 1  ;;  %v2910_v43 = vrot.slane %v8146_v58, 2 }
 0x205   : > { %v8151_v15 = vpop.f32.mrb[83].mxu1  ;;  %9360 = vst [vmem:[#allocation17_spill] sm:$0xff] %v8169_v38  ;;  %v3039_v42 = vrot.slane %v2840_v34, 7  ;;  %v2911_v20 = vrot.slane %v8156_v24, 2  ;;  %v6489_v57 = vadd.f32 %v6488_v33, %v8069_v26  ;;  %v5670_v50 = vpop.f32.mrb[112].mxu0  ;;  %6335 = vmatmul.mubr.bf16.vlgmr.msra.gmra.mrb[96].mxu1 %v8169_v38  ;;  %v3037_v61 = vrot.slane %v8146_v58, 7  ;;  %5907 = vmatpush3.bf16.msra.mxu0 %v6911_v6 }
 0x206   : > { %9361 = vst [vmem:[#allocation12_spill] sm:$0xff] %v8171_v48  ;;  %v2637_v39 = vadd.f32 %v6481_v51, %v8077_v2  ;;  %3694 = vmatmul.mubr.bf16.gmra.mrb[164].mxu0 %v8171_v48  ;;  %v3045_v41 = vrot.slane %v8156_v24, 7  ;;  %v5671_v12 = vpop.f32.mrb[113].mxu0  ;;  %v2842_v40 = vsel %vm429_vm0, %v2840_v34, %v2841_v55  ;;  %v3047_v59 = vrot.slane %v2841_v55, 7  ;;  %6367 = vmatpush3.bf16.msra.mxu1 %v8014_v37  ;;  %v6902_v34 = vld [vmem:[#allocation3 + $0x2d0] sm:$0xff]   ;;  %v6913_v6 = vld [vmem:[#allocation3 + $0x258] sm:$0xff]  }
 0x207   : > { %v2912_v35 = vsel %vm494_vm3, %v2910_v43, %v2911_v20  ;;  %v2914_v26 = vsel %vm494_vm3, %v2911_v20, %v8091_v56  ;;  %v2638_v58 = vadd.f32 %v6489_v57, %v8077_v2  ;;  %v5672_v7 = vadd.f32 %v5671_v12, %v5670_v50  ;;  %v5673_v24 = vpop.f32.mrb[114].mxu0  ;;  %6368 = vmatprep.subr.bf16.mxu1 %v6901_v23 }
 0x208   : > { %v8191_v4 = vmax.f32 %v2637_v39, 0.0  ;;  %v3040_v51 = vrot.slane %v2842_v40, 7  ;;  %5908 = vmatprep.subr.bf16.mxu0 %v6912_v9  ;;  %v5674_v33 = vpop.f32.mrb[115].mxu0  ;;  %v3042_v48 = vrot.slane %v2910_v43, 7  ;;  %v3043_v20 = vrot.slane %v2912_v35, 7 }
 0x209   : > { %v3049_v47 = vrot.slane %v2914_v26, 7  ;;  %v3038_v37 = vsel %vm591_vm1, %v9355_v54, %v3037_v61  ;;  %v8201_v39 = vmax.f32 %v2638_v58, 0.0  ;;  %v6500_v57 = vadd.f32 %v5672_v7, %v7973_v49  ;;  %5909 = vmatpush3.bf16.msra.mxu0 %v6913_v6 }
 0x20a   : > { %v8180_v8 = vpop.f32.mrb[84].mxu1  ;;  %2701 = vst [vmem:[#allocation2 + $0x88] sm:$0xff] %v8191_v4  ;;  %v5675_v50 = vadd.f32 %v5674_v33, %v5673_v24  ;;  %v3041_v12 = vsel %vm591_vm1, %v3039_v42, %v3040_v51  ;;  %v3048_v9 = vsel %vm591_vm1, %v3040_v51, %v3047_v59  ;;  %v3044_v40 = vsel %vm591_vm1, %v3042_v48, %v3043_v20  ;;  %v6903_v42 = vld [vmem:[#allocation3 + $0x2d8] sm:$0xff]   ;;  %v6915_v59 = vld [vmem:[#allocation3 + $0x2a0] sm:$0xff]  }
 0x20b   : > { %v8184_v63 = vpop.f32.mrb[85].mxu1  ;;  %v3050_v43 = vsel %vm591_vm1, %v3043_v20, %v3049_v47  ;;  %v3046_v35 = vsel %vm591_vm1, %v3037_v61, %v3045_v41  ;;  %6369 = vmatpush3.bf16.msra.mxu1 %v6901_v23  ;;  %2702 = vst [vmem:[#allocation2 + $0x90] sm:$0xff] %v8201_v39  ;;  %v6501_v26 = vadd.f32 %v6500_v57, %v8083_v11  ;;  %v2843_v47 = vrot.slane %v8191_v4, 1  ;;  %v6916_v61 = vld [vmem:[#allocation3 + $0x260] sm:$0xff]   ;;  %v6917_v20 = vld [vmem:[#allocation3 + $0x2a8] sm:$0xff]  }
 0x20c   : > { %v8194_v31 = vpop.f32.mrb[86].mxu1  ;;  %v6508_v58 = vadd.f32 %v5675_v50, %v7980_v52  ;;  %v8212_v38 = vpack.c.bf16 %v3048_v9, %v3041_v12  ;;  %v8214_v49 = vpack.c.bf16 %v3050_v43, %v3044_v40  ;;  %6370 = vmatprep.subr.bf16.mxu1 %v6902_v34  ;;  %v8216_v7 = vpack.c.bf16 %v3046_v35, %v3038_v37 }
 0x20d   : > { %v8196_v55 = vpop.f32.mrb[87].mxu1  ;;  %v2844_v48 = vrot.slane %v8201_v39, 1  ;;  %v2915_v23 = vrot.slane %v8191_v4, 2  ;;  %v2639_v11 = vadd.f32 %v6501_v26, %v8077_v2  ;;  %v5676_v41 = vpop.f32.mrb[116].mxu0  ;;  %v2916_v51 = vrot.slane %v8201_v39, 2  ;;  %5910 = vmatprep.subr.bf16.mxu0 %v6915_v59 }
 0x20e   : > { %9362 = vst [vmem:[#allocation21_spill] sm:$0xff] %v8212_v38  ;;  %9363 = vst [vmem:[#allocation18_spill] sm:$0xff] %v8214_v49  ;;  %v6509_v52 = vadd.f32 %v6508_v58, %v8088_v17  ;;  %3701 = vmatprep.mubr.bf16.mxu0 %v8212_v38  ;;  %6338 = vmatprep.mubr.bf16.mxu1 %v8214_v49  ;;  %v3052_v33 = vrot.slane %v8191_v4, 7  ;;  %v5677_v37 = vpop.f32.mrb[117].mxu0  ;;  %v3054_v17 = vrot.slane %v2843_v47, 7  ;;  %v6904_v58 = vld [vmem:[#allocation3 + $0x2e0] sm:$0xff]  }
 0x20f   : > { %9364 = vst [vmem:[#allocation20_spill] sm:$0xff] %v8216_v7  ;;  %3702 = vmatmul.mubr.bf16.gmra.mrb[168].mxu0 %v8216_v7  ;;  %v2845_v57 = vsel %vm429_vm0, %v2843_v47, %v2844_v48  ;;  %v3062_v50 = vrot.slane %v2844_v48, 7  ;;  %v3057_v12 = vrot.slane %v2915_v23, 7  ;;  %6371 = vmatpush3.bf16.msra.mxu1 %v6902_v34  ;;  %v8233_v9 = vmax.f32 %v2639_v11, 0.0  ;;  %v5679_v35 = vpop.f32.mrb[118].mxu0 }
 0x210   : > { %v2640_v40 = vadd.f32 %v6509_v52, %v8077_v2  ;;  %v5678_v43 = vadd.f32 %v5677_v37, %v5676_v41  ;;  %v3055_v4 = vrot.slane %v2845_v57, 7  ;;  %6372 = vmatprep.subr.bf16.mxu1 %v6903_v42  ;;  %v5680_v7 = vpop.f32.mrb[119].mxu0  ;;  %v2917_v47 = vsel %vm494_vm3, %v2915_v23, %v2916_v51  ;;  %5911 = vmatpush3.bf16.msra.mxu0 %v6916_v61  ;;  %v6918_v52 = vld [vmem:[#allocation3 + $0x268] sm:$0xff]   ;;  %v6920_v23 = vld [vmem:[#allocation3 + $0x2b0] sm:$0xff]  }
 0x211   : > { %v2919_v34 = vsel %vm494_vm3, %v2916_v51, %v8091_v56  ;;  %v3053_v48 = vsel %vm591_vm1, %v9355_v54, %v3052_v33  ;;  %v3060_v11 = vrot.slane %v8201_v39, 7  ;;  %2703 = vst [vmem:[#allocation2 + $0xa8] sm:$0xff] %v8233_v9  ;;  %v5681_v37 = vadd.f32 %v5680_v7, %v5679_v35  ;;  %5912 = vmatprep.subr.bf16.mxu0 %v6917_v20  ;;  %v6909_v7 = vld [vmem:[#allocation3 + $0x2e8] sm:$0xff]  }
 0x212   : > { %v8225_v24 = vpop.f32.mrb[88].mxu1  ;;  %v8247_v41 = vmax.f32 %v2640_v40, 0.0  ;;  %v6496_v59 = vadd.f32 %v5678_v43, %v7969_v21  ;;  %v3056_v57 = vsel %vm591_vm1, %v3054_v17, %v3055_v4  ;;  %v3063_v51 = vsel %vm591_vm1, %v3055_v4, %v3062_v50 }
 0x213   : > { %9365 = vst [vmem:[#allocation6_spill] sm:$0xff] %v8225_v24  ;;  %v8230_v6 = vpop.f32.mrb[89].mxu1  ;;  %v3058_v49 = vrot.slane %v2917_v47, 7  ;;  %v3061_v24 = vsel %vm591_vm1, %v3052_v33, %v3060_v11  ;;  %6373 = vmatpush3.bf16.msra.mxu1 %v6903_v42  ;;  %v6504_v61 = vadd.f32 %v5681_v37, %v7977_v46  ;;  %v8256_v40 = vpack.c.bf16 %v3063_v51, %v3056_v57  ;;  %v6921_v33 = vld [vmem:[#allocation3 + $0x270] sm:$0xff]  }
 0x214   : > { %v8236_v26 = vpop.f32.mrb[90].mxu1  ;;  %2704 = vst [vmem:[#allocation2 + $0xb0] sm:$0xff] %v8247_v41  ;;  %v6497_v39 = vadd.f32 %v6496_v59, %v8081_v27  ;;  %v8258_v21 = vpack.c.bf16 %v3061_v24, %v3053_v48  ;;  %6374 = vmatprep.subr.bf16.mxu1 %v6904_v58  ;;  %v2846_v50 = vrot.slane %v8233_v9, 1  ;;  %v2847_v42 = vrot.slane %v8247_v41, 1  ;;  %5913 = vmatpush3.bf16.msra.mxu0 %v6918_v52  ;;  %v6914_v51 = vld [vmem:[#allocation3 + $0x2f0] sm:$0xff]  }
 0x215   : > { %9366 = vst [vmem:[#allocation10_spill] sm:$0xff] %v8236_v26  ;;  %v8238_v38 = vpop.f32.mrb[91].mxu1  ;;  %v3064_v26 = vrot.slane %v2919_v34, 7  ;;  %9367 = vst [vmem:[#allocation24_spill] sm:$0xff] %v8256_v40  ;;  %v3059_v20 = vsel %vm591_vm1, %v3057_v12, %v3058_v49  ;;  %v6505_v46 = vadd.f32 %v6504_v61, %v8086_v62  ;;  %v5682_v43 = vpop.f32.mrb[120].mxu0  ;;  %3709 = vmatprep.mubr.bf16.mxu0 %v8256_v40  ;;  %v2920_v12 = vrot.slane %v8233_v9, 2 }
 0x216   : > { %9368 = vst [vmem:[#allocation25_spill] sm:$0xff] %v8258_v21  ;;  %v2641_v27 = vadd.f32 %v6497_v39, %v8077_v2  ;;  %5914 = vmatprep.subr.bf16.mxu0 %v6920_v23  ;;  %v2848_v47 = vsel %vm429_vm0, %v2846_v50, %v2847_v42  ;;  %v3069_v34 = vrot.slane %v2846_v50, 7  ;;  %v3077_v62 = vrot.slane %v2847_v42, 7  ;;  %v6923_v42 = vld [vmem:[#allocation3 + $0x278] sm:$0xff]  }
 0x217   : > { %v3065_v17 = vsel %vm591_vm1, %v3058_v49, %v3064_v26  ;;  %v6922_v49 = vld [vmem:[#allocation3 + $0x2b8] sm:$0xff]   ;;  %v5683_v26 = vpop.f32.mrb[121].mxu0  ;;  %3710 = vmatmul.mubr.bf16.gmra.mrb[172].mxu0 %v8258_v21  ;;  %v2921_v48 = vrot.slane %v8247_v41, 2  ;;  %6375 = vmatpush3.bf16.msra.mxu1 %v6904_v58  ;;  %v2642_v52 = vadd.f32 %v6505_v46, %v8077_v2  ;;  %v3070_v23 = vrot.slane %v2848_v47, 7 }
 0x218   : > { %v8267_v24 = vpack.c.bf16 %v3065_v17, %v3059_v20  ;;  %v8277_v11 = vmax.f32 %v2641_v27, 0.0  ;;  %v5684_v59 = vadd.f32 %v5683_v26, %v5682_v43  ;;  %v5685_v37 = vpop.f32.mrb[122].mxu0  ;;  %6376 = vmatprep.subr.bf16.mxu1 %v6909_v7  ;;  %v3072_v17 = vrot.slane %v2920_v12, 7  ;;  %5915 = vmatpush3.bf16.msra.mxu0 %v6921_v33 }
 0x219   : > { %v5686_v39 = vpop.f32.mrb[123].mxu0  ;;  %v2922_v20 = vsel %vm494_vm3, %v2920_v12, %v2921_v48  ;;  %v2924_v58 = vsel %vm494_vm3, %v2921_v48, %v8091_v56  ;;  %v3067_v50 = vrot.slane %v8233_v9, 7  ;;  %v8290_v27 = vmax.f32 %v2642_v52, 0.0  ;;  %5916 = vmatprep.subr.bf16.mxu0 %v6922_v49  ;;  %v6919_v49 = vld [vmem:[#allocation3 + $0x2f8] sm:$0xff]  }
 0x21a   : > { %v8269_v35 = vpop.f32.mrb[92].mxu1  ;;  %6339 = vmatmul.mubr.bf16.gmra.mrb[100].mxu1 %v8267_v24  ;;  %2705 = vst [vmem:[#allocation2 + $0xc8] sm:$0xff] %v8277_v11  ;;  %v6516_v46 = vadd.f32 %v5684_v59, %v7989_v14  ;;  %v5687_v43 = vadd.f32 %v5686_v39, %v5685_v37  ;;  %v3071_v26 = vsel %vm591_vm1, %v3069_v34, %v3070_v23  ;;  %v3073_v21 = vrot.slane %v2922_v20, 7 }
 0x21b   : > { %v8273_v4 = vpop.f32.mrb[93].mxu1  ;;  %v3078_v47 = vsel %vm591_vm1, %v3070_v23, %v3077_v62  ;;  %v3079_v40 = vrot.slane %v2924_v58, 7  ;;  %v3068_v12 = vsel %vm591_vm1, %v9355_v54, %v3067_v50  ;;  %6377 = vmatpush3.bf16.msra.mxu1 %v6909_v7  ;;  %2706 = vst [vmem:[#allocation2 + $0xd0] sm:$0xff] %v8290_v27  ;;  %v3075_v14 = vrot.slane %v8247_v41, 7 }
 0x21c   : > { %v8281_v57 = vpop.f32.mrb[94].mxu1  ;;  %v6517_v9 = vadd.f32 %v6516_v46, %v8101_v36  ;;  %v6524_v33 = vadd.f32 %v5687_v43, %v7996_v3  ;;  %v8300_v48 = vpack.c.bf16 %v3078_v47, %v3071_v26  ;;  %6378 = vmatprep.subr.bf16.mxu1 %v6914_v51  ;;  %v3074_v34 = vsel %vm591_vm1, %v3072_v17, %v3073_v21  ;;  %v6924_v43 = vld [vmem:[#allocation3 + $0x400] sm:$0xff]  }
 0x21d   : > { %v8283_v61 = vpop.f32.mrb[95].mxu1  ;;  %v3080_v62 = vsel %vm591_vm1, %v3073_v21, %v3079_v40  ;;  %v2849_v52 = vrot.slane %v8277_v11, 1  ;;  %v2850_v7 = vrot.slane %v8290_v27, 1  ;;  %5917 = vmatpush3.bf16.msra.mxu0 %v6923_v42  ;;  %v5688_v3 = vpop.f32.mrb[124].mxu0  ;;  %v3076_v41 = vsel %vm591_vm1, %v3067_v50, %v3075_v14 }
 0x21e   : > { %v2643_v59 = vadd.f32 %v6517_v9, %v8077_v2  ;;  %v6525_v36 = vadd.f32 %v6524_v33, %v8112_v1  ;;  %3717 = vmatprep.mubr.bf16.mxu0 %v8300_v48  ;;  %v8310_v37 = vpack.c.bf16 %v3080_v62, %v3074_v34  ;;  %v5689_v23 = vpop.f32.mrb[125].mxu0  ;;  %v8313_v39 = vpack.c.bf16 %v3076_v41, %v3068_v12 }
 0x21f   : > { %v2851_v40 = vsel %vm429_vm0, %v2849_v52, %v2850_v7  ;;  %v3084_v21 = vrot.slane %v2849_v52, 7  ;;  %v3092_v20 = vrot.slane %v2850_v7, 7  ;;  %6379 = vmatpush3.bf16.msra.mxu1 %v6914_v51  ;;  %v5690_v1 = vadd.f32 %v5689_v23, %v5688_v3  ;;  %v5691_v42 = vpop.f32.mrb[126].mxu0 }
 0x220   : > { %v8316_v58 = vmax.f32 %v2643_v59, 0.0  ;;  %v2644_v17 = vadd.f32 %v6525_v36, %v8077_v2  ;;  %6342 = vmatprep.mubr.bf16.mxu1 %v8310_v37  ;;  %v3085_v46 = vrot.slane %v2851_v40, 7  ;;  %6380 = vmatprep.subr.bf16.mxu1 %v6919_v49  ;;  %v5692_v50 = vpop.f32.mrb[127].mxu0  ;;  %v2925_v26 = vrot.slane %v8277_v11, 2 }
 0x221   : > { %3718 = vmatmul.mubr.bf16.gmra.mrb[176].mxu0 %v8313_v39  ;;  %v2926_v47 = vrot.slane %v8290_v27, 2  ;;  %v3082_v51 = vrot.slane %v8277_v11, 7  ;;  %v3090_v12 = vrot.slane %v8290_v27, 7  ;;  %v6512_v33 = vadd.f32 %v5690_v1, %v7985_v28 }
 0x222   : > { %2707 = vst [vmem:[#allocation2 + $0xe8] sm:$0xff] %v8316_v58  ;;  %v8326_v9 = vmax.f32 %v2644_v17, 0.0  ;;  %v5693_v14 = vadd.f32 %v5692_v50, %v5691_v42  ;;  %v3086_v34 = vsel %vm591_vm1, %v3084_v21, %v3085_v46  ;;  %v3093_v62 = vsel %vm591_vm1, %v3085_v46, %v3092_v20 }
 0x223   : > { %v2927_v52 = vsel %vm494_vm3, %v2925_v26, %v2926_v47  ;;  %v2929_v7 = vsel %vm494_vm3, %v2926_v47, %v8091_v56  ;;  %v3087_v59 = vrot.slane %v2925_v26, 7  ;;  %6381 = vmatpush3.bf16.msra.mxu1 %v6919_v49  ;;  %v6513_v11 = vadd.f32 %v6512_v33, %v8098_v18 }
 0x224   : > { %2708 = vst [vmem:[#allocation2 + $0xf0] sm:$0xff] %v8326_v9  ;;  %v6520_v27 = vadd.f32 %v5693_v14, %v7993_v25  ;;  %v8337_v36 = vpack.c.bf16 %v3093_v62, %v3086_v34  ;;  %v3088_v28 = vrot.slane %v2927_v52, 7  ;;  %6038 = vmatprep.subr.bf16.mxu1 %v6924_v43  ;;  %v3094_v3 = vrot.slane %v2929_v7, 7 }
 0x225   : > { %v3083_v41 = vsel %vm591_vm1, %v9355_v54, %v3082_v51  ;;  %v3091_v23 = vsel %vm591_vm1, %v3082_v51, %v3090_v12  ;;  %v2852_v40 = vrot.slane %v8316_v58, 1  ;;  %v2645_v49 = vadd.f32 %v6513_v11, %v8077_v2  ;;  %v5694_v20 = vpop.f32.mrb[128].mxu0 }
 0x226   : > { %v6521_v21 = vadd.f32 %v6520_v27, %v8110_v5  ;;  %3725 = vmatprep.mubr.bf16.mxu0 %v8337_v36  ;;  %v3089_v25 = vsel %vm591_vm1, %v3087_v59, %v3088_v28  ;;  %v8347_v18 = vpack.c.bf16 %v3091_v23, %v3083_v41  ;;  %v5695_v17 = vpop.f32.mrb[129].mxu0  ;;  %v3095_v1 = vsel %vm591_vm1, %v3088_v28, %v3094_v3 }
 0x227   : > { %v2853_v42 = vrot.slane %v8326_v9, 1  ;;  %v3099_v46 = vrot.slane %v2852_v40, 7  ;;  %v2930_v43 = vrot.slane %v8316_v58, 2  ;;  %v8352_v50 = vmax.f32 %v2645_v49, 0.0  ;;  %v5697_v47 = vpop.f32.mrb[130].mxu0 }
 0x228   : > { %v2646_v26 = vadd.f32 %v6521_v21, %v8077_v2  ;;  %v5696_v5 = vadd.f32 %v5695_v17, %v5694_v20  ;;  %v8355_v51 = vpack.c.bf16 %v3095_v1, %v3089_v25  ;;  %v5698_v12 = vpop.f32.mrb[131].mxu0  ;;  %v2931_v34 = vrot.slane %v8326_v9, 2 }
 0x229   : > { %3726 = vmatmul.mubr.bf16.gmra.mrb[180].mxu0 %v8347_v18  ;;  %v2854_v33 = vsel %vm429_vm0, %v2852_v40, %v2853_v42  ;;  %v3107_v14 = vrot.slane %v2853_v42, 7  ;;  %v3102_v62 = vrot.slane %v2930_v43, 7  ;;  %2709 = vst [vmem:[#allocation2 + $0x108] sm:$0xff] %v8352_v50  ;;  %v5699_v59 = vadd.f32 %v5698_v12, %v5697_v47 }
 0x22a   : > { %v8361_v52 = vmax.f32 %v2646_v26, 0.0  ;;  %v6532_v7 = vadd.f32 %v5696_v5, %v8005_v13  ;;  %6343 = vmatmul.mubr.bf16.gmra.mrb[104].mxu1 %v8355_v51  ;;  %v3100_v11 = vrot.slane %v2854_v33, 7  ;;  %v2932_v27 = vsel %vm494_vm3, %v2930_v43, %v2931_v34 }
 0x22b   : > { %v2934_v28 = vsel %vm494_vm3, %v2931_v34, %v8091_v56  ;;  %v3097_v3 = vrot.slane %v8316_v58, 7  ;;  %v3105_v41 = vrot.slane %v8326_v9, 7  ;;  %v6540_v40 = vadd.f32 %v5699_v59, %v8012_v10 }
 0x22c   : > { %2710 = vst [vmem:[#allocation2 + $0x110] sm:$0xff] %v8361_v52  ;;  %v6533_v23 = vadd.f32 %v6532_v7, %v8139_v30  ;;  %v3101_v13 = vsel %vm591_vm1, %v3099_v46, %v3100_v11  ;;  %v3108_v49 = vsel %vm591_vm1, %v3100_v11, %v3107_v14  ;;  %v3103_v20 = vrot.slane %v2932_v27, 7 }
 0x22d   : > { %v8375_v21 = vpack.c.bf16 %v3108_v49, %v3101_v13  ;;  %v3109_v25 = vrot.slane %v2934_v28, 7  ;;  %v3098_v17 = vsel %vm591_vm1, %v9355_v54, %v3097_v3  ;;  %v6541_v9 = vadd.f32 %v6540_v40, %v8151_v15  ;;  %v5700_v1 = vpop.f32.mrb[132].mxu0 }
 0x22e   : > { %v2647_v58 = vadd.f32 %v6533_v23, %v8077_v2  ;;  %v3106_v30 = vsel %vm591_vm1, %v3097_v3, %v3105_v41  ;;  %v2855_v10 = vrot.slane %v8352_v50, 1  ;;  %v5701_v42 = vpop.f32.mrb[133].mxu0  ;;  %v3104_v46 = vsel %vm591_vm1, %v3102_v62, %v3103_v20 }
 0x22f   : > { %3733 = vmatprep.mubr.bf16.mxu0 %v8375_v21  ;;  %v3110_v43 = vsel %vm591_vm1, %v3103_v20, %v3109_v25  ;;  %v8386_v26 = vpack.c.bf16 %v3106_v30, %v3098_v17  ;;  %v2856_v5 = vrot.slane %v8361_v52, 1  ;;  %v2648_v15 = vadd.f32 %v6541_v9, %v8077_v2  ;;  %v5703_v33 = vpop.f32.mrb[134].mxu0 }
 0x230   : > { %v8389_v47 = vmax.f32 %v2647_v58, 0.0  ;;  %v5702_v12 = vadd.f32 %v5701_v42, %v5700_v1  ;;  %v8392_v14 = vpack.c.bf16 %v3110_v43, %v3104_v46  ;;  %v5704_v34 = vpop.f32.mrb[135].mxu0  ;;  %v3114_v62 = vrot.slane %v2855_v10, 7 }
 0x231   : > { %3734 = vmatmul.mubr.bf16.gmra.mrb[184].mxu0 %v8386_v26  ;;  %v2857_v7 = vsel %vm429_vm0, %v2855_v10, %v2856_v5  ;;  %v3122_v59 = vrot.slane %v2856_v5, 7  ;;  %v2935_v11 = vrot.slane %v8352_v50, 2  ;;  %v8398_v27 = vmax.f32 %v2648_v15, 0.0 }
 0x232   : > { %2711 = vst [vmem:[#allocation2 + $0x128] sm:$0xff] %v8389_v47  ;;  %v6528_v28 = vadd.f32 %v5702_v12, %v8001_v60  ;;  %v5705_v3 = vadd.f32 %v5704_v34, %v5703_v33  ;;  %6346 = vmatprep.mubr.bf16.mxu1 %v8392_v14  ;;  %v3115_v41 = vrot.slane %v2857_v7, 7  ;;  %v2936_v23 = vrot.slane %v8361_v52, 2 }
 0x233   : > { %v3117_v40 = vrot.slane %v2935_v11, 7  ;;  %v3112_v13 = vrot.slane %v8352_v50, 7  ;;  %v3120_v49 = vrot.slane %v8361_v52, 7  ;;  %2712 = vst [vmem:[#allocation2 + $0x130] sm:$0xff] %v8398_v27  ;;  %v2858_v43 = vrot.slane %v8389_v47, 1 }
 0x234   : > { %v6529_v20 = vadd.f32 %v6528_v28, %v8136_v44  ;;  %v6536_v25 = vadd.f32 %v5705_v3, %v8009_v32  ;;  %v3116_v17 = vsel %vm591_vm1, %v3114_v62, %v3115_v41  ;;  %v3123_v60 = vsel %vm591_vm1, %v3115_v41, %v3122_v59 }
 0x235   : > { %v8410_v58 = vpack.c.bf16 %v3123_v60, %v3116_v17  ;;  %v2937_v9 = vsel %vm494_vm3, %v2935_v11, %v2936_v23  ;;  %v2939_v1 = vsel %vm494_vm3, %v2936_v23, %v8091_v56  ;;  %v3113_v50 = vsel %vm591_vm1, %v9355_v54, %v3112_v13  ;;  %v5706_v30 = vpop.f32.mrb[136].mxu0 }
 0x236   : > { %v2649_v52 = vadd.f32 %v6529_v20, %v8077_v2  ;;  %v6537_v44 = vadd.f32 %v6536_v25, %v8149_v0  ;;  %v3118_v32 = vrot.slane %v2937_v9, 7  ;;  %v3124_v10 = vrot.slane %v2939_v1, 7  ;;  %v5707_v42 = vpop.f32.mrb[137].mxu0 }
 0x237   : > { %3741 = vmatprep.mubr.bf16.mxu0 %v8410_v58  ;;  %v3121_v46 = vsel %vm591_vm1, %v3112_v13, %v3120_v49  ;;  %v2859_v5 = vrot.slane %v8398_v27, 1  ;;  %v2940_v15 = vrot.slane %v8389_v47, 2  ;;  %v5708_v34 = vadd.f32 %v5707_v42, %v5706_v30  ;;  %v5709_v0 = vpop.f32.mrb[138].mxu0 }
 0x238   : > { %v8424_v12 = vmax.f32 %v2649_v52, 0.0  ;;  %v2650_v33 = vadd.f32 %v6537_v44, %v8077_v2  ;;  %v3119_v7 = vsel %vm591_vm1, %v3117_v40, %v3118_v32  ;;  %v5710_v62 = vpop.f32.mrb[139].mxu0  ;;  %v3125_v59 = vsel %vm591_vm1, %v3118_v32, %v3124_v10 }
 0x239   : > { %v8429_v11 = vpack.c.bf16 %v3121_v46, %v3113_v50  ;;  %v2860_v28 = vsel %vm429_vm0, %v2858_v43, %v2859_v5  ;;  %v3129_v3 = vrot.slane %v2858_v43, 7  ;;  %v6548_v23 = vadd.f32 %v5708_v34, %v8024_v53 }
 0x23a   : > { %2713 = vst [vmem:[#allocation2 + $0x148] sm:$0xff] %v8424_v12  ;;  %v8433_v41 = vmax.f32 %v2650_v33, 0.0  ;;  %v5711_v13 = vadd.f32 %v5710_v62, %v5709_v0  ;;  %v8436_v49 = vpack.c.bf16 %v3125_v59, %v3119_v7  ;;  %v3130_v40 = vrot.slane %v2860_v28, 7 }
 0x23b   : > { %3742 = vmatmul.mubr.bf16.gmra.mrb[188].mxu0 %v8429_v11  ;;  %v3137_v20 = vrot.slane %v2859_v5, 7  ;;  %v2941_v25 = vrot.slane %v8398_v27, 2  ;;  %v3132_v17 = vrot.slane %v2940_v15, 7  ;;  %v6549_v60 = vadd.f32 %v6548_v23, %v8184_v63 }
 0x23c   : > { %2714 = vst [vmem:[#allocation2 + $0x150] sm:$0xff] %v8433_v41  ;;  %v6556_v9 = vadd.f32 %v5711_v13, %v8031_v19  ;;  %6347 = vmatmul.mubr.bf16.gmra.mrb[108].mxu1 %v8436_v49  ;;  %v3127_v53 = vrot.slane %v8389_v47, 7  ;;  %v3135_v1 = vrot.slane %v8398_v27, 7  ;;  %v3131_v50 = vsel %vm591_vm1, %v3129_v3, %v3130_v40 }
 0x23d   : > { %v3138_v52 = vsel %vm591_vm1, %v3130_v40, %v3137_v20  ;;  %v2942_v44 = vsel %vm494_vm3, %v2940_v15, %v2941_v25  ;;  %v2944_v30 = vsel %vm494_vm3, %v2941_v25, %v8091_v56  ;;  %v2651_v32 = vadd.f32 %v6549_v60, %v8077_v2  ;;  %v5712_v19 = vpop.f32.mrb[140].mxu0 }
 0x23e   : > { %v6557_v63 = vadd.f32 %v6556_v9, %v8196_v55  ;;  %v8453_v10 = vpack.c.bf16 %v3138_v52, %v3131_v50  ;;  %v3133_v42 = vrot.slane %v2942_v44, 7  ;;  %v5713_v47 = vpop.f32.mrb[141].mxu0  ;;  %v3139_v46 = vrot.slane %v2944_v30, 7 }
 0x23f   : > { %v3128_v27 = vsel %vm591_vm1, %v9355_v54, %v3127_v53  ;;  %v3136_v43 = vsel %vm591_vm1, %v3127_v53, %v3135_v1  ;;  %v2861_v5 = vrot.slane %v8424_v12, 1  ;;  %v8459_v15 = vmax.f32 %v2651_v32, 0.0  ;;  %v5715_v0 = vpop.f32.mrb[142].mxu0  ;;  %v8490_v32 = vld [vmem:[%s9220_s2] ss:$0 sm:$0xff] }
 0x240   : > { %v2652_v33 = vadd.f32 %v6557_v63, %v8077_v2  ;;  %v5714_v34 = vadd.f32 %v5713_v47, %v5712_v19  ;;  %3749 = vmatprep.mubr.bf16.mxu0 %v8453_v10  ;;  %v3134_v55 = vsel %vm591_vm1, %v3132_v17, %v3133_v42  ;;  %v5716_v7 = vpop.f32.mrb[143].mxu0  ;;  %v3140_v62 = vsel %vm591_vm1, %v3133_v42, %v3139_v46 }
 0x241   : > { %v8465_v59 = vpack.c.bf16 %v3136_v43, %v3128_v27  ;;  %v2862_v28 = vrot.slane %v8433_v41, 1  ;;  %v3144_v3 = vrot.slane %v2861_v5, 7  ;;  %2715 = vst [vmem:[#allocation2 + $0x168] sm:$0xff] %v8459_v15  ;;  %v5717_v13 = vadd.f32 %v5716_v7, %v5715_v0 }
 0x242   : > { %v8469_v23 = vmax.f32 %v2652_v33, 0.0  ;;  %v6544_v2 = vadd.f32 %v5714_v34, %v8020_v29  ;;  %v8472_v40 = vpack.c.bf16 %v3140_v62, %v3134_v55  ;;  %v2945_v17 = vrot.slane %v8424_v12, 2 }
 0x243   : > { %3750 = vmatmul.mubr.bf16.gmra.mrb[192].mxu0 %v8465_v59  ;;  %v2863_v20 = vsel %vm429_vm0, %v2861_v5, %v2862_v28  ;;  %v3152_v25 = vrot.slane %v2862_v28, 7  ;;  %v2946_v60 = vrot.slane %v8433_v41, 2  ;;  %v6552_v53 = vadd.f32 %v5717_v13, %v8028_v45 }
 0x244   : > { %2716 = vst [vmem:[#allocation2 + $0x170] sm:$0xff] %v8469_v23  ;;  %v6545_v9 = vadd.f32 %v6544_v2, %v8180_v8  ;;  %6350 = vmatprep.mubr.bf16.mxu1 %v8472_v40  ;;  %v3145_v29 = vrot.slane %v2863_v20, 7  ;;  %v3142_v1 = vrot.slane %v8424_v12, 7  ;;  %v3147_v44 = vrot.slane %v2945_v17, 7 }
 0x245   : > { %v2947_v50 = vsel %vm494_vm3, %v2945_v17, %v2946_v60  ;;  %v2949_v52 = vsel %vm494_vm3, %v2946_v60, %v8091_v56  ;;  %v3150_v30 = vrot.slane %v8433_v41, 7  ;;  %v6553_v8 = vadd.f32 %v6552_v53, %v8194_v31  ;;  %v5718_v63 = vpop.f32.mrb[144].mxu0 }
 0x246   : > { %v2653_v45 = vadd.f32 %v8490_v32, %v6545_v9  ;;  %v3146_v12 = vsel %vm591_vm1, %v3144_v3, %v3145_v29  ;;  %v3153_v19 = vsel %vm591_vm1, %v3145_v29, %v3152_v25  ;;  %v5719_v42 = vpop.f32.mrb[145].mxu0  ;;  %v3148_v46 = vrot.slane %v2947_v50, 7 }
 0x247   : > { %v8496_v47 = vpack.c.bf16 %v3153_v19, %v3146_v12  ;;  %v3154_v27 = vrot.slane %v2949_v52, 7  ;;  %v3143_v41 = vsel %vm591_vm1, %v9355_v54, %v3142_v1  ;;  %v2654_v5 = vadd.f32 %v8490_v32, %v6553_v8  ;;  %v5721_v34 = vpop.f32.mrb[146].mxu0 }
 0x248   : > { %v8500_v43 = vmax.f32 %v2653_v45, 0.0  ;;  %v5720_v33 = vadd.f32 %v5719_v42, %v5718_v63  ;;  %v3151_v31 = vsel %vm591_vm1, %v3142_v1, %v3150_v30  ;;  %v5722_v0 = vpop.f32.mrb[147].mxu0  ;;  %v3149_v55 = vsel %vm591_vm1, %v3147_v44, %v3148_v46 }
 0x249   : > { %3757 = vmatprep.mubr.bf16.mxu0 %v8496_v47  ;;  %v3155_v7 = vsel %vm591_vm1, %v3148_v46, %v3154_v27  ;;  %v8507_v62 = vpack.c.bf16 %v3151_v31, %v3143_v41  ;;  %v2864_v28 = vrot.slane %v8459_v15, 1  ;;  %v8511_v3 = vmax.f32 %v2654_v5, 0.0 }
 0x24a   : > { %2717 = vst [vmem:[#allocation2 + $0x188] sm:$0xff] %v8500_v43  ;;  %v6564_v2 = vadd.f32 %v5720_v33, %v8040_v22  ;;  %v5723_v13 = vadd.f32 %v5722_v0, %v5721_v34  ;;  %v8514_v20 = vpack.c.bf16 %v3155_v7, %v3149_v55  ;;  %v2865_v25 = vrot.slane %v8469_v23, 1 }
 0x24b   : > { %3758 = vmatmul.mubr.bf16.gmra.mrb[196].mxu0 %v8507_v62  ;;  %v3159_v17 = vrot.slane %v2864_v28, 7  ;;  %v2950_v60 = vrot.slane %v8459_v15, 2  ;;  %v2951_v9 = vrot.slane %v8469_v23, 2  ;;  %2718 = vst [vmem:[#allocation2 + $0x190] sm:$0xff] %v8511_v3  ;;  %v3157_v22 = vrot.slane %v8459_v15, 7 }
 0x24c   : > { %v6565_v53 = vadd.f32 %v6564_v2, %v8230_v6  ;;  %v6572_v29 = vadd.f32 %v5723_v13, %v8047_v16  ;;  %6351 = vmatmul.mubr.bf16.gmra.mrb[112].mxu1 %v8514_v20  ;;  %v3165_v1 = vrot.slane %v8469_v23, 7  ;;  %v2866_v50 = vsel %vm429_vm0, %v2864_v28, %v2865_v25  ;;  %v9369_v28 = vld [vmem:[#allocation22_spill] sm:$0xff] }
 0x24d   : > { %v3167_v52 = vrot.slane %v2865_v25, 7  ;;  %v2952_v44 = vsel %vm494_vm3, %v2950_v60, %v2951_v9  ;;  %v2954_v30 = vsel %vm494_vm3, %v2951_v9, %v8091_v56  ;;  %v5724_v8 = vpop.f32.mrb[148].mxu0  ;;  %v3160_v16 = vrot.slane %v2866_v50, 7 }
 0x24e   : > { %v2655_v45 = vadd.f32 %v8490_v32, %v6565_v53  ;;  %v6573_v6 = vadd.f32 %v6572_v29, %v8238_v38  ;;  %v3162_v63 = vrot.slane %v2950_v60, 7  ;;  %v5725_v12 = vpop.f32.mrb[149].mxu0  ;;  %v3163_v19 = vrot.slane %v2952_v44, 7  ;;  %v9370_v29 = vld [vmem:[#allocation6_spill] sm:$0xff] }
 0x24f   : > { %v3169_v15 = vrot.slane %v2954_v30, 7  ;;  %v3158_v23 = vsel %vm591_vm1, %v9355_v54, %v3157_v22  ;;  %v3166_v42 = vsel %vm591_vm1, %v3157_v22, %v3165_v1  ;;  %v5726_v41 = vadd.f32 %v5725_v12, %v5724_v8  ;;  %v5727_v5 = vpop.f32.mrb[150].mxu0  ;;  %v9371_v1 = vld [vmem:[#allocation23_spill] sm:$0xff] }
 0x250   : > { %v8535_v46 = vmax.f32 %v2655_v45, 0.0  ;;  %v2656_v27 = vadd.f32 %v8490_v32, %v6573_v6  ;;  %v3161_v33 = vsel %vm591_vm1, %v3159_v17, %v3160_v16  ;;  %v5728_v38 = vpop.f32.mrb[151].mxu0  ;;  %v3168_v34 = vsel %vm591_vm1, %v3160_v16, %v3167_v52 }
 0x251   : > { %v3164_v31 = vsel %vm591_vm1, %v3162_v63, %v3163_v19  ;;  %v3170_v0 = vsel %vm591_vm1, %v3163_v19, %v3169_v15  ;;  %v8542_v55 = vpack.c.bf16 %v3166_v42, %v3158_v23  ;;  %v6560_v2 = vadd.f32 %v5726_v41, %v9369_v28  ;;  %v9372_v63 = vld [vmem:[#allocation10_spill] sm:$0xff] }
 0x252   : > { %2719 = vst [vmem:[#allocation2 + $0x1a8] sm:$0xff] %v8535_v46  ;;  %v8545_v7 = vmax.f32 %v2656_v27, 0.0  ;;  %v5729_v13 = vadd.f32 %v5728_v38, %v5727_v5  ;;  %v8548_v25 = vpack.c.bf16 %v3168_v34, %v3161_v33  ;;  %v8550_v60 = vpack.c.bf16 %v3170_v0, %v3164_v31 }
 0x253   : > { %v2867_v17 = vrot.slane %v8500_v43, 1  ;;  %v2868_v9 = vrot.slane %v8511_v3, 1  ;;  %v2955_v53 = vrot.slane %v8500_v43, 2  ;;  %v6561_v22 = vadd.f32 %v6560_v2, %v9370_v29 }
 0x254   : > { %2720 = vst [vmem:[#allocation2 + $0x1b0] sm:$0xff] %v8545_v7  ;;  %v6568_v50 = vadd.f32 %v5729_v13, %v9371_v1  ;;  %3765 = vmatprep.mubr.bf16.mxu0 %v8548_v25  ;;  %v2956_v52 = vrot.slane %v8511_v3, 2  ;;  %v3172_v44 = vrot.slane %v8500_v43, 7  ;;  %6354 = vmatprep.mubr.bf16.mxu1 %v8550_v60  ;;  %v3180_v5 = vrot.slane %v8511_v3, 7  ;;  %v9373_v3 = vld [vmem:[#allocation9_spill] sm:$0xff] }
 0x255   : > { %3766 = vmatmul.mubr.bf16.gmra.mrb[200].mxu0 %v8542_v55  ;;  %v2869_v30 = vsel %vm429_vm0, %v2867_v17, %v2868_v9  ;;  %v3174_v45 = vrot.slane %v2867_v17, 7  ;;  %v3182_v6 = vrot.slane %v2868_v9, 7  ;;  %v3177_v8 = vrot.slane %v2955_v53, 7  ;;  %v5730_v19 = vpop.f32.mrb[152].mxu0 }
 0x256   : > { %v2657_v16 = vadd.f32 %v8490_v32, %v6561_v22  ;;  %v6569_v12 = vadd.f32 %v6568_v50, %v9372_v63  ;;  %v3175_v15 = vrot.slane %v2869_v30, 7  ;;  %v2957_v23 = vsel %vm494_vm3, %v2955_v53, %v2956_v52  ;;  %v5731_v42 = vpop.f32.mrb[153].mxu0 }
 0x257   : > { %v2959_v43 = vsel %vm494_vm3, %v2956_v52, %v8091_v56  ;;  %v3178_v27 = vrot.slane %v2957_v23, 7  ;;  %v3173_v41 = vsel %vm591_vm1, %v9355_v54, %v3172_v44  ;;  %v5732_v34 = vadd.f32 %v5731_v42, %v5730_v19  ;;  %v5733_v31 = vpop.f32.mrb[154].mxu0 }
 0x258   : > { %v8572_v33 = vmax.f32 %v2657_v16, 0.0  ;;  %v2658_v38 = vadd.f32 %v8490_v32, %v6569_v12  ;;  %v3176_v0 = vsel %vm591_vm1, %v3174_v45, %v3175_v15  ;;  %v5734_v28 = vpop.f32.mrb[155].mxu0  ;;  %v3183_v2 = vsel %vm591_vm1, %v3175_v15, %v3182_v6  ;;  %v9374_v6 = vld [vmem:[#allocation14_spill] sm:$0xff] }
 0x259   : > { %v3179_v13 = vsel %vm591_vm1, %v3177_v8, %v3178_v27  ;;  %v3184_v17 = vrot.slane %v2959_v43, 7  ;;  %v3181_v9 = vsel %vm591_vm1, %v3172_v44, %v3180_v5  ;;  %v6580_v29 = vadd.f32 %v5732_v34, %v9373_v3 }
 0x25a   : > { %2721 = vst [vmem:[#allocation2 + $0x1c8] sm:$0xff] %v8572_v33  ;;  %v8580_v53 = vmax.f32 %v2658_v38, 0.0  ;;  %v5735_v22 = vadd.f32 %v5734_v28, %v5733_v31  ;;  %v8583_v1 = vpack.c.bf16 %v3183_v2, %v3176_v0  ;;  %v8586_v52 = vpack.c.bf16 %v3181_v9, %v3173_v41 }
 0x25b   : > { %v3185_v50 = vsel %vm591_vm1, %v3178_v27, %v3184_v17  ;;  %v2870_v30 = vrot.slane %v8535_v46, 1  ;;  %v2871_v45 = vrot.slane %v8545_v7, 1  ;;  %v6581_v44 = vadd.f32 %v6580_v29, %v8273_v4 }
 0x25c   : > { %2722 = vst [vmem:[#allocation2 + $0x1d0] sm:$0xff] %v8580_v53  ;;  %v6588_v8 = vadd.f32 %v5735_v22, %v9374_v6  ;;  %3773 = vmatprep.mubr.bf16.mxu0 %v8583_v1  ;;  %v8594_v16 = vpack.c.bf16 %v3185_v50, %v3179_v13  ;;  %v2960_v63 = vrot.slane %v8535_v46, 2  ;;  %v2961_v23 = vrot.slane %v8545_v7, 2 }
 0x25d   : > { %3774 = vmatmul.mubr.bf16.gmra.mrb[204].mxu0 %v8586_v52  ;;  %v2872_v12 = vsel %vm429_vm0, %v2870_v30, %v2871_v45  ;;  %v3189_v19 = vrot.slane %v2870_v30, 7  ;;  %v3197_v15 = vrot.slane %v2871_v45, 7  ;;  %v2659_v42 = vadd.f32 %v8490_v32, %v6581_v44  ;;  %v5736_v43 = vpop.f32.mrb[156].mxu0 }
 0x25e   : > { %v6589_v4 = vadd.f32 %v6588_v8, %v8283_v61  ;;  %6355 = vmatmul.mubr.bf16.gmra.mrb[116].mxu1 %v8594_v16  ;;  %v3190_v27 = vrot.slane %v2872_v12, 7  ;;  %v3192_v41 = vrot.slane %v2960_v63, 7  ;;  %v5737_v5 = vpop.f32.mrb[157].mxu0  ;;  %v2962_v38 = vsel %vm494_vm3, %v2960_v63, %v2961_v23 }
 0x25f   : > { %v2964_v34 = vsel %vm494_vm3, %v2961_v23, %v8091_v56  ;;  %v3187_v31 = vrot.slane %v8535_v46, 7  ;;  %v3195_v0 = vrot.slane %v8545_v7, 7  ;;  %v8608_v28 = vmax.f32 %v2659_v42, 0.0  ;;  %v5739_v13 = vpop.f32.mrb[158].mxu0  ;;  %v9375_v7 = vld [vmem:[#allocation8_spill] sm:$0xff] }
 0x260   : > { %v2660_v2 = vadd.f32 %v8490_v32, %v6589_v4  ;;  %v5738_v61 = vadd.f32 %v5737_v5, %v5736_v43  ;;  %v3191_v17 = vsel %vm591_vm1, %v3189_v19, %v3190_v27  ;;  %v5740_v9 = vpop.f32.mrb[159].mxu0  ;;  %v3198_v3 = vsel %vm591_vm1, %v3190_v27, %v3197_v15  ;;  %v9376_v15 = vld [vmem:[#allocation7_spill] sm:$0xff] }
 0x261   : > { %v3193_v29 = vrot.slane %v2962_v38, 7  ;;  %v3199_v22 = vrot.slane %v2964_v34, 7  ;;  %v3188_v50 = vsel %vm591_vm1, %v9355_v54, %v3187_v31  ;;  %2723 = vst [vmem:[#allocation2 + $0x1e8] sm:$0xff] %v8608_v28  ;;  %v5741_v45 = vadd.f32 %v5740_v9, %v5739_v13 }
 0x262   : > { %v8616_v46 = vmax.f32 %v2660_v2, 0.0  ;;  %v6576_v30 = vadd.f32 %v5738_v61, %v9375_v7  ;;  %v8619_v44 = vpack.c.bf16 %v3198_v3, %v3191_v17  ;;  %v3196_v63 = vsel %vm591_vm1, %v3187_v31, %v3195_v0 }
 0x263   : > { %v3194_v6 = vsel %vm591_vm1, %v3192_v41, %v3193_v29  ;;  %v3200_v8 = vsel %vm591_vm1, %v3193_v29, %v3199_v22  ;;  %v2873_v12 = vrot.slane %v8572_v33, 1  ;;  %v6584_v23 = vadd.f32 %v5741_v45, %v9376_v15 }
 0x264   : > { %2724 = vst [vmem:[#allocation2 + $0x1f0] sm:$0xff] %v8616_v46  ;;  %v6577_v19 = vadd.f32 %v6576_v30, %v8269_v35  ;;  %3781 = vmatprep.mubr.bf16.mxu0 %v8619_v44  ;;  %v8629_v42 = vpack.c.bf16 %v3200_v8, %v3194_v6  ;;  %v8631_v4 = vpack.c.bf16 %v3196_v63, %v3188_v50  ;;  %v2874_v43 = vrot.slane %v8580_v53, 1 }
 0x265   : > { %v3204_v27 = vrot.slane %v2873_v12, 7  ;;  %v2965_v41 = vrot.slane %v8572_v33, 2  ;;  %v2966_v5 = vrot.slane %v8580_v53, 2  ;;  %v6585_v34 = vadd.f32 %v6584_v23, %v8281_v57 }
 0x266   : > { %v2661_v38 = vadd.f32 %v8490_v32, %v6577_v19  ;;  %6358 = vmatprep.mubr.bf16.mxu1 %v8629_v42  ;;  %3782 = vmatmul.mubr.bf16.gmra.mrb[208].mxu0 %v8631_v4  ;;  %v3202_v35 = vrot.slane %v8572_v33, 7  ;;  %v3210_v31 = vrot.slane %v8580_v53, 7  ;;  %v2875_v0 = vsel %vm429_vm0, %v2873_v12, %v2874_v43 }
 0x267   : > { %v3212_v2 = vrot.slane %v2874_v43, 7  ;;  %v2967_v61 = vsel %vm494_vm3, %v2965_v41, %v2966_v5  ;;  %v2969_v13 = vsel %vm494_vm3, %v2966_v5, %v8091_v56  ;;  %v2662_v57 = vadd.f32 %v8490_v32, %v6585_v34 }
 0x268   : > { %v8646_v17 = vmax.f32 %v2661_v38, 0.0  ;;  %v3205_v9 = vrot.slane %v2875_v0, 7  ;;  %v3207_v3 = vrot.slane %v2965_v41, 7  ;;  %v3208_v29 = vrot.slane %v2967_v61, 7 }
 0x269   : > { %v3214_v22 = vrot.slane %v2969_v13, 7  ;;  %v3203_v33 = vsel %vm591_vm1, %v9355_v54, %v3202_v35  ;;  %v3211_v53 = vsel %vm591_vm1, %v3202_v35, %v3210_v31  ;;  %v2694_v50 = vmax.f32 %v2662_v57, 0.0 }
 0x26a   : > { %2725 = vst [vmem:[#allocation2 + $0x208] sm:$0xff] %v8646_v17  ;;  %v3206_v7 = vsel %vm591_vm1, %v3204_v27, %v3205_v9  ;;  %v3213_v30 = vsel %vm591_vm1, %v3205_v9, %v3212_v2  ;;  %v8655_v45 = vpack.c.bf16 %v3211_v53, %v3203_v33  ;;  %v3209_v32 = vsel %vm591_vm1, %v3207_v3, %v3208_v29 }
 0x26b   : > { %v8657_v6 = vpack.c.bf16 %v3213_v30, %v3206_v7  ;;  %v3215_v8 = vsel %vm591_vm1, %v3208_v29, %v3214_v22  ;;  %v2876_v63 = vrot.slane %v8608_v28, 1  ;;  %2726 = vst [vmem:[#allocation2 + $0x210] sm:$0xff] %v2694_v50  ;;  %v2877_v19 = vrot.slane %v8616_v46, 1 }
 0x26c   : > { %v8662_v12 = vpack.c.bf16 %v3215_v8, %v3209_v32  ;;  %v2970_v15 = vrot.slane %v8608_v28, 2  ;;  %v2971_v23 = vrot.slane %v8616_v46, 2  ;;  %v3217_v27 = vrot.slane %v8608_v28, 7 }
 0x26d   : > { %3789 = vmatprep.mubr.bf16.mxu0 %v8657_v6  ;;  %v3219_v43 = vrot.slane %v2876_v63, 7  ;;  %v3225_v41 = vrot.slane %v8616_v46, 7  ;;  %v3426_v5 = vrot.slane %v8646_v17, 1  ;;  %v2878_v38 = vsel %vm429_vm0, %v2876_v63, %v2877_v19 }
 0x26e   : > { %6359 = vmatmul.mubr.bf16.gmra.mrb[120].mxu1 %v8662_v12  ;;  %3790 = vmatmul.mubr.bf16.gmra.mrb[212].mxu0 %v8655_v45  ;;  %v3227_v34 = vrot.slane %v2877_v19, 7  ;;  %v2972_v35 = vsel %vm494_vm3, %v2970_v15, %v2971_v23  ;;  %v2974_v31 = vsel %vm494_vm3, %v2971_v23, %v8091_v56  ;;  %v3220_v0 = vrot.slane %v2878_v38, 7 }
 0x26f   : > { %v3222_v2 = vrot.slane %v2970_v15, 7  ;;  %v3223_v61 = vrot.slane %v2972_v35, 7  ;;  %v3229_v28 = vrot.slane %v2974_v31, 7  ;;  %v3218_v46 = vsel %vm591_vm1, %v9355_v54, %v3217_v27 }
 0x270   : > { %v3226_v13 = vsel %vm591_vm1, %v3217_v27, %v3225_v41  ;;  %v3427_v57 = vrot.slane %v2694_v50, 1  ;;  %v3439_v9 = vrot.slane %v3426_v5, 7  ;;  %v3221_v3 = vsel %vm591_vm1, %v3219_v43, %v3220_v0 }
 0x271   : > { %v3228_v29 = vsel %vm591_vm1, %v3220_v0, %v3227_v34  ;;  %v3224_v22 = vsel %vm591_vm1, %v3222_v2, %v3223_v61  ;;  %v3230_v33 = vsel %vm591_vm1, %v3223_v61, %v3229_v28  ;;  %v8688_v30 = vpack.c.bf16 %v3226_v13, %v3218_v46 }
 0x272   : > { %v8684_v53 = vpack.c.bf16 %v3228_v29, %v3221_v3  ;;  %v8686_v7 = vpack.c.bf16 %v3230_v33, %v3224_v22  ;;  %v3428_v32 = vsel %vm429_vm0, %v3426_v5, %v3427_v57  ;;  %v3447_v63 = vrot.slane %v3427_v57, 7  ;;  %v6925_v33 = vld [vmem:[#allocation3 + $0x3c0] sm:$0xff]  }
 0x273   : > { %v3440_v8 = vrot.slane %v3428_v32, 7  ;;  %v3430_v19 = vrot.slane %v8646_v17, 2  ;;  %v3431_v15 = vrot.slane %v2694_v50, 2  ;;  %v3437_v23 = vrot.slane %v8646_v17, 7  ;;  %v6926_v32 = vld [vmem:[#allocation3 + $0x408] sm:$0xff]  }
 0x274   : > { %3797 = vmatprep.mubr.bf16.mxu0 %v8684_v53  ;;  %6362 = vmatprep.mubr.bf16.mxu1 %v8686_v7  ;;  %v3445_v43 = vrot.slane %v2694_v50, 7  ;;  %v2997_v2 = vrot.slane %v8091_v56, 7 }
 0x275   : > { %v3441_v27 = vsel %vm591_vm1, %v3439_v9, %v3440_v8  ;;  %v3448_v41 = vsel %vm591_vm1, %v3440_v8, %v3447_v63  ;;  %v3432_v38 = vsel %vm494_vm3, %v3430_v19, %v3431_v15  ;;  %v3434_v5 = vsel %vm494_vm3, %v3431_v15, %v8091_v56  ;;  %v8715_v9 = vld [vmem:[#allocation2] sm:$0xff]  ;;  %v9377_v8 = vld [vmem:[#allocation11_spill] sm:$0xff]  ;;  %v9378_v63 = vld [vmem:[#allocation17_spill] sm:$0xff] }
 0x276   : > { %3798 = vmatmul.mubr.bf16.gmra.mrb[216].mxu0 %v8688_v30  ;;  %v8701_v34 = vpack.c.bf16 %v3448_v41, %v3441_v27  ;;  %v3442_v35 = vrot.slane %v3430_v19, 7  ;;  %v3443_v31 = vrot.slane %v3432_v38, 7  ;;  %v3449_v0 = vrot.slane %v3434_v5, 7  ;;  %v6927_v19 = vld [vmem:[#allocation3 + $0x3c8] sm:$0xff]   ;;  %v6928_v15 = vld [vmem:[#allocation3 + $0x410] sm:$0xff]   ;;  %v6930_v41 = vld [vmem:[#allocation3 + $0x418] sm:$0xff]  }
 0x277   : > { %v3438_v17 = vsel %vm591_vm1, %v9355_v54, %v3437_v23  ;;  %v3446_v50 = vsel %vm591_vm1, %v3437_v23, %v3445_v43  ;;  %v2999_v57 = vsel %vm591_vm1, %v2997_v2, %v2997_v2  ;;  %v2831_v54 = vrot.slane %v8715_v9, 1  ;;  %v9379_v23 = vld [vmem:[#allocation13_spill] sm:$0xff]  ;;  %v9380_v43 = vld [vmem:[#allocation19_spill] sm:$0xff]  ;;  %v6929_v27 = vld [vmem:[#allocation3 + $0x3d0] sm:$0xff]  }
 0x278   : > { %3805 = vmatprep.mubr.bf16.mxu0 %v8701_v34  ;;  %v3444_v61 = vsel %vm591_vm1, %v3442_v35, %v3443_v31  ;;  %v3450_v28 = vsel %vm591_vm1, %v3443_v31, %v3449_v0  ;;  %v8710_v46 = vpack.c.bf16 %v3446_v50, %v3438_v17  ;;  %v3329_v3 = vpack.c.bf16 %v2999_v57, %v2999_v57  ;;  %v9381_v38 = vld [vmem:[#allocation18_spill] sm:$0xff]  ;;  %v6931_v5 = vld [vmem:[#allocation3 + $0x3d8] sm:$0xff]   ;;  %v9382_v31 = vld [vmem:[#allocation15_spill] sm:$0xff] }
 0x279   : > { %v8712_v13 = vpack.c.bf16 %v3450_v28, %v3444_v61  ;;  %v2994_v56 = vrot.slane %v2831_v54, 7  ;;  %v6932_v35 = vld [vmem:[#allocation3 + $0x420] sm:$0xff]   ;;  %v9383_v0 = vld [vmem:[#allocation16_spill] sm:$0xff]  ;;  %v6934_v50 = vld [vmem:[#allocation3 + $0x428] sm:$0xff]  }
 0x27a   : > { %v6933_v17 = vld [vmem:[#allocation3 + $0x3e0] sm:$0xff]   ;;  %v6935_v2 = vld [vmem:[#allocation3 + $0x3e8] sm:$0xff]   ;;  %v6936_v61 = vld [vmem:[#allocation3 + $0x430] sm:$0xff]  }
 0x27b   : > { %6363 = vmatmul.mubr.bf16.gmra.mrb[124].mxu1 %v8712_v13  ;;  %v2996_v29 = vsel %vm591_vm1, %v2994_v56, %v2994_v56  ;;  %v9384_v28 = vld [vmem:[#allocation12_spill] sm:$0xff]  ;;  %v9385_v57 = vld [vmem:[#allocation21_spill] sm:$0xff] }
 0x27c   : > { %6382 = vmatprep.mubr.bf16.mxu1 %v3329_v3  ;;  %v8721_v22 = vpack.c.bf16 %v2996_v29, %v2996_v29  ;;  %v6937_v54 = vld [vmem:[#allocation3 + $0x3f0] sm:$0xff]   ;;  %v6938_v3 = vld [vmem:[#allocation3 + $0x438] sm:$0xff]   ;;  %v6940_v29 = vld [vmem:[#allocation3 + $0x440] sm:$0xff]  }
 0x27d   : > { %v6939_v56 = vld [vmem:[#allocation3 + $0x3f8] sm:$0xff]  }
 0x27e   : > { %3806 = vmatmul.mubr.bf16.gmra.mrb[220].mxu0 %v8710_v46 }
 0x27f   : > { %4151 = vmatprep.mubr.bf16.mxu0 %v8721_v22 }
 0x283   : > { %6383 = vmatmul.mubr.bf16.vlgmr.msra.gmra.mrb[96].mxu1 %v9377_v8  ;;  %v9388_v8 = vld [vmem:[#allocation25_spill] sm:$0xff] }
 0x284   : > { %6386 = vmatprep.mubr.bf16.mxu1 %v9378_v63  ;;  %6039 = vmatpush3.bf16.msra.mxu1 %v6925_v33  ;;  %v9386_v33 = vld [vmem:[#allocation20_spill] sm:$0xff] }
 0x285   : > { %6040 = vmatprep.subr.bf16.mxu1 %v6926_v32  ;;  %v9387_v32 = vld [vmem:[#allocation24_spill] sm:$0xff] }
 0x286   : > { %4152 = vmatmul.mubr.bf16.vlgmr.msra.gmra.mrb[224].mxu0 %v9379_v23 }
 0x287   : > { %4159 = vmatprep.mubr.bf16.mxu0 %v9380_v43  ;;  %v6943_v43 = vld [vmem:[#allocation3 + $0x458] sm:$0xff]  }
 0x288   : > { %6041 = vmatpush3.bf16.msra.mxu1 %v6927_v19  ;;  %v6941_v19 = vld [vmem:[#allocation3 + $0x448] sm:$0xff]  }
 0x289   : > { %6042 = vmatprep.subr.bf16.mxu1 %v6928_v15  ;;  %v6942_v15 = vld [vmem:[#allocation3 + $0x450] sm:$0xff]  }
 0x28b   : > { %6387 = vmatmul.mubr.bf16.gmra.mrb[100].mxu1 %v9381_v38 }
 0x28c   : > { %6390 = vmatprep.mubr.bf16.mxu1 %v8267_v24  ;;  %6043 = vmatpush3.bf16.msra.mxu1 %v6929_v27  ;;  %v6944_v27 = vld [vmem:[#allocation3 + $0x460] sm:$0xff]  }
 0x28d   : > { %6044 = vmatprep.subr.bf16.mxu1 %v6930_v41 }
 0x28e   : > { %4160 = vmatmul.mubr.bf16.gmra.mrb[228].mxu0 %v9382_v31 }
 0x28f   : > { %4167 = vmatprep.mubr.bf16.mxu0 %v9383_v0 }
 0x290   : > { %6045 = vmatpush3.bf16.msra.mxu1 %v6931_v5 }
 0x291   : > { %6046 = vmatprep.subr.bf16.mxu1 %v6932_v35  ;;  %v6945_v35 = vld [vmem:[#allocation3 + $0x468] sm:$0xff]  }
 0x293   : > { %6391 = vmatmul.mubr.bf16.gmra.mrb[104].mxu1 %v8310_v37 }
 0x294   : > { %6394 = vmatprep.mubr.bf16.mxu1 %v8355_v51  ;;  %6047 = vmatpush3.bf16.msra.mxu1 %v6933_v17 }
 0x295   : > { %6048 = vmatprep.subr.bf16.mxu1 %v6934_v50 }
 0x296   : > { %4168 = vmatmul.mubr.bf16.gmra.mrb[232].mxu0 %v9384_v28 }
 0x297   : > { %4175 = vmatprep.mubr.bf16.mxu0 %v9385_v57 }
 0x298   : > { %6049 = vmatpush3.bf16.msra.mxu1 %v6935_v2  ;;  %v6946_v2 = vld [vmem:[#allocation3 + $0x470] sm:$0xff]  }
 0x299   : > { %6050 = vmatprep.subr.bf16.mxu1 %v6936_v61 }
 0x29b   : > { %6395 = vmatmul.mubr.bf16.gmra.mrb[108].mxu1 %v8392_v14 }
 0x29c   : > { %6398 = vmatprep.mubr.bf16.mxu1 %v8436_v49  ;;  %6051 = vmatpush3.bf16.msra.mxu1 %v6937_v54 }
 0x29d   : > { %6052 = vmatprep.subr.bf16.mxu1 %v6938_v3 }
 0x29e   : > { %4176 = vmatmul.mubr.bf16.gmra.mrb[236].mxu0 %v9386_v33 }
 0x29f   : > { %4183 = vmatprep.mubr.bf16.mxu0 %v9387_v32 }
 0x2a0   : > { %6053 = vmatpush3.bf16.msra.mxu1 %v6939_v56 }
 0x2a1   : > { %6414 = vmatprep.subr.bf16.mxu1 %v6940_v29 }
 0x2a3   : > { %6399 = vmatmul.mubr.bf16.gmra.mrb[112].mxu1 %v8472_v40 }
 0x2a4   : > { %6402 = vmatprep.mubr.bf16.mxu1 %v8514_v20 }
 0x2a6   : > { %4184 = vmatmul.mubr.bf16.gmra.mrb[240].mxu0 %v9388_v8 }
 0x2a7   : > { %4191 = vmatprep.mubr.bf16.mxu0 %v8300_v48 }
 0x2ab   : > { %6403 = vmatmul.mubr.bf16.gmra.mrb[116].mxu1 %v8550_v60 }
 0x2ac   : > { %6406 = vmatprep.mubr.bf16.mxu1 %v8594_v16 }
 0x2ae   : > { %4192 = vmatmul.mubr.bf16.gmra.mrb[244].mxu0 %v8313_v39 }
 0x2af   : > { %4199 = vmatprep.mubr.bf16.mxu0 %v8337_v36 }
 0x2b3   : > { %6407 = vmatmul.mubr.bf16.gmra.mrb[120].mxu1 %v8629_v42 }
 0x2b4   : > { %6410 = vmatprep.mubr.bf16.mxu1 %v8662_v12 }
 0x2b6   : > { %4200 = vmatmul.mubr.bf16.gmra.mrb[248].mxu0 %v8347_v18 }
 0x2b7   : > { %4207 = vmatprep.mubr.bf16.mxu0 %v8375_v21 }
 0x2bb   : > { %6411 = vmatmul.mubr.bf16.gmra.mrb[124].mxu1 %v8686_v7 }
 0x2bc   : > { %4702 = vmatprep.mubr.bf16.mxu1 %v9383_v0 }
 0x2be   : > { %4208 = vmatmul.mubr.bf16.gmra.mrb[252].mxu0 %v8386_v26 }
 0x2bf   : > { %4215 = vmatprep.mubr.bf16.mxu0 %v8410_v58 }
 0x2c3   : > { %4703 = vmatmul.mubr.bf16.vlgmr.msra.gmra.mrb[128].mxu1 %v9384_v28  ;;  %v6947_v28 = vld [vmem:[#allocation3 + $0x478] sm:$0xff]  }
 0x2c4   : > { %4710 = vmatprep.mubr.bf16.mxu1 %v9385_v57  ;;  %6415 = vmatpush3.bf16.msra.mxu1 %v6940_v29 }
 0x2c5   : > { %6416 = vmatprep.subr.bf16.mxu1 %v6941_v19 }
 0x2c6   : > { %4216 = vmatmul.mubr.bf16.gmra.mrb[0].mxu0 %v8429_v11 }
 0x2c7   : > { %4223 = vmatprep.mubr.bf16.mxu0 %v8453_v10 }
 0x2c8   : > { %6417 = vmatpush3.bf16.msra.mxu1 %v6941_v19 }
 0x2c9   : > { %6418 = vmatprep.subr.bf16.mxu1 %v6942_v15 }
 0x2cb   : > { %4711 = vmatmul.mubr.bf16.gmra.mrb[132].mxu1 %v9386_v33 }
 0x2cc   : > { %4718 = vmatprep.mubr.bf16.mxu1 %v9387_v32  ;;  %6419 = vmatpush3.bf16.msra.mxu1 %v6942_v15 }
 0x2cd   : > { %6420 = vmatprep.subr.bf16.mxu1 %v6943_v43 }
 0x2ce   : > { %4224 = vmatmul.mubr.bf16.gmra.mrb[4].mxu0 %v8465_v59 }
 0x2cf   : > { %4231 = vmatprep.mubr.bf16.mxu0 %v8496_v47  ;;  %v5782_v41 = vpop.f32.mrb[160].mxu0 }
 0x2d0   : > { %6421 = vmatpush3.bf16.msra.mxu1 %v6943_v43  ;;  %v5783_v5 = vpop.f32.mrb[161].mxu0 }
 0x2d1   : > { %6422 = vmatprep.subr.bf16.mxu1 %v6944_v27  ;;  %v8764_v31 = vadd.f32 %v5783_v5, %v5782_v41  ;;  %v5785_v0 = vpop.f32.mrb[162].mxu0 }
 0x2d2   : > { %v5786_v17 = vpop.f32.mrb[163].mxu0 }
 0x2d3   : > { %4719 = vmatmul.mubr.bf16.gmra.mrb[136].mxu1 %v9388_v8  ;;  %v8768_v50 = vadd.f32 %v5786_v17, %v5785_v0 }
 0x2d4   : > { %4726 = vmatprep.mubr.bf16.mxu1 %v8300_v48  ;;  %6423 = vmatpush3.bf16.msra.mxu1 %v6944_v27 }
 0x2d5   : > { %6424 = vmatprep.subr.bf16.mxu1 %v6945_v35 }
 0x2d6   : > { %4232 = vmatmul.mubr.bf16.gmra.mrb[8].mxu0 %v8507_v62 }
 0x2d7   : > { %4239 = vmatprep.mubr.bf16.mxu0 %v8548_v25 }
 0x2d8   : > { %6425 = vmatpush3.bf16.msra.mxu1 %v6945_v35 }
 0x2d9   : > { %v5788_v61 = vpop.f32.mrb[164].mxu0  ;;  %6426 = vmatprep.subr.bf16.mxu1 %v6946_v2 }
 0x2da   : > { %v5789_v57 = vpop.f32.mrb[165].mxu0 }
 0x2db   : > { %4727 = vmatmul.mubr.bf16.gmra.mrb[140].mxu1 %v8313_v39  ;;  %v8773_v54 = vadd.f32 %v5789_v57, %v5788_v61  ;;  %v5791_v3 = vpop.f32.mrb[166].mxu0 }
 0x2dc   : > { %4734 = vmatprep.mubr.bf16.mxu1 %v8337_v36  ;;  %v5792_v48 = vpop.f32.mrb[167].mxu0  ;;  %6427 = vmatpush3.bf16.msra.mxu1 %v6946_v2 }
 0x2dd   : > { %v8776_v56 = vadd.f32 %v5792_v48, %v5791_v3  ;;  %6428 = vmatprep.subr.bf16.mxu1 %v6947_v28 }
 0x2de   : > { %4240 = vmatmul.mubr.bf16.gmra.mrb[12].mxu0 %v8542_v55 }
 0x2df   : > { %4247 = vmatprep.mubr.bf16.mxu0 %v8583_v1 }
 0x2e0   : > { %6429 = vmatpush3.bf16.msra.mxu1 %v6947_v28 }
 0x2e2   : > { %v5794_v29 = vpop.f32.mrb[168].mxu0 }
 0x2e3   : > { %4735 = vmatmul.mubr.bf16.gmra.mrb[144].mxu1 %v8347_v18  ;;  %v5795_v33 = vpop.f32.mrb[169].mxu0 }
 0x2e4   : > { %4742 = vmatprep.mubr.bf16.mxu1 %v8375_v21  ;;  %v8782_v39 = vadd.f32 %v5795_v33, %v5794_v29  ;;  %v5797_v32 = vpop.f32.mrb[170].mxu0 }
 0x2e5   : > { %v5798_v36 = vpop.f32.mrb[171].mxu0 }
 0x2e6   : > { %4248 = vmatmul.mubr.bf16.gmra.mrb[16].mxu0 %v8586_v52  ;;  %v8785_v8 = vadd.f32 %v5798_v36, %v5797_v32 }
 0x2e7   : > { %4255 = vmatprep.mubr.bf16.mxu0 %v8619_v44 }
 0x2ea   : > { %v5800_v19 = vpop.f32.mrb[172].mxu0 }
 0x2eb   : > { %4743 = vmatmul.mubr.bf16.gmra.mrb[148].mxu1 %v8386_v26  ;;  %v5801_v15 = vpop.f32.mrb[173].mxu0 }
 0x2ec   : > { %4750 = vmatprep.mubr.bf16.mxu1 %v8410_v58  ;;  %v8790_v18 = vadd.f32 %v5801_v15, %v5800_v19  ;;  %v5803_v43 = vpop.f32.mrb[174].mxu0 }
 0x2ed   : > { %v5804_v21 = vpop.f32.mrb[175].mxu0 }
 0x2ee   : > { %4256 = vmatmul.mubr.bf16.gmra.mrb[20].mxu0 %v8631_v4  ;;  %v8793_v27 = vadd.f32 %v5804_v21, %v5803_v43 }
 0x2ef   : > { %4263 = vmatprep.mubr.bf16.mxu0 %v8657_v6 }
 0x2f3   : > { %4751 = vmatmul.mubr.bf16.gmra.mrb[152].mxu1 %v8429_v11 }
 0x2f4   : > { %4758 = vmatprep.mubr.bf16.mxu1 %v8453_v10  ;;  %v5806_v41 = vpop.f32.mrb[176].mxu0 }
 0x2f5   : > { %v5807_v5 = vpop.f32.mrb[177].mxu0 }
 0x2f6   : > { %4264 = vmatmul.mubr.bf16.gmra.mrb[24].mxu0 %v8655_v45  ;;  %v8799_v26 = vadd.f32 %v5807_v5, %v5806_v41  ;;  %v5809_v58 = vpop.f32.mrb[178].mxu0 }
 0x2f7   : > { %4271 = vmatprep.mubr.bf16.mxu0 %v8684_v53  ;;  %v5810_v35 = vpop.f32.mrb[179].mxu0 }
 0x2f8   : > { %v8802_v0 = vadd.f32 %v5810_v35, %v5809_v58 }
 0x2fb   : > { %4759 = vmatmul.mubr.bf16.gmra.mrb[156].mxu1 %v8465_v59 }
 0x2fc   : > { %4766 = vmatprep.mubr.bf16.mxu1 %v8496_v47  ;;  %v5812_v17 = vpop.f32.mrb[180].mxu0 }
 0x2fd   : > { %v5813_v11 = vpop.f32.mrb[181].mxu0 }
 0x2fe   : > { %4272 = vmatmul.mubr.bf16.gmra.mrb[28].mxu0 %v8688_v30  ;;  %v8807_v10 = vadd.f32 %v5813_v11, %v5812_v17  ;;  %v5815_v2 = vpop.f32.mrb[182].mxu0 }
 0x2ff   : > { %v5816_v61 = vpop.f32.mrb[183].mxu0 }
 0x300   : > { %v8809_v28 = vadd.f32 %v5816_v61, %v5815_v2 }
 0x303   : > { %4767 = vmatmul.mubr.bf16.gmra.mrb[160].mxu1 %v8507_v62 }
 0x304   : > { %4774 = vmatprep.mubr.bf16.mxu1 %v8548_v25  ;;  %v5818_v57 = vpop.f32.mrb[184].mxu0 }
 0x305   : > { %v5819_v3 = vpop.f32.mrb[185].mxu0 }
 0x306   : > { %v8813_v48 = vadd.f32 %v5819_v3, %v5818_v57  ;;  %v5821_v59 = vpop.f32.mrb[186].mxu0 }
 0x307   : > { %v5822_v47 = vpop.f32.mrb[187].mxu0 }
 0x308   : > { %v8815_v29 = vadd.f32 %v5822_v47, %v5821_v59 }
 0x30b   : > { %4775 = vmatmul.mubr.bf16.gmra.mrb[164].mxu1 %v8542_v55 }
 0x30c   : > { %4782 = vmatprep.mubr.bf16.mxu1 %v8583_v1 }
 0x30e   : > { %v5824_v33 = vpop.f32.mrb[188].mxu0 }
 0x30f   : > { %v5825_v32 = vpop.f32.mrb[189].mxu0 }
 0x310   : > { %v8819_v36 = vadd.f32 %v5825_v32, %v5824_v33  ;;  %v5827_v19 = vpop.f32.mrb[190].mxu0 }
 0x311   : > { %v5828_v62 = vpop.f32.mrb[191].mxu0 }
 0x312   : > { %v8821_v15 = vadd.f32 %v5828_v62, %v5827_v19 }
 0x313   : > { %4783 = vmatmul.mubr.bf16.gmra.mrb[168].mxu1 %v8586_v52 }
 0x314   : > { %4790 = vmatprep.mubr.bf16.mxu1 %v8619_v44 }
 0x316   : > { %v5830_v25 = vpop.f32.mrb[192].mxu0 }
 0x317   : > { %v5831_v43 = vpop.f32.mrb[193].mxu0 }
 0x318   : > { %v8825_v21 = vadd.f32 %v5831_v43, %v5830_v25  ;;  %v5833_v41 = vpop.f32.mrb[194].mxu0 }
 0x319   : > { %v5834_v55 = vpop.f32.mrb[195].mxu0 }
 0x31a   : > { %v8827_v5 = vadd.f32 %v5834_v55, %v5833_v41 }
 0x31b   : > { %4791 = vmatmul.mubr.bf16.gmra.mrb[172].mxu1 %v8631_v4 }
 0x31c   : > { %4798 = vmatprep.mubr.bf16.mxu1 %v8657_v6 }
 0x31e   : > { %v5836_v1 = vpop.f32.mrb[196].mxu0 }
 0x31f   : > { %v5837_v58 = vpop.f32.mrb[197].mxu0 }
 0x320   : > { %v8831_v35 = vadd.f32 %v5837_v58, %v5836_v1  ;;  %v5839_v17 = vpop.f32.mrb[198].mxu0 }
 0x321   : > { %v5840_v52 = vpop.f32.mrb[199].mxu0 }
 0x322   : > { %v8833_v11 = vadd.f32 %v5840_v52, %v5839_v17 }
 0x323   : > { %4799 = vmatmul.mubr.bf16.gmra.mrb[176].mxu1 %v8655_v45 }
 0x324   : > { %4806 = vmatprep.mubr.bf16.mxu1 %v8684_v53 }
 0x328   : > { %v5842_v44 = vpop.f32.mrb[200].mxu0 }
 0x329   : > { %v5843_v2 = vpop.f32.mrb[201].mxu0 }
 0x32a   : > { %v8837_v61 = vadd.f32 %v5843_v2, %v5842_v44  ;;  %v5845_v57 = vpop.f32.mrb[202].mxu0 }
 0x32b   : > { %v5846_v4 = vpop.f32.mrb[203].mxu0  ;;  %4807 = vmatmul.mubr.bf16.gmra.mrb[180].mxu1 %v8688_v30 }
 0x32c   : > { %v8840_v6 = vadd.f32 %v5846_v4, %v5845_v57  ;;  %4814 = vmatprep.mubr.bf16.mxu1 %v8701_v34 }
 0x330   : > { %v5848_v3 = vpop.f32.mrb[204].mxu0 }
 0x331   : > { %v5849_v59 = vpop.f32.mrb[205].mxu0 }
 0x332   : > { %v8843_v47 = vadd.f32 %v5849_v59, %v5848_v3  ;;  %v5851_v33 = vpop.f32.mrb[206].mxu0 }
 0x333   : > { %v5852_v45 = vpop.f32.mrb[207].mxu0  ;;  %4815 = vmatmul.mubr.bf16.gmra.mrb[184].mxu1 %v8710_v46 }
 0x334   : > { %v8846_v53 = vadd.f32 %v5852_v45, %v5851_v33  ;;  %4822 = vmatprep.mubr.bf16.mxu1 %v8721_v22 }
 0x339   : > { %v5854_v32 = vpop.f32.mrb[208].mxu0 }
 0x33a   : > { %v5855_v19 = vpop.f32.mrb[209].mxu0 }
 0x33b   : > { %v8849_v62 = vadd.f32 %v5855_v19, %v5854_v32  ;;  %v5857_v30 = vpop.f32.mrb[210].mxu0  ;;  %4823 = vmatmul.mubr.bf16.gmra.mrb[188].mxu1 %v9379_v23 }
 0x33c   : > { %v5858_v34 = vpop.f32.mrb[211].mxu0  ;;  %6430 = vmatprep.mubr.bf16.mxu1 %v9378_v63 }
 0x33d   : > { %v8853_v25 = vadd.f32 %v5858_v34, %v5857_v30 }
 0x341   : > { %v5860_v43 = vpop.f32.mrb[212].mxu0 }
 0x342   : > { %v5861_v41 = vpop.f32.mrb[213].mxu0 }
 0x343   : > { %v8855_v55 = vadd.f32 %v5861_v41, %v5860_v43  ;;  %v5863_v46 = vpop.f32.mrb[214].mxu0  ;;  %6431 = vmatmul.mubr.bf16.vlgmr.msra.gmra.mrb[96].mxu1 %v9381_v38 }
 0x344   : > { %v5864_v22 = vpop.f32.mrb[215].mxu0  ;;  %6434 = vmatprep.mubr.bf16.mxu1 %v8267_v24 }
 0x345   : > { %v8859_v1 = vadd.f32 %v5864_v22, %v5863_v46 }
 0x349   : > { %v5866_v58 = vpop.f32.mrb[216].mxu0 }
 0x34a   : > { %v5867_v17 = vpop.f32.mrb[217].mxu0 }
 0x34b   : > { %v8861_v23 = vadd.f32 %v5867_v17, %v5866_v58  ;;  %v5869_v52 = vpop.f32.mrb[218].mxu0  ;;  %6435 = vmatmul.mubr.bf16.gmra.mrb[100].mxu1 %v8310_v37 }
 0x34c   : > { %v5870_v63 = vpop.f32.mrb[219].mxu0  ;;  %6438 = vmatprep.mubr.bf16.mxu1 %v8355_v51 }
 0x34d   : > { %v8865_v44 = vadd.f32 %v5870_v63, %v5869_v52 }
 0x351   : > { %v5872_v2 = vpop.f32.mrb[220].mxu0 }
 0x352   : > { %v5873_v57 = vpop.f32.mrb[221].mxu0 }
 0x353   : > { %v8867_v38 = vadd.f32 %v5873_v57, %v5872_v2  ;;  %v5875_v4 = vpop.f32.mrb[222].mxu0  ;;  %6439 = vmatmul.mubr.bf16.gmra.mrb[104].mxu1 %v8392_v14 }
 0x354   : > { %v5876_v24 = vpop.f32.mrb[223].mxu0  ;;  %6442 = vmatprep.mubr.bf16.mxu1 %v8436_v49 }
 0x355   : > { %v8871_v3 = vadd.f32 %v5876_v24, %v5875_v4 }
 0x359   : > { %v5918_v59 = vpop.f32.mrb[224].mxu0 }
 0x35a   : > { %v5919_v33 = vpop.f32.mrb[225].mxu0 }
 0x35b   : > { %v5920_v37 = vadd.f32 %v5919_v33, %v5918_v59  ;;  %v5921_v45 = vpop.f32.mrb[226].mxu0  ;;  %6443 = vmatmul.mubr.bf16.gmra.mrb[108].mxu1 %v8472_v40 }
 0x35c   : > { %v5922_v51 = vpop.f32.mrb[227].mxu0  ;;  %6446 = vmatprep.mubr.bf16.mxu1 %v8514_v20 }
 0x35d   : > { %v8876_v32 = vadd.f32 %v5920_v37, %v8764_v31  ;;  %v5923_v19 = vadd.f32 %v5922_v51, %v5921_v45 }
 0x35f   : > { %v8879_v14 = vadd.f32 %v5923_v19, %v8768_v50  ;;  %v4447_v50 = vrot.slane %v8715_v9, 2 }
 0x361   : > { %v5924_v30 = vpop.f32.mrb[228].mxu0 }
 0x362   : > { %v5925_v49 = vpop.f32.mrb[229].mxu0 }
 0x363   : > { %v5926_v34 = vadd.f32 %v5925_v49, %v5924_v30  ;;  %v5927_v43 = vpop.f32.mrb[230].mxu0  ;;  %6447 = vmatmul.mubr.bf16.gmra.mrb[112].mxu1 %v8550_v60 }
 0x364   : > { %v5928_v41 = vpop.f32.mrb[231].mxu0  ;;  %6450 = vmatprep.mubr.bf16.mxu1 %v8594_v16 }
 0x365   : > { %v8884_v40 = vadd.f32 %v5926_v34, %v8773_v54  ;;  %v5929_v20 = vadd.f32 %v5928_v41, %v5927_v43 }
 0x367   : > { %v8887_v31 = vadd.f32 %v5929_v20, %v8776_v56  ;;  %v4459_v56 = vrot.slane %v4447_v50, 7 }
 0x369   : > { %v5930_v46 = vpop.f32.mrb[232].mxu0 }
 0x36a   : > { %v5931_v22 = vpop.f32.mrb[233].mxu0 }
 0x36b   : > { %v5932_v58 = vadd.f32 %v5931_v22, %v5930_v46  ;;  %v5933_v17 = vpop.f32.mrb[234].mxu0  ;;  %6451 = vmatmul.mubr.bf16.gmra.mrb[116].mxu1 %v8629_v42  ;;  %v4461_v42 = vsel %vm591_vm1, %v4459_v56, %v4459_v56 }
 0x36c   : > { %v5934_v52 = vpop.f32.mrb[235].mxu0  ;;  %6454 = vmatprep.mubr.bf16.mxu1 %v8662_v12 }
 0x36d   : > { %v8893_v60 = vadd.f32 %v5932_v58, %v8782_v39  ;;  %v5935_v16 = vadd.f32 %v5934_v52, %v5933_v17 }
 0x36f   : > { %v8896_v54 = vadd.f32 %v5935_v16, %v8785_v8  ;;  %v4476_v8 = vpack.c.bf16 %v4459_v56, %v4461_v42 }
 0x371   : > { %v5936_v63 = vpop.f32.mrb[236].mxu0 }
 0x372   : > { %v5937_v2 = vpop.f32.mrb[237].mxu0 }
 0x373   : > { %v5938_v57 = vadd.f32 %v5937_v2, %v5936_v63  ;;  %v5939_v9 = vpop.f32.mrb[238].mxu0  ;;  %6455 = vmatmul.mubr.bf16.gmra.mrb[120].mxu1 %v8686_v7 }
 0x374   : > { %v5940_v4 = vpop.f32.mrb[239].mxu0  ;;  %6458 = vmatprep.mubr.bf16.mxu1 %v8712_v13 }
 0x375   : > { %v8902_v12 = vadd.f32 %v5938_v57, %v8790_v18  ;;  %v5941_v39 = vadd.f32 %v5940_v4, %v5939_v9 }
 0x377   : > { %v8905_v24 = vadd.f32 %v5941_v39, %v8793_v27 }
 0x379   : > { %v5942_v59 = vpop.f32.mrb[240].mxu0 }
 0x37a   : > { %v5943_v33 = vpop.f32.mrb[241].mxu0 }
 0x37b   : > { %v5944_v37 = vadd.f32 %v5943_v33, %v5942_v59  ;;  %v5945_v45 = vpop.f32.mrb[242].mxu0  ;;  %6459 = vmatmul.mubr.bf16.gmra.mrb[124].mxu1 %v4476_v8 }
 0x37c   : > { %v5946_v51 = vpop.f32.mrb[243].mxu0 }
 0x37d   : > { %v8908_v7 = vadd.f32 %v5944_v37, %v8799_v26  ;;  %v5947_v13 = vadd.f32 %v5946_v51, %v5945_v45 }
 0x37f   : > { %v8911_v19 = vadd.f32 %v5947_v13, %v8802_v0 }
 0x381   : > { %v5948_v18 = vpop.f32.mrb[244].mxu0 }
 0x382   : > { %v5949_v30 = vpop.f32.mrb[245].mxu0 }
 0x383   : > { %v5950_v49 = vadd.f32 %v5949_v30, %v5948_v18  ;;  %v5951_v34 = vpop.f32.mrb[246].mxu0 }
 0x384   : > { %v5952_v27 = vpop.f32.mrb[247].mxu0 }
 0x385   : > { %v8914_v43 = vadd.f32 %v5950_v49, %v8807_v10  ;;  %v5953_v41 = vadd.f32 %v5952_v27, %v5951_v34 }
 0x387   : > { %v8917_v20 = vadd.f32 %v5953_v41, %v8809_v28 }
 0x389   : > { %v5954_v46 = vpop.f32.mrb[248].mxu0 }
 0x38a   : > { %v5955_v50 = vpop.f32.mrb[249].mxu0 }
 0x38b   : > { %v5956_v26 = vadd.f32 %v5955_v50, %v5954_v46  ;;  %v5957_v22 = vpop.f32.mrb[250].mxu0 }
 0x38c   : > { %v5958_v58 = vpop.f32.mrb[251].mxu0 }
 0x38d   : > { %v8920_v0 = vadd.f32 %v5956_v26, %v8813_v48  ;;  %v5959_v17 = vadd.f32 %v5958_v58, %v5957_v22 }
 0x38f   : > { %v8923_v52 = vadd.f32 %v5959_v17, %v8815_v29 }
 0x391   : > { %v5960_v16 = vpop.f32.mrb[252].mxu0 }
 0x392   : > { %v5961_v56 = vpop.f32.mrb[253].mxu0 }
 0x393   : > { %v5962_v10 = vadd.f32 %v5961_v56, %v5960_v16  ;;  %v5963_v63 = vpop.f32.mrb[254].mxu0 }
 0x394   : > { %v5964_v2 = vpop.f32.mrb[255].mxu0 }
 0x395   : > { %v8926_v28 = vadd.f32 %v5962_v10, %v8819_v36  ;;  %v5965_v57 = vadd.f32 %v5964_v2, %v5963_v63 }
 0x396   : > { %v6054_v9 = vpop.f32.mrb[128].mxu1 }
 0x397   : > { %v8929_v4 = vadd.f32 %v5965_v57, %v8821_v15  ;;  %v6055_v42 = vpop.f32.mrb[129].mxu1 }
 0x398   : > { %v6056_v48 = vadd.f32 %v6055_v42, %v6054_v9  ;;  %v6057_v39 = vpop.f32.mrb[130].mxu1 }
 0x399   : > { %v5966_v8 = vpop.f32.mrb[0].mxu0  ;;  %v6058_v59 = vpop.f32.mrb[131].mxu1 }
 0x39a   : > { %v5967_v29 = vpop.f32.mrb[1].mxu0  ;;  %v6059_v33 = vadd.f32 %v6058_v59, %v6057_v39  ;;  %v8932_v37 = vadd.f32 %v8876_v32, %v6056_v48 }
 0x39b   : > { %v5968_v45 = vadd.f32 %v5967_v29, %v5966_v8  ;;  %v5969_v51 = vpop.f32.mrb[2].mxu0 }
 0x39c   : > { %v5970_v13 = vpop.f32.mrb[3].mxu0  ;;  %v8935_v36 = vadd.f32 %v8879_v14, %v6059_v33 }
 0x39d   : > { %v8938_v18 = vadd.f32 %v5968_v45, %v8825_v21  ;;  %v5971_v15 = vadd.f32 %v5970_v13, %v5969_v51 }
 0x39e   : > { %v6060_v30 = vpop.f32.mrb[132].mxu1 }
 0x39f   : > { %v8941_v49 = vadd.f32 %v5971_v15, %v8827_v5  ;;  %v6061_v34 = vpop.f32.mrb[133].mxu1 }
 0x3a0   : > { %v6062_v27 = vadd.f32 %v6061_v34, %v6060_v30  ;;  %v6063_v41 = vpop.f32.mrb[134].mxu1 }
 0x3a1   : > { %v5972_v46 = vpop.f32.mrb[4].mxu0  ;;  %v6064_v32 = vpop.f32.mrb[135].mxu1 }
 0x3a2   : > { %v5973_v50 = vpop.f32.mrb[5].mxu0  ;;  %v6065_v26 = vadd.f32 %v6064_v32, %v6063_v41  ;;  %v8944_v22 = vadd.f32 %v8884_v40, %v6062_v27 }
 0x3a3   : > { %v5974_v14 = vadd.f32 %v5973_v50, %v5972_v46  ;;  %v5975_v58 = vpop.f32.mrb[6].mxu0 }
 0x3a4   : > { %v5976_v17 = vpop.f32.mrb[7].mxu0  ;;  %v8947_v21 = vadd.f32 %v8887_v31, %v6065_v26 }
 0x3a5   : > { %v8950_v16 = vadd.f32 %v5974_v14, %v8831_v35  ;;  %v5977_v5 = vadd.f32 %v5976_v17, %v5975_v58 }
 0x3a6   : > { %v6066_v56 = vpop.f32.mrb[136].mxu1 }
 0x3a7   : > { %v8953_v10 = vadd.f32 %v5977_v5, %v8833_v11  ;;  %v6067_v63 = vpop.f32.mrb[137].mxu1 }
 0x3a8   : > { %v6068_v2 = vadd.f32 %v6067_v63, %v6066_v56  ;;  %v6069_v57 = vpop.f32.mrb[138].mxu1 }
 0x3a9   : > { %v5978_v9 = vpop.f32.mrb[8].mxu0  ;;  %v6070_v40 = vpop.f32.mrb[139].mxu1 }
 0x3aa   : > { %v5979_v42 = vpop.f32.mrb[9].mxu0  ;;  %v6071_v48 = vadd.f32 %v6070_v40, %v6069_v57  ;;  %v8956_v39 = vadd.f32 %v8893_v60, %v6068_v2 }
 0x3ab   : > { %v5980_v31 = vadd.f32 %v5979_v42, %v5978_v9  ;;  %v5981_v8 = vpop.f32.mrb[10].mxu0 }
 0x3ac   : > { %v5982_v59 = vpop.f32.mrb[11].mxu0  ;;  %v8959_v35 = vadd.f32 %v8896_v54, %v6071_v48 }
 0x3ad   : > { %v8962_v29 = vadd.f32 %v5980_v31, %v8837_v61  ;;  %v5983_v11 = vadd.f32 %v5982_v59, %v5981_v8 }
 0x3ae   : > { %v6072_v33 = vpop.f32.mrb[140].mxu1 }
 0x3af   : > { %v8965_v45 = vadd.f32 %v5983_v11, %v8840_v6  ;;  %v6073_v51 = vpop.f32.mrb[141].mxu1 }
 0x3b0   : > { %v6074_v13 = vadd.f32 %v6073_v51, %v6072_v33  ;;  %v6075_v15 = vpop.f32.mrb[142].mxu1 }
 0x3b1   : > { %v5984_v30 = vpop.f32.mrb[12].mxu0  ;;  %v6076_v60 = vpop.f32.mrb[143].mxu1 }
 0x3b2   : > { %v5985_v34 = vpop.f32.mrb[13].mxu0  ;;  %v6077_v27 = vadd.f32 %v6076_v60, %v6075_v15  ;;  %v8968_v41 = vadd.f32 %v8902_v12, %v6074_v13 }
 0x3b3   : > { %v5986_v54 = vadd.f32 %v5985_v34, %v5984_v30  ;;  %v5987_v46 = vpop.f32.mrb[14].mxu0 }
 0x3b4   : > { %v5988_v32 = vpop.f32.mrb[15].mxu0  ;;  %v8971_v61 = vadd.f32 %v8905_v24, %v6077_v27 }
 0x3b5   : > { %v8974_v50 = vadd.f32 %v5986_v54, %v8843_v47  ;;  %v5989_v6 = vadd.f32 %v5988_v32, %v5987_v46 }
 0x3b6   : > { %v6078_v26 = vpop.f32.mrb[144].mxu1 }
 0x3b7   : > { %v8977_v14 = vadd.f32 %v5989_v6, %v8846_v53  ;;  %v6079_v58 = vpop.f32.mrb[145].mxu1 }
 0x3b8   : > { %v6080_v17 = vadd.f32 %v6079_v58, %v6078_v26  ;;  %v6081_v5 = vpop.f32.mrb[146].mxu1 }
 0x3b9   : > { %v5990_v56 = vpop.f32.mrb[16].mxu0  ;;  %v6082_v12 = vpop.f32.mrb[147].mxu1 }
 0x3ba   : > { %v5991_v63 = vpop.f32.mrb[17].mxu0  ;;  %v6083_v2 = vadd.f32 %v6082_v12, %v6081_v5  ;;  %v8980_v57 = vadd.f32 %v8908_v7, %v6080_v17 }
 0x3bb   : > { %v5992_v24 = vadd.f32 %v5991_v63, %v5990_v56  ;;  %v5993_v9 = vpop.f32.mrb[18].mxu0 }
 0x3bc   : > { %v5994_v40 = vpop.f32.mrb[19].mxu0  ;;  %v8983_v47 = vadd.f32 %v8911_v19, %v6083_v2 }
 0x3bd   : > { %v8986_v42 = vadd.f32 %v5992_v24, %v8849_v62  ;;  %v5995_v53 = vadd.f32 %v5994_v40, %v5993_v9 }
 0x3be   : > { %v6084_v48 = vpop.f32.mrb[148].mxu1 }
 0x3bf   : > { %v8989_v31 = vadd.f32 %v5995_v53, %v8853_v25  ;;  %v6085_v8 = vpop.f32.mrb[149].mxu1 }
 0x3c0   : > { %v6086_v59 = vadd.f32 %v6085_v8, %v6084_v48  ;;  %v6087_v11 = vpop.f32.mrb[150].mxu1 }
 0x3c1   : > { %v5996_v33 = vpop.f32.mrb[20].mxu0  ;;  %v6088_v7 = vpop.f32.mrb[151].mxu1 }
 0x3c2   : > { %v5997_v51 = vpop.f32.mrb[21].mxu0  ;;  %v6089_v13 = vadd.f32 %v6088_v7, %v6087_v11  ;;  %v8992_v15 = vadd.f32 %v8914_v43, %v6086_v59 }
 0x3c3   : > { %v5998_v19 = vadd.f32 %v5997_v51, %v5996_v33  ;;  %v5999_v30 = vpop.f32.mrb[22].mxu0 }
 0x3c4   : > { %v6000_v60 = vpop.f32.mrb[23].mxu0  ;;  %v8995_v62 = vadd.f32 %v8917_v20, %v6089_v13 }
 0x3c5   : > { %v8998_v34 = vadd.f32 %v5998_v19, %v8855_v55  ;;  %v6001_v25 = vadd.f32 %v6000_v60, %v5999_v30 }
 0x3c6   : > { %v6090_v27 = vpop.f32.mrb[152].mxu1 }
 0x3c7   : > { %v9001_v54 = vadd.f32 %v6001_v25, %v8859_v1  ;;  %v6091_v46 = vpop.f32.mrb[153].mxu1 }
 0x3c8   : > { %v6092_v32 = vadd.f32 %v6091_v46, %v6090_v27  ;;  %v6093_v6 = vpop.f32.mrb[154].mxu1 }
 0x3c9   : > { %v6002_v26 = vpop.f32.mrb[24].mxu0  ;;  %v6094_v43 = vpop.f32.mrb[155].mxu1 }
 0x3ca   : > { %v6003_v58 = vpop.f32.mrb[25].mxu0  ;;  %v6095_v17 = vadd.f32 %v6094_v43, %v6093_v6  ;;  %v9004_v5 = vadd.f32 %v8920_v0, %v6092_v32 }
 0x3cb   : > { %v6004_v20 = vadd.f32 %v6003_v58, %v6002_v26  ;;  %v6005_v56 = vpop.f32.mrb[26].mxu0 }
 0x3cc   : > { %v6006_v12 = vpop.f32.mrb[27].mxu0  ;;  %v9007_v55 = vadd.f32 %v8923_v52, %v6095_v17 }
 0x3cd   : > { %v9010_v63 = vadd.f32 %v6004_v20, %v8861_v23  ;;  %v6007_v1 = vadd.f32 %v6006_v12, %v6005_v56 }
 0x3ce   : > { %v6096_v2 = vpop.f32.mrb[156].mxu1 }
 0x3cf   : > { %v9013_v24 = vadd.f32 %v6007_v1, %v8865_v44  ;;  %v6097_v9 = vpop.f32.mrb[157].mxu1 }
 0x3d0   : > { %v6098_v40 = vadd.f32 %v6097_v9, %v6096_v2  ;;  %v6099_v53 = vpop.f32.mrb[158].mxu1 }
 0x3d1   : > { %v6008_v48 = vpop.f32.mrb[28].mxu0  ;;  %v6100_v0 = vpop.f32.mrb[159].mxu1 }
 0x3d2   : > { %v6009_v8 = vpop.f32.mrb[29].mxu0  ;;  %v6101_v59 = vadd.f32 %v6100_v0, %v6099_v53  ;;  %v9016_v11 = vadd.f32 %v8926_v28, %v6098_v40 }
 0x3d3   : > { %v6010_v52 = vadd.f32 %v6009_v8, %v6008_v48  ;;  %v6011_v33 = vpop.f32.mrb[30].mxu0 }
 0x3d4   : > { %v6012_v7 = vpop.f32.mrb[31].mxu0  ;;  %v9019_v23 = vadd.f32 %v8929_v4, %v6101_v59 }
 0x3d5   : > { %v9022_v51 = vadd.f32 %v6010_v52, %v8867_v38  ;;  %v6013_v44 = vadd.f32 %v6012_v7, %v6011_v33 }
 0x3d6   : > { %v6102_v13 = vpop.f32.mrb[160].mxu1 }
 0x3d7   : > { %v9025_v19 = vadd.f32 %v6013_v44, %v8871_v3  ;;  %v6103_v30 = vpop.f32.mrb[161].mxu1 }
 0x3d8   : > { %v6104_v60 = vadd.f32 %v6103_v30, %v6102_v13  ;;  %v6105_v25 = vpop.f32.mrb[162].mxu1 }
 0x3d9   : > { %v6106_v27 = vpop.f32.mrb[163].mxu1 }
 0x3da   : > { %v6107_v28 = vadd.f32 %v6106_v27, %v6105_v25  ;;  %v9028_v46 = vadd.f32 %v8938_v18, %v6104_v60 }
 0x3dc   : > { %v9031_v32 = vadd.f32 %v8941_v49, %v6107_v28 }
 0x3de   : > { %v6108_v4 = vpop.f32.mrb[164].mxu1 }
 0x3df   : > { %v6109_v6 = vpop.f32.mrb[165].mxu1 }
 0x3e0   : > { %v6110_v38 = vadd.f32 %v6109_v6, %v6108_v4  ;;  %v6111_v26 = vpop.f32.mrb[166].mxu1 }
 0x3e1   : > { %v6112_v43 = vpop.f32.mrb[167].mxu1 }
 0x3e2   : > { %v6113_v58 = vadd.f32 %v6112_v43, %v6111_v26  ;;  %v9034_v3 = vadd.f32 %v8950_v16, %v6110_v38 }
 0x3e4   : > { %v9037_v17 = vadd.f32 %v8953_v10, %v6113_v58 }
 0x3e6   : > { %v6114_v20 = vpop.f32.mrb[168].mxu1 }
 0x3e7   : > { %v6115_v56 = vpop.f32.mrb[169].mxu1 }
 0x3e8   : > { %v6116_v12 = vadd.f32 %v6115_v56, %v6114_v20  ;;  %v6117_v18 = vpop.f32.mrb[170].mxu1 }
 0x3e9   : > { %v6118_v1 = vpop.f32.mrb[171].mxu1 }
 0x3ea   : > { %v6119_v2 = vadd.f32 %v6118_v1, %v6117_v18  ;;  %v9040_v49 = vadd.f32 %v8962_v29, %v6116_v12 }
 0x3ec   : > { %v9043_v9 = vadd.f32 %v8965_v45, %v6119_v2 }
 0x3ee   : > { %v6120_v40 = vpop.f32.mrb[172].mxu1 }
 0x3ef   : > { %v6121_v53 = vpop.f32.mrb[173].mxu1 }
 0x3f0   : > { %v6122_v48 = vadd.f32 %v6121_v53, %v6120_v40  ;;  %v6123_v16 = vpop.f32.mrb[174].mxu1 }
 0x3f1   : > { %v6124_v0 = vpop.f32.mrb[175].mxu1 }
 0x3f2   : > { %v6125_v8 = vadd.f32 %v6124_v0, %v6123_v16  ;;  %v9046_v10 = vadd.f32 %v8974_v50, %v6122_v48 }
 0x3f4   : > { %v9049_v59 = vadd.f32 %v8977_v14, %v6125_v8 }
 0x3f6   : > { %v6126_v52 = vpop.f32.mrb[176].mxu1 }
 0x3f7   : > { %v6127_v33 = vpop.f32.mrb[177].mxu1 }
 0x3f8   : > { %v6128_v7 = vadd.f32 %v6127_v33, %v6126_v52  ;;  %v6129_v29 = vpop.f32.mrb[178].mxu1 }
 0x3f9   : > { %v6130_v44 = vpop.f32.mrb[179].mxu1 }
 0x3fa   : > { %v6131_v13 = vadd.f32 %v6130_v44, %v6129_v29  ;;  %v9052_v45 = vadd.f32 %v8986_v42, %v6128_v7 }
 0x3fc   : > { %v9055_v30 = vadd.f32 %v8989_v31, %v6131_v13 }
 0x3fe   : > { %v6132_v60 = vpop.f32.mrb[180].mxu1 }
 0x3ff   : > { %v6133_v25 = vpop.f32.mrb[181].mxu1 }
 0x400   : > { %v6134_v27 = vadd.f32 %v6133_v25, %v6132_v60  ;;  %v6135_v50 = vpop.f32.mrb[182].mxu1 }
 0x401   : > { %v6136_v28 = vpop.f32.mrb[183].mxu1 }
 0x402   : > { %v6137_v4 = vadd.f32 %v6136_v28, %v6135_v50  ;;  %v9058_v14 = vadd.f32 %v8998_v34, %v6134_v27 }
 0x404   : > { %v9061_v6 = vadd.f32 %v9001_v54, %v6137_v4 }
 0x406   : > { %v6138_v38 = vpop.f32.mrb[184].mxu1 }
 0x407   : > { %v6139_v26 = vpop.f32.mrb[185].mxu1 }
 0x408   : > { %v6140_v43 = vadd.f32 %v6139_v26, %v6138_v38  ;;  %v6141_v42 = vpop.f32.mrb[186].mxu1 }
 0x409   : > { %v6142_v58 = vpop.f32.mrb[187].mxu1 }
 0x40a   : > { %v6143_v20 = vadd.f32 %v6142_v58, %v6141_v42  ;;  %v9064_v31 = vadd.f32 %v9010_v63, %v6140_v43  ;;  %v9078_v63 = vld [vmem:[%s9220_s2 + $0x1] ss:$0 sm:$0xff] }
 0x40c   : > { %v9067_v56 = vadd.f32 %v9013_v24, %v6143_v20 }
 0x40e   : > { %v6144_v12 = vpop.f32.mrb[188].mxu1 }
 0x40f   : > { %v6145_v18 = vpop.f32.mrb[189].mxu1 }
 0x410   : > { %v6146_v34 = vadd.f32 %v6145_v18, %v6144_v12  ;;  %v6147_v1 = vpop.f32.mrb[190].mxu1 }
 0x411   : > { %v6148_v2 = vpop.f32.mrb[191].mxu1 }
 0x412   : > { %v6149_v54 = vadd.f32 %v6148_v2, %v6147_v1  ;;  %v9070_v40 = vadd.f32 %v9022_v51, %v6146_v34 }
 0x414   : > { %v9073_v53 = vadd.f32 %v9025_v19, %v6149_v54 }
 0x416   : > { %v6432_v48 = vpop.f32.mrb[96].mxu1 }
 0x417   : > { %v6592_v24 = vadd.f32 %v8944_v22, %v6432_v48  ;;  %v4865_v16 = vpop.f32.mrb[97].mxu1 }
 0x418   : > { %v6595_v0 = vadd.f32 %v8932_v37, %v4865_v16  ;;  %v6433_v8 = vpop.f32.mrb[98].mxu1 }
 0x419   : > { %v5034_v52 = vadd.f32 %v6592_v24, %v9078_v63  ;;  %v6598_v51 = vadd.f32 %v8947_v21, %v6433_v8  ;;  %v4868_v33 = vpop.f32.mrb[99].mxu1 }
 0x41a   : > { %v5032_v22 = vadd.f32 %v6595_v0, %v9078_v63  ;;  %v6601_v37 = vadd.f32 %v8935_v36, %v4868_v33 }
 0x41b   : > { %v5066_v19 = vmax.f32 %v5034_v52, 0.0  ;;  %v5035_v7 = vadd.f32 %v6598_v51, %v9078_v63 }
 0x41c   : > { %v5064_v21 = vmax.f32 %v5032_v22, 0.0  ;;  %v5033_v29 = vadd.f32 %v6601_v37, %v9078_v63 }
 0x41d   : > { %5099 = vst.msk [vmem:[%s9089_s17 + $0x10] sm:$0xff] %vm5096_vm4, %v5066_v19  ;;  %v5067_v44 = vmax.f32 %v5035_v7, 0.0 }
 0x41e   : > { %5097 = vst.msk [vmem:[%s9089_s17] sm:$0xff] %vm5096_vm4, %v5064_v21  ;;  %v5065_v13 = vmax.f32 %v5033_v29, 0.0  ;;  %v6436_v60 = vpop.f32.mrb[100].mxu1 }
 0x41f   : > { %5100 = vst.msk [vmem:[%s9089_s17 + $0x18] sm:$0xff] %vm5096_vm4, %v5067_v44  ;;  %v6604_v25 = vadd.f32 %v8968_v41, %v6436_v60  ;;  %v4881_v36 = vpop.f32.mrb[101].mxu1 }
 0x420   : > { %5098 = vst.msk [vmem:[%s9089_s17 + $0x8] sm:$0xff] %vm5096_vm4, %v5065_v13  ;;  %v6607_v27 = vadd.f32 %v8956_v39, %v4881_v36  ;;  %v6437_v50 = vpop.f32.mrb[102].mxu1 }
 0x421   : > { %v5038_v28 = vadd.f32 %v6604_v25, %v9078_v63  ;;  %v6610_v4 = vadd.f32 %v8971_v61, %v6437_v50  ;;  %v4884_v38 = vpop.f32.mrb[103].mxu1 }
 0x422   : > { %v5036_v26 = vadd.f32 %v6607_v27, %v9078_v63  ;;  %v6613_v43 = vadd.f32 %v8959_v35, %v4884_v38 }
 0x423   : > { %v5070_v42 = vmax.f32 %v5038_v28, 0.0  ;;  %v5039_v41 = vadd.f32 %v6610_v4, %v9078_v63 }
 0x424   : > { %v5068_v58 = vmax.f32 %v5036_v26, 0.0  ;;  %v5037_v20 = vadd.f32 %v6613_v43, %v9078_v63 }
 0x425   : > { %5103 = vst.msk [vmem:[%s9089_s17 + $0x30] sm:$0xff] %vm5096_vm4, %v5070_v42  ;;  %v5071_v39 = vmax.f32 %v5039_v41, 0.0 }
 0x426   : > { %5101 = vst.msk [vmem:[%s9089_s17 + $0x20] sm:$0xff] %vm5096_vm4, %v5068_v58  ;;  %v5069_v12 = vmax.f32 %v5037_v20, 0.0  ;;  %v6440_v18 = vpop.f32.mrb[104].mxu1 }
 0x427   : > { %5104 = vst.msk [vmem:[%s9089_s17 + $0x38] sm:$0xff] %vm5096_vm4, %v5071_v39  ;;  %v6616_v61 = vadd.f32 %v8992_v15, %v6440_v18  ;;  %v4897_v35 = vpop.f32.mrb[105].mxu1 }
 0x428   : > { %5102 = vst.msk [vmem:[%s9089_s17 + $0x28] sm:$0xff] %vm5096_vm4, %v5069_v12  ;;  %v6619_v34 = vadd.f32 %v8980_v57, %v4897_v35  ;;  %v6441_v1 = vpop.f32.mrb[106].mxu1 }
 0x429   : > { %v5042_v2 = vadd.f32 %v6616_v61, %v9078_v63  ;;  %v6622_v54 = vadd.f32 %v8995_v62, %v6441_v1  ;;  %v4900_v48 = vpop.f32.mrb[107].mxu1 }
 0x42a   : > { %v5040_v24 = vadd.f32 %v6619_v34, %v9078_v63  ;;  %v6625_v16 = vadd.f32 %v8983_v47, %v4900_v48 }
 0x42b   : > { %v5074_v0 = vmax.f32 %v5042_v2, 0.0  ;;  %v5043_v15 = vadd.f32 %v6622_v54, %v9078_v63 }
 0x42c   : > { %v5072_v8 = vmax.f32 %v5040_v24, 0.0  ;;  %v5041_v52 = vadd.f32 %v6625_v16, %v9078_v63 }
 0x42d   : > { %5107 = vst.msk [vmem:[%s9089_s17 + $0x50] sm:$0xff] %vm5096_vm4, %v5074_v0  ;;  %v5075_v57 = vmax.f32 %v5043_v15, 0.0 }
 0x42e   : > { %5105 = vst.msk [vmem:[%s9089_s17 + $0x40] sm:$0xff] %vm5096_vm4, %v5072_v8  ;;  %v5073_v51 = vmax.f32 %v5041_v52, 0.0  ;;  %v6444_v33 = vpop.f32.mrb[108].mxu1 }
 0x42f   : > { %5108 = vst.msk [vmem:[%s9089_s17 + $0x58] sm:$0xff] %vm5096_vm4, %v5075_v57  ;;  %v6628_v62 = vadd.f32 %v9016_v11, %v6444_v33  ;;  %v4913_v47 = vpop.f32.mrb[109].mxu1 }
 0x430   : > { %5106 = vst.msk [vmem:[%s9089_s17 + $0x48] sm:$0xff] %vm5096_vm4, %v5073_v51  ;;  %v6631_v22 = vadd.f32 %v9004_v5, %v4913_v47  ;;  %v6445_v37 = vpop.f32.mrb[110].mxu1 }
 0x431   : > { %v5046_v19 = vadd.f32 %v6628_v62, %v9078_v63  ;;  %v6634_v7 = vadd.f32 %v9019_v23, %v6445_v37  ;;  %v4916_v21 = vpop.f32.mrb[111].mxu1 }
 0x432   : > { %v5044_v29 = vadd.f32 %v6631_v22, %v9078_v63  ;;  %v6637_v44 = vadd.f32 %v9007_v55, %v4916_v21 }
 0x433   : > { %v5078_v13 = vmax.f32 %v5046_v19, 0.0  ;;  %v5047_v11 = vadd.f32 %v6634_v7, %v9078_v63 }
 0x434   : > { %v5076_v60 = vmax.f32 %v5044_v29, 0.0  ;;  %v5045_v25 = vadd.f32 %v6637_v44, %v9078_v63 }
 0x435   : > { %5111 = vst.msk [vmem:[%s9089_s17 + $0x70] sm:$0xff] %vm5096_vm4, %v5078_v13  ;;  %v5079_v5 = vmax.f32 %v5047_v11, 0.0 }
 0x436   : > { %5109 = vst.msk [vmem:[%s9089_s17 + $0x60] sm:$0xff] %vm5096_vm4, %v5076_v60  ;;  %v5077_v36 = vmax.f32 %v5045_v25, 0.0  ;;  %v6448_v27 = vpop.f32.mrb[112].mxu1 }
 0x437   : > { %5112 = vst.msk [vmem:[%s9089_s17 + $0x78] sm:$0xff] %vm5096_vm4, %v5079_v5  ;;  %v6640_v23 = vadd.f32 %v9034_v3, %v6448_v27  ;;  %v4929_v55 = vpop.f32.mrb[113].mxu1 }
 0x438   : > { %5110 = vst.msk [vmem:[%s9089_s17 + $0x68] sm:$0xff] %vm5096_vm4, %v5077_v36  ;;  %v6643_v50 = vadd.f32 %v9028_v46, %v4929_v55  ;;  %v6449_v28 = vpop.f32.mrb[114].mxu1 }
 0x439   : > { %v5050_v4 = vadd.f32 %v6640_v23, %v9078_v63  ;;  %v6646_v38 = vadd.f32 %v9037_v17, %v6449_v28  ;;  %v4932_v26 = vpop.f32.mrb[115].mxu1 }
 0x43a   : > { %v5048_v43 = vadd.f32 %v6643_v50, %v9078_v63  ;;  %v6649_v42 = vadd.f32 %v9031_v32, %v4932_v26 }
 0x43b   : > { %v5082_v41 = vmax.f32 %v5050_v4, 0.0  ;;  %v5051_v3 = vadd.f32 %v6646_v38, %v9078_v63 }
 0x43c   : > { %v5080_v58 = vmax.f32 %v5048_v43, 0.0  ;;  %v5049_v20 = vadd.f32 %v6649_v42, %v9078_v63 }
 0x43d   : > { %5115 = vst.msk [vmem:[%s9089_s17 + $0x90] sm:$0xff] %vm5096_vm4, %v5082_v41  ;;  %v5083_v46 = vmax.f32 %v5051_v3, 0.0 }
 0x43e   : > { %5113 = vst.msk [vmem:[%s9089_s17 + $0x80] sm:$0xff] %vm5096_vm4, %v5080_v58  ;;  %v5081_v39 = vmax.f32 %v5049_v20, 0.0  ;;  %v6452_v12 = vpop.f32.mrb[116].mxu1 }
 0x43f   : > { %5116 = vst.msk [vmem:[%s9089_s17 + $0x98] sm:$0xff] %vm5096_vm4, %v5083_v46  ;;  %v6652_v17 = vadd.f32 %v9046_v10, %v6452_v12  ;;  %v4945_v32 = vpop.f32.mrb[117].mxu1 }
 0x440   : > { %5114 = vst.msk [vmem:[%s9089_s17 + $0x88] sm:$0xff] %vm5096_vm4, %v5081_v39  ;;  %v6655_v18 = vadd.f32 %v9040_v49, %v4945_v32  ;;  %v6453_v61 = vpop.f32.mrb[118].mxu1 }
 0x441   : > { %v5054_v35 = vadd.f32 %v6652_v17, %v9078_v63  ;;  %v6658_v34 = vadd.f32 %v9049_v59, %v6453_v61  ;;  %v4948_v1 = vpop.f32.mrb[119].mxu1 }
 0x442   : > { %v5052_v2 = vadd.f32 %v6655_v18, %v9078_v63  ;;  %v6661_v54 = vadd.f32 %v9043_v9, %v4948_v1 }
 0x443   : > { %v5086_v48 = vmax.f32 %v5054_v35, 0.0  ;;  %v5055_v10 = vadd.f32 %v6658_v34, %v9078_v63 }
 0x444   : > { %v5084_v24 = vmax.f32 %v5052_v2, 0.0  ;;  %v5053_v16 = vadd.f32 %v6661_v54, %v9078_v63 }
 0x445   : > { %5119 = vst.msk [vmem:[%s9089_s17 + $0xb0] sm:$0xff] %vm5096_vm4, %v5086_v48  ;;  %v5087_v49 = vmax.f32 %v5055_v10, 0.0 }
 0x446   : > { %5117 = vst.msk [vmem:[%s9089_s17 + $0xa0] sm:$0xff] %vm5096_vm4, %v5084_v24  ;;  %v5085_v0 = vmax.f32 %v5053_v16, 0.0  ;;  %v6456_v15 = vpop.f32.mrb[120].mxu1 }
 0x447   : > { %5120 = vst.msk [vmem:[%s9089_s17 + $0xb8] sm:$0xff] %vm5096_vm4, %v5087_v49  ;;  %v6664_v59 = vadd.f32 %v9058_v14, %v6456_v15  ;;  %v4961_v9 = vpop.f32.mrb[121].mxu1 }
 0x448   : > { %5118 = vst.msk [vmem:[%s9089_s17 + $0xa8] sm:$0xff] %vm5096_vm4, %v5085_v0  ;;  %v6667_v8 = vadd.f32 %v9052_v45, %v4961_v9  ;;  %v6457_v52 = vpop.f32.mrb[122].mxu1 }
 0x449   : > { %v5058_v57 = vadd.f32 %v6664_v59, %v9078_v63  ;;  %v6670_v51 = vadd.f32 %v9061_v6, %v6457_v52  ;;  %v4964_v33 = vpop.f32.mrb[123].mxu1 }
 0x44a   : > { %v5056_v62 = vadd.f32 %v6667_v8, %v9078_v63  ;;  %v6673_v47 = vadd.f32 %v9055_v30, %v4964_v33 }
 0x44b   : > { %v5090_v22 = vmax.f32 %v5058_v57, 0.0  ;;  %v5059_v14 = vadd.f32 %v6670_v51, %v9078_v63 }
 0x44c   : > { %v5088_v37 = vmax.f32 %v5056_v62, 0.0  ;;  %v5057_v19 = vadd.f32 %v6673_v47, %v9078_v63 }
 0x44d   : > { %5123 = vst.msk [vmem:[%s9089_s17 + $0xd0] sm:$0xff] %vm5096_vm4, %v5090_v22  ;;  %v5091_v45 = vmax.f32 %v5059_v14, 0.0 }
 0x44e   : > { %5121 = vst.msk [vmem:[%s9089_s17 + $0xc0] sm:$0xff] %vm5096_vm4, %v5088_v37  ;;  %v5089_v7 = vmax.f32 %v5057_v19, 0.0  ;;  %v6460_v21 = vpop.f32.mrb[124].mxu1 }
 0x44f   : > { %5124 = vst.msk [vmem:[%s9089_s17 + $0xd8] sm:$0xff] %vm5096_vm4, %v5091_v45  ;;  %v6676_v6 = vadd.f32 %v9070_v40, %v6460_v21  ;;  %v4977_v30 = vpop.f32.mrb[125].mxu1 }
 0x450   : > { %5122 = vst.msk [vmem:[%s9089_s17 + $0xc8] sm:$0xff] %vm5096_vm4, %v5089_v7  ;;  %v6679_v29 = vadd.f32 %v9064_v31, %v4977_v30  ;;  %v6461_v44 = vpop.f32.mrb[126].mxu1 }
 0x451   : > { %v5062_v13 = vadd.f32 %v6676_v6, %v9078_v63  ;;  %v6682_v11 = vadd.f32 %v9073_v53, %v6461_v44  ;;  %v4980_v60 = vpop.f32.mrb[127].mxu1 }
 0x452   : > { %v5060_v25 = vadd.f32 %v6679_v29, %v9078_v63  ;;  %v6685_v5 = vadd.f32 %v9067_v56, %v4980_v60 }
 0x453   : > { %v5094_v36 = vmax.f32 %v5062_v13, 0.0  ;;  %v5063_v40 = vadd.f32 %v6682_v11, %v9078_v63 }
 0x454   : > { %v5092_v27 = vmax.f32 %v5060_v25, 0.0  ;;  %v5061_v23 = vadd.f32 %v6685_v5, %v9078_v63 }
 0x455   : > { %5127 = vst.msk [vmem:[%s9089_s17 + $0xf0] sm:$0xff] %vm5096_vm4, %v5094_v36  ;;  %v5095_v31 = vmax.f32 %v5063_v40, 0.0 }
 0x456   : > { %5125 = vst.msk [vmem:[%s9089_s17 + $0xe0] sm:$0xff] %vm5096_vm4, %v5092_v27  ;;  %v5093_v55 = vmax.f32 %v5061_v23, 0.0 }
 0x457   : > { %5128 = vst.msk [vmem:[%s9089_s17 + $0xf8] sm:$0xff] %vm5096_vm4, %v5095_v31 }
 0x458   : > { %5126 = vst.msk [vmem:[%s9089_s17 + $0xe8] sm:$0xff] %vm5096_vm4, %v5093_v55 }
 0x459 PF: > { %s14_s12 = sadd.s32 1, %s6994_s12  }
 0x45a   : > { %p11_p3 = scmp.ge.s32.totalorder %s14_s12, 4  }
 0x45c   :  { %13 = sbr.rel (!%p11_p3) target bundleno = 1 (0x1), region = 74 }
 0x463   :  { %5150 = vsyncpa [#allocation4], 1 }
 0x464   :  { %5152 = vsyncpa [#allocation4 + $0x1], 1 }

</bundles_post_ra>
